<compile_context>
chip_gen: v7x
topology: tpu7x:2x2x1
jax: 0.10.0
libtpu: 0.0.40
codegen_flags: <defaults>
</compile_context>

<pallas_src>
import functools

import jax
import jax.numpy as jnp
from jax.experimental import pallas as pl
from jax.experimental.pallas import tpu as pltpu

BN_EPS = 1e-5


# ---------------------------------------------------------------------------
# Kernel A: conv1 (7x7, stride 2, pad 3) + folded BatchNorm + ReLU
# ---------------------------------------------------------------------------
def _conv_bn_relu_kernel(xe_ref, w_ref, b_ref, o_ref, *, ho, wo):
    """One batch element.

    xe_ref: (1, ho+3, wo+3, 4*cin) bf16  stride-2 space-to-depth of the pad-3 input
    w_ref : (16, 4*cin, cout)      bf16  tap-major repacked conv weight, BN scale folded
    b_ref : (1, cout)              f32   BN-folded bias
    o_ref : (1, ho*wo, cout)       f32   ReLU(conv + bias), rows ordered (i, j)
    """
    xe = xe_ref[0]                                   # (ho+3, wo+3, 4*cin)
    kdim = xe.shape[-1]
    cout = o_ref.shape[-1]
    acc = jnp.zeros((ho * wo, cout), jnp.float32)
    # 7x7/stride-2 conv == 4x4/stride-1 conv on the parity-packed planes:
    # 16 contiguous taps, each an MXU matmul accumulated in f32.
    for di in range(4):
        for dj in range(4):
            tap = xe[di:di + ho, dj:dj + wo, :].reshape(ho * wo, kdim)
            acc = acc + jnp.dot(tap, w_ref[di * 4 + dj],
                                preferred_element_type=jnp.float32)
    o_ref[0] = jnp.maximum(acc + b_ref[...], 0.0)


# ---------------------------------------------------------------------------
# Kernel B: max pool 3x3 / stride 2 / pad 1
# ---------------------------------------------------------------------------
def _maxpool3s2_kernel(ys_ref, o_ref, *, hp, wp, c):
    """One batch element.

    ys_ref: (1, hp+1, wp+1, 4*c) f32  zero-padded(1) + stride-2 space-to-depth of the
                                      (non-negative) ReLU output
    o_ref : (1, hp, wp, c)       f32
    """
    ys = ys_ref[0]
    out = None
    # window offset k in {0,1,2} -> (block shift d, parity p) = (k // 2, k % 2)
    for di, pi in ((0, 0), (0, 1), (1, 0)):
        for dj, pj in ((0, 0), (0, 1), (1, 0)):
            off = (pi * 2 + pj) * c
            t = ys[di:di + hp, dj:dj + wp, off:off + c]
            out = t if out is None else jnp.maximum(out, t)
    o_ref[0] = out


# ---------------------------------------------------------------------------
# Forward pass
# ---------------------------------------------------------------------------
@jax.jit
def thermal_module_forward(x, params):
    """x: (B, 3, H, W) NCHW float32 -> (B, 64, H//4, W//4) NCHW float32."""
    B, cin, H, W = x.shape
    cout = params["conv_w"].shape[0]
    assert H % 2 == 0 and W % 2 == 0, "even spatial dims assumed"
    ho, wo = H // 2, W // 2            # conv1 output spatial (k7, s2, p3)
    hp, wp = ho // 2, wo // 2          # maxpool output spatial (k3, s2, p1)
    hh, wh = ho + 3, wo + 3            # space-to-depth spatial of the padded input
    kdim = 4 * cin

    # ---- one-time host/XLA prep: fold BN into conv, repack weight for the
    #      stride-2 parity layout.
    scale = params["bn_gamma"] * jax.lax.rsqrt(params["bn_var"] + BN_EPS)     # (cout,)
    bias = (params["bn_beta"] - params["bn_mean"] * scale).astype(jnp.float32)
    wsc = params["conv_w"] * scale[:, None, None, None]                       # (cout,cin,7,7)
    wsc = jnp.pad(wsc, ((0, 0), (0, 0), (0, 1), (0, 1)))                      # kh,kw: 7 -> 8
    w2 = wsc.reshape(cout, cin, 4, 2, 4, 2)            # [n, c, di, pi, dj, pj]
    w2 = jnp.transpose(w2, (2, 4, 3, 5, 1, 0))         # [di, dj, pi, pj, c, n]
    w2 = w2.reshape(16, kdim, cout).astype(jnp.bfloat16)

    # ---- input: NCHW -> NHWC, pad 3, stride-2 space-to-depth, bf16 MXU operands
    xn = jnp.transpose(x, (0, 2, 3, 1)).astype(jnp.float32)
    xp = jnp.pad(xn, ((0, 0), (3, 3), (3, 3), (0, 0)))                        # (B, H+6, W+6, cin)
    xe = xp.reshape(B, hh, 2, wh, 2, cin)
    xe = jnp.transpose(xe, (0, 1, 3, 2, 4, 5)).reshape(B, hh, wh, kdim)
    xe = xe.astype(jnp.bfloat16)

    conv = pl.pallas_call(
        functools.partial(_conv_bn_relu_kernel, ho=ho, wo=wo),
        grid=(B,),
        in_specs=[
            pl.BlockSpec((1, hh, wh, kdim), lambda b: (b, 0, 0, 0)),
            pl.BlockSpec((16, kdim, cout), lambda b: (0, 0, 0)),
            pl.BlockSpec((1, cout), lambda b: (0, 0)),
        ],
        out_specs=pl.BlockSpec((1, ho * wo, cout), lambda b: (b, 0, 0)),
        out_shape=jax.ShapeDtypeStruct((B, ho * wo, cout), jnp.float32),
        compiler_params=pltpu.CompilerParams(dimension_semantics=("parallel",)),
    )(xe, w2, bias.reshape(1, cout))

    # ---- maxpool glue: zero-pad by 1 (exact: ReLU output >= 0, so zero padding is
    #      equivalent to PyTorch's -inf padding) + stride-2 space-to-depth so the pool
    #      kernel only needs contiguous slices.  Single cheap XLA pass.
    y = conv.reshape(B, ho, wo, cout)
    yp = jnp.pad(y, ((0, 0), (1, 1), (1, 1), (0, 0)))                         # (B, ho+2, wo+2, cout)
    hs, ws = hp + 1, wp + 1
    ys = yp.reshape(B, hs, 2, ws, 2, cout)
    ys = jnp.transpose(ys, (0, 1, 3, 2, 4, 5)).reshape(B, hs, ws, 4 * cout)

    pooled = pl.pallas_call(
        functools.partial(_maxpool3s2_kernel, hp=hp, wp=wp, c=cout),
        grid=(B,),
        in_specs=[pl.BlockSpec((1, hs, ws, 4 * cout), lambda b: (b, 0, 0, 0))],
        out_specs=pl.BlockSpec((1, hp, wp, cout), lambda b: (b, 0, 0, 0)),
        out_shape=jax.ShapeDtypeStruct((B, hp, wp, cout), jnp.float32),
        compiler_params=pltpu.CompilerParams(dimension_semantics=("parallel",)),
    )(ys)

    return jnp.transpose(pooled, (0, 3, 1, 2))        # NHWC -> NCHW


# ---------------------------------------------------------------------------
# Deterministic parameter init (same shapes as resnet50.conv1 / resnet50.bn1)
# ---------------------------------------------------------------------------
def init_params(key, cin=3, cout=64):
    k = jax.random.split(key, 5)
    conv_w = jax.random.normal(k[0], (cout, cin, 7, 7), jnp.float32) * (2.0 / (cin * 49)) ** 0.5
    return {
        "conv_w": conv_w,                                                   # conv1.weight
        "bn_gamma": jax.random.uniform(k[1], (cout,), jnp.float32, 0.5, 1.5),
        "bn_beta": 0.1 * jax.random.normal(k[2], (cout,), jnp.float32),
        "bn_mean": 0.1 * jax.random.normal(k[3], (cout,), jnp.float32),     # running_mean
        "bn_var": jax.random.uniform(k[4], (cout,), jnp.float32, 0.5, 1.5), # running_var
    }


if __name__ == "__main__":
    key = jax.random.PRNGKey(0)
    kp, kx = jax.random.split(key)

    params = init_params(kp)
    x = jax.random.normal(kx, (2, 3, 32, 32), jnp.float32)   # NCHW image batch

    out = thermal_module_forward(x, params)
    jax.block_until_ready(out)
    assert out.shape == (2, 64, 8, 8), out.shape
    print("KERNEL_OK")
</pallas_src>

<mosaic_0001>
module attributes {stable_mosaic.version = 11 : i64} {
  func.func @_conv_bn_relu_kernel(%arg0: i32, %arg1: memref<1x19x19x12xbf16, #tpu.memory_space<vmem>>, %arg2: memref<16x12x64xbf16, #tpu.memory_space<vmem>>, %arg3: memref<1x64xf32, #tpu.memory_space<vmem>>, %arg4: memref<1x256x64xf32, #tpu.memory_space<vmem>>) attributes {dimension_semantics = [#tpu.dimension_semantics<parallel>], iteration_bounds = array<i64: 2>, scalar_prefetch = 0 : i64, scratch_operands = 0 : i64, tpu.core_type = #tpu.core_type<tc>, window_params = [{transform_indices = @transform_0, window_bounds = array<i64: 1, 19, 19, 12>}, {pipeline_mode = #tpu.pipeline_mode<synchronous>, transform_indices = @transform_1, window_bounds = array<i64: 16, 12, 64>}, {pipeline_mode = #tpu.pipeline_mode<synchronous>, transform_indices = @transform_2, window_bounds = array<i64: 1, 64>}, {transform_indices = @transform_3, window_bounds = array<i64: 1, 256, 64>}]} {
    %c0 = arith.constant 0 : index
    %c0_0 = arith.constant 0 : index
    %c0_1 = arith.constant 0 : index
    %c0_2 = arith.constant 0 : index
    %0 = vector.load %arg1[%c0, %c0_0, %c0_1, %c0_2] : memref<1x19x19x12xbf16, #tpu.memory_space<vmem>>, vector<1x19x19x12xbf16>
    %1 = vector.shape_cast %0 : vector<1x19x19x12xbf16> to vector<19x19x12xbf16>
    %cst = arith.constant 0.000000e+00 : f32
    %2 = vector.broadcast %cst : f32 to vector<256x64xf32>
    %3 = vector.extract_strided_slice %1 {offsets = [0, 0, 0], sizes = [16, 16, 12], strides = [1, 1, 1]} : vector<19x19x12xbf16> to vector<16x16x12xbf16>
    %4 = vector.shape_cast %3 : vector<16x16x12xbf16> to vector<256x12xbf16>
    %c0_3 = arith.constant 0 : index
    %c0_4 = arith.constant 0 : index
    %c0_5 = arith.constant 0 : index
    %5 = vector.load %arg2[%c0_3, %c0_4, %c0_5] : memref<16x12x64xbf16, #tpu.memory_space<vmem>>, vector<1x12x64xbf16>
    %6 = vector.shape_cast %5 : vector<1x12x64xbf16> to vector<12x64xbf16>
    %cst_6 = arith.constant dense<0.000000e+00> : vector<256x64xf32>
    %7 = tpu.matmul %4, %6, %cst_6 {dimension_numbers = #tpu.dot_dimension_numbers<[1], [0], [0], [1], [0, 0, 1, 1], [], []>} : vector<256x12xbf16>, vector<12x64xbf16>, vector<256x64xf32> -> vector<256x64xf32>
    %8 = arith.addf %2, %7 : vector<256x64xf32>
    %9 = vector.extract_strided_slice %1 {offsets = [0, 1, 0], sizes = [16, 16, 12], strides = [1, 1, 1]} : vector<19x19x12xbf16> to vector<16x16x12xbf16>
    %10 = vector.shape_cast %9 : vector<16x16x12xbf16> to vector<256x12xbf16>
    %c1 = arith.constant 1 : index
    %c0_7 = arith.constant 0 : index
    %c0_8 = arith.constant 0 : index
    %11 = vector.load %arg2[%c1, %c0_7, %c0_8] : memref<16x12x64xbf16, #tpu.memory_space<vmem>>, vector<1x12x64xbf16>
    %12 = vector.shape_cast %11 : vector<1x12x64xbf16> to vector<12x64xbf16>
    %cst_9 = arith.constant dense<0.000000e+00> : vector<256x64xf32>
    %13 = tpu.matmul %10, %12, %cst_9 {dimension_numbers = #tpu.dot_dimension_numbers<[1], [0], [0], [1], [0, 0, 1, 1], [], []>} : vector<256x12xbf16>, vector<12x64xbf16>, vector<256x64xf32> -> vector<256x64xf32>
    %14 = arith.addf %8, %13 : vector<256x64xf32>
    %15 = vector.extract_strided_slice %1 {offsets = [0, 2, 0], sizes = [16, 16, 12], strides = [1, 1, 1]} : vector<19x19x12xbf16> to vector<16x16x12xbf16>
    %16 = vector.shape_cast %15 : vector<16x16x12xbf16> to vector<256x12xbf16>
    %c2 = arith.constant 2 : index
    %c0_10 = arith.constant 0 : index
    %c0_11 = arith.constant 0 : index
    %17 = vector.load %arg2[%c2, %c0_10, %c0_11] : memref<16x12x64xbf16, #tpu.memory_space<vmem>>, vector<1x12x64xbf16>
    %18 = vector.shape_cast %17 : vector<1x12x64xbf16> to vector<12x64xbf16>
    %cst_12 = arith.constant dense<0.000000e+00> : vector<256x64xf32>
    %19 = tpu.matmul %16, %18, %cst_12 {dimension_numbers = #tpu.dot_dimension_numbers<[1], [0], [0], [1], [0, 0, 1, 1], [], []>} : vector<256x12xbf16>, vector<12x64xbf16>, vector<256x64xf32> -> vector<256x64xf32>
    %20 = arith.addf %14, %19 : vector<256x64xf32>
    %21 = vector.extract_strided_slice %1 {offsets = [0, 3, 0], sizes = [16, 16, 12], strides = [1, 1, 1]} : vector<19x19x12xbf16> to vector<16x16x12xbf16>
    %22 = vector.shape_cast %21 : vector<16x16x12xbf16> to vector<256x12xbf16>
    %c3 = arith.constant 3 : index
    %c0_13 = arith.constant 0 : index
    %c0_14 = arith.constant 0 : index
    %23 = vector.load %arg2[%c3, %c0_13, %c0_14] : memref<16x12x64xbf16, #tpu.memory_space<vmem>>, vector<1x12x64xbf16>
    %24 = vector.shape_cast %23 : vector<1x12x64xbf16> to vector<12x64xbf16>
    %cst_15 = arith.constant dense<0.000000e+00> : vector<256x64xf32>
    %25 = tpu.matmul %22, %24, %cst_15 {dimension_numbers = #tpu.dot_dimension_numbers<[1], [0], [0], [1], [0, 0, 1, 1], [], []>} : vector<256x12xbf16>, vector<12x64xbf16>, vector<256x64xf32> -> vector<256x64xf32>
    %26 = arith.addf %20, %25 : vector<256x64xf32>
    %27 = vector.extract_strided_slice %1 {offsets = [1, 0, 0], sizes = [16, 16, 12], strides = [1, 1, 1]} : vector<19x19x12xbf16> to vector<16x16x12xbf16>
    %28 = vector.shape_cast %27 : vector<16x16x12xbf16> to vector<256x12xbf16>
    %c4 = arith.constant 4 : index
    %c0_16 = arith.constant 0 : index
    %c0_17 = arith.constant 0 : index
    %29 = vector.load %arg2[%c4, %c0_16, %c0_17] : memref<16x12x64xbf16, #tpu.memory_space<vmem>>, vector<1x12x64xbf16>
    %30 = vector.shape_cast %29 : vector<1x12x64xbf16> to vector<12x64xbf16>
    %cst_18 = arith.constant dense<0.000000e+00> : vector<256x64xf32>
    %31 = tpu.matmul %28, %30, %cst_18 {dimension_numbers = #tpu.dot_dimension_numbers<[1], [0], [0], [1], [0, 0, 1, 1], [], []>} : vector<256x12xbf16>, vector<12x64xbf16>, vector<256x64xf32> -> vector<256x64xf32>
    %32 = arith.addf %26, %31 : vector<256x64xf32>
    %33 = vector.extract_strided_slice %1 {offsets = [1, 1, 0], sizes = [16, 16, 12], strides = [1, 1, 1]} : vector<19x19x12xbf16> to vector<16x16x12xbf16>
    %34 = vector.shape_cast %33 : vector<16x16x12xbf16> to vector<256x12xbf16>
    %c5 = arith.constant 5 : index
    %c0_19 = arith.constant 0 : index
    %c0_20 = arith.constant 0 : index
    %35 = vector.load %arg2[%c5, %c0_19, %c0_20] : memref<16x12x64xbf16, #tpu.memory_space<vmem>>, vector<1x12x64xbf16>
    %36 = vector.shape_cast %35 : vector<1x12x64xbf16> to vector<12x64xbf16>
    %cst_21 = arith.constant dense<0.000000e+00> : vector<256x64xf32>
    %37 = tpu.matmul %34, %36, %cst_21 {dimension_numbers = #tpu.dot_dimension_numbers<[1], [0], [0], [1], [0, 0, 1, 1], [], []>} : vector<256x12xbf16>, vector<12x64xbf16>, vector<256x64xf32> -> vector<256x64xf32>
    %38 = arith.addf %32, %37 : vector<256x64xf32>
    %39 = vector.extract_strided_slice %1 {offsets = [1, 2, 0], sizes = [16, 16, 12], strides = [1, 1, 1]} : vector<19x19x12xbf16> to vector<16x16x12xbf16>
    %40 = vector.shape_cast %39 : vector<16x16x12xbf16> to vector<256x12xbf16>
    %c6 = arith.constant 6 : index
    %c0_22 = arith.constant 0 : index
    %c0_23 = arith.constant 0 : index
    %41 = vector.load %arg2[%c6, %c0_22, %c0_23] : memref<16x12x64xbf16, #tpu.memory_space<vmem>>, vector<1x12x64xbf16>
    %42 = vector.shape_cast %41 : vector<1x12x64xbf16> to vector<12x64xbf16>
    %cst_24 = arith.constant dense<0.000000e+00> : vector<256x64xf32>
    %43 = tpu.matmul %40, %42, %cst_24 {dimension_numbers = #tpu.dot_dimension_numbers<[1], [0], [0], [1], [0, 0, 1, 1], [], []>} : vector<256x12xbf16>, vector<12x64xbf16>, vector<256x64xf32> -> vector<256x64xf32>
    %44 = arith.addf %38, %43 : vector<256x64xf32>
    %45 = vector.extract_strided_slice %1 {offsets = [1, 3, 0], sizes = [16, 16, 12], strides = [1, 1, 1]} : vector<19x19x12xbf16> to vector<16x16x12xbf16>
    %46 = vector.shape_cast %45 : vector<16x16x12xbf16> to vector<256x12xbf16>
    %c7 = arith.constant 7 : index
    %c0_25 = arith.constant 0 : index
    %c0_26 = arith.constant 0 : index
    %47 = vector.load %arg2[%c7, %c0_25, %c0_26] : memref<16x12x64xbf16, #tpu.memory_space<vmem>>, vector<1x12x64xbf16>
    %48 = vector.shape_cast %47 : vector<1x12x64xbf16> to vector<12x64xbf16>
    %cst_27 = arith.constant dense<0.000000e+00> : vector<256x64xf32>
    %49 = tpu.matmul %46, %48, %cst_27 {dimension_numbers = #tpu.dot_dimension_numbers<[1], [0], [0], [1], [0, 0, 1, 1], [], []>} : vector<256x12xbf16>, vector<12x64xbf16>, vector<256x64xf32> -> vector<256x64xf32>
    %50 = arith.addf %44, %49 : vector<256x64xf32>
    %51 = vector.extract_strided_slice %1 {offsets = [2, 0, 0], sizes = [16, 16, 12], strides = [1, 1, 1]} : vector<19x19x12xbf16> to vector<16x16x12xbf16>
    %52 = vector.shape_cast %51 : vector<16x16x12xbf16> to vector<256x12xbf16>
    %c8 = arith.constant 8 : index
    %c0_28 = arith.constant 0 : index
    %c0_29 = arith.constant 0 : index
    %53 = vector.load %arg2[%c8, %c0_28, %c0_29] : memref<16x12x64xbf16, #tpu.memory_space<vmem>>, vector<1x12x64xbf16>
    %54 = vector.shape_cast %53 : vector<1x12x64xbf16> to vector<12x64xbf16>
    %cst_30 = arith.constant dense<0.000000e+00> : vector<256x64xf32>
    %55 = tpu.matmul %52, %54, %cst_30 {dimension_numbers = #tpu.dot_dimension_numbers<[1], [0], [0], [1], [0, 0, 1, 1], [], []>} : vector<256x12xbf16>, vector<12x64xbf16>, vector<256x64xf32> -> vector<256x64xf32>
    %56 = arith.addf %50, %55 : vector<256x64xf32>
    %57 = vector.extract_strided_slice %1 {offsets = [2, 1, 0], sizes = [16, 16, 12], strides = [1, 1, 1]} : vector<19x19x12xbf16> to vector<16x16x12xbf16>
    %58 = vector.shape_cast %57 : vector<16x16x12xbf16> to vector<256x12xbf16>
    %c9 = arith.constant 9 : index
    %c0_31 = arith.constant 0 : index
    %c0_32 = arith.constant 0 : index
    %59 = vector.load %arg2[%c9, %c0_31, %c0_32] : memref<16x12x64xbf16, #tpu.memory_space<vmem>>, vector<1x12x64xbf16>
    %60 = vector.shape_cast %59 : vector<1x12x64xbf16> to vector<12x64xbf16>
    %cst_33 = arith.constant dense<0.000000e+00> : vector<256x64xf32>
    %61 = tpu.matmul %58, %60, %cst_33 {dimension_numbers = #tpu.dot_dimension_numbers<[1], [0], [0], [1], [0, 0, 1, 1], [], []>} : vector<256x12xbf16>, vector<12x64xbf16>, vector<256x64xf32> -> vector<256x64xf32>
    %62 = arith.addf %56, %61 : vector<256x64xf32>
    %63 = vector.extract_strided_slice %1 {offsets = [2, 2, 0], sizes = [16, 16, 12], strides = [1, 1, 1]} : vector<19x19x12xbf16> to vector<16x16x12xbf16>
    %64 = vector.shape_cast %63 : vector<16x16x12xbf16> to vector<256x12xbf16>
    %c10 = arith.constant 10 : index
    %c0_34 = arith.constant 0 : index
    %c0_35 = arith.constant 0 : index
    %65 = vector.load %arg2[%c10, %c0_34, %c0_35] : memref<16x12x64xbf16, #tpu.memory_space<vmem>>, vector<1x12x64xbf16>
    %66 = vector.shape_cast %65 : vector<1x12x64xbf16> to vector<12x64xbf16>
    %cst_36 = arith.constant dense<0.000000e+00> : vector<256x64xf32>
    %67 = tpu.matmul %64, %66, %cst_36 {dimension_numbers = #tpu.dot_dimension_numbers<[1], [0], [0], [1], [0, 0, 1, 1], [], []>} : vector<256x12xbf16>, vector<12x64xbf16>, vector<256x64xf32> -> vector<256x64xf32>
    %68 = arith.addf %62, %67 : vector<256x64xf32>
    %69 = vector.extract_strided_slice %1 {offsets = [2, 3, 0], sizes = [16, 16, 12], strides = [1, 1, 1]} : vector<19x19x12xbf16> to vector<16x16x12xbf16>
    %70 = vector.shape_cast %69 : vector<16x16x12xbf16> to vector<256x12xbf16>
    %c11 = arith.constant 11 : index
    %c0_37 = arith.constant 0 : index
    %c0_38 = arith.constant 0 : index
    %71 = vector.load %arg2[%c11, %c0_37, %c0_38] : memref<16x12x64xbf16, #tpu.memory_space<vmem>>, vector<1x12x64xbf16>
    %72 = vector.shape_cast %71 : vector<1x12x64xbf16> to vector<12x64xbf16>
    %cst_39 = arith.constant dense<0.000000e+00> : vector<256x64xf32>
    %73 = tpu.matmul %70, %72, %cst_39 {dimension_numbers = #tpu.dot_dimension_numbers<[1], [0], [0], [1], [0, 0, 1, 1], [], []>} : vector<256x12xbf16>, vector<12x64xbf16>, vector<256x64xf32> -> vector<256x64xf32>
    %74 = arith.addf %68, %73 : vector<256x64xf32>
    %75 = vector.extract_strided_slice %1 {offsets = [3, 0, 0], sizes = [16, 16, 12], strides = [1, 1, 1]} : vector<19x19x12xbf16> to vector<16x16x12xbf16>
    %76 = vector.shape_cast %75 : vector<16x16x12xbf16> to vector<256x12xbf16>
    %c12 = arith.constant 12 : index
    %c0_40 = arith.constant 0 : index
    %c0_41 = arith.constant 0 : index
    %77 = vector.load %arg2[%c12, %c0_40, %c0_41] : memref<16x12x64xbf16, #tpu.memory_space<vmem>>, vector<1x12x64xbf16>
    %78 = vector.shape_cast %77 : vector<1x12x64xbf16> to vector<12x64xbf16>
    %cst_42 = arith.constant dense<0.000000e+00> : vector<256x64xf32>
    %79 = tpu.matmul %76, %78, %cst_42 {dimension_numbers = #tpu.dot_dimension_numbers<[1], [0], [0], [1], [0, 0, 1, 1], [], []>} : vector<256x12xbf16>, vector<12x64xbf16>, vector<256x64xf32> -> vector<256x64xf32>
    %80 = arith.addf %74, %79 : vector<256x64xf32>
    %81 = vector.extract_strided_slice %1 {offsets = [3, 1, 0], sizes = [16, 16, 12], strides = [1, 1, 1]} : vector<19x19x12xbf16> to vector<16x16x12xbf16>
    %82 = vector.shape_cast %81 : vector<16x16x12xbf16> to vector<256x12xbf16>
    %c13 = arith.constant 13 : index
    %c0_43 = arith.constant 0 : index
    %c0_44 = arith.constant 0 : index
    %83 = vector.load %arg2[%c13, %c0_43, %c0_44] : memref<16x12x64xbf16, #tpu.memory_space<vmem>>, vector<1x12x64xbf16>
    %84 = vector.shape_cast %83 : vector<1x12x64xbf16> to vector<12x64xbf16>
    %cst_45 = arith.constant dense<0.000000e+00> : vector<256x64xf32>
    %85 = tpu.matmul %82, %84, %cst_45 {dimension_numbers = #tpu.dot_dimension_numbers<[1], [0], [0], [1], [0, 0, 1, 1], [], []>} : vector<256x12xbf16>, vector<12x64xbf16>, vector<256x64xf32> -> vector<256x64xf32>
    %86 = arith.addf %80, %85 : vector<256x64xf32>
    %87 = vector.extract_strided_slice %1 {offsets = [3, 2, 0], sizes = [16, 16, 12], strides = [1, 1, 1]} : vector<19x19x12xbf16> to vector<16x16x12xbf16>
    %88 = vector.shape_cast %87 : vector<16x16x12xbf16> to vector<256x12xbf16>
    %c14 = arith.constant 14 : index
    %c0_46 = arith.constant 0 : index
    %c0_47 = arith.constant 0 : index
    %89 = vector.load %arg2[%c14, %c0_46, %c0_47] : memref<16x12x64xbf16, #tpu.memory_space<vmem>>, vector<1x12x64xbf16>
    %90 = vector.shape_cast %89 : vector<1x12x64xbf16> to vector<12x64xbf16>
    %cst_48 = arith.constant dense<0.000000e+00> : vector<256x64xf32>
    %91 = tpu.matmul %88, %90, %cst_48 {dimension_numbers = #tpu.dot_dimension_numbers<[1], [0], [0], [1], [0, 0, 1, 1], [], []>} : vector<256x12xbf16>, vector<12x64xbf16>, vector<256x64xf32> -> vector<256x64xf32>
    %92 = arith.addf %86, %91 : vector<256x64xf32>
    %93 = vector.extract_strided_slice %1 {offsets = [3, 3, 0], sizes = [16, 16, 12], strides = [1, 1, 1]} : vector<19x19x12xbf16> to vector<16x16x12xbf16>
    %94 = vector.shape_cast %93 : vector<16x16x12xbf16> to vector<256x12xbf16>
    %c15 = arith.constant 15 : index
    %c0_49 = arith.constant 0 : index
    %c0_50 = arith.constant 0 : index
    %95 = vector.load %arg2[%c15, %c0_49, %c0_50] : memref<16x12x64xbf16, #tpu.memory_space<vmem>>, vector<1x12x64xbf16>
    %96 = vector.shape_cast %95 : vector<1x12x64xbf16> to vector<12x64xbf16>
    %cst_51 = arith.constant dense<0.000000e+00> : vector<256x64xf32>
    %97 = tpu.matmul %94, %96, %cst_51 {dimension_numbers = #tpu.dot_dimension_numbers<[1], [0], [0], [1], [0, 0, 1, 1], [], []>} : vector<256x12xbf16>, vector<12x64xbf16>, vector<256x64xf32> -> vector<256x64xf32>
    %98 = arith.addf %92, %97 : vector<256x64xf32>
    %c0_52 = arith.constant 0 : index
    %c0_53 = arith.constant 0 : index
    %99 = vector.load %arg3[%c0_52, %c0_53] : memref<1x64xf32, #tpu.memory_space<vmem>>, vector<1x64xf32>
    %100 = vector.broadcast %99 : vector<1x64xf32> to vector<256x64xf32>
    %101 = arith.addf %98, %100 : vector<256x64xf32>
    %cst_54 = arith.constant 0.000000e+00 : f32
    %102 = vector.broadcast %cst_54 : f32 to vector<256x64xf32>
    %103 = arith.maximumf %101, %102 : vector<256x64xf32>
    %c0_55 = arith.constant 0 : index
    %c0_56 = arith.constant 0 : index
    %c0_57 = arith.constant 0 : index
    %104 = vector.load %arg4[%c0_55, %c0_56, %c0_57] : memref<1x256x64xf32, #tpu.memory_space<vmem>>, vector<1x256x64xf32>
    %105 = vector.shape_cast %104 : vector<1x256x64xf32> to vector<256x64xf32>
    %106 = vector.shape_cast %103 : vector<256x64xf32> to vector<1x256x64xf32>
    tpu.vector_store %arg4[%c0_55, %c0_56, %c0_57], %106 {strides = array<i32>} : memref<1x256x64xf32, #tpu.memory_space<vmem>>, vector<1x256x64xf32>,
    return
  }
  func.func @transform_0(%arg0: i32) -> (i32, i32, i32, i32) {
    %c0_i32 = arith.constant 0 : i32
    %c0_i32_0 = arith.constant 0 : i32
    %c0_i32_1 = arith.constant 0 : i32
    %c0_i32_2 = arith.constant 0 : i32
    return %arg0, %c0_i32, %c0_i32_0, %c0_i32_1 : i32, i32, i32, i32
  }
  func.func @transform_1(%arg0: i32) -> (i32, i32, i32) {
    %c0_i32 = arith.constant 0 : i32
    %c0_i32_0 = arith.constant 0 : i32
    %c0_i32_1 = arith.constant 0 : i32
    %c0_i32_2 = arith.constant 0 : i32
    return %c0_i32, %c0_i32_0, %c0_i32_1 : i32, i32, i32
  }
  func.func @transform_2(%arg0: i32) -> (i32, i32) {
    %c0_i32 = arith.constant 0 : i32
    %c0_i32_0 = arith.constant 0 : i32
    %c0_i32_1 = arith.constant 0 : i32
    return %c0_i32, %c0_i32_0 : i32, i32
  }
  func.func @transform_3(%arg0: i32) -> (i32, i32, i32) {
    %c0_i32 = arith.constant 0 : i32
    %c0_i32_0 = arith.constant 0 : i32
    %c0_i32_1 = arith.constant 0 : i32
    return %arg0, %c0_i32, %c0_i32_0 : i32, i32, i32
  }
}

module attributes {stable_mosaic.version = 11 : i64} {
  func.func @_maxpool3s2_kernel(%arg0: i32, %arg1: memref<1x9x9x256xf32, #tpu.memory_space<vmem>>, %arg2: memref<1x8x8x64xf32, #tpu.memory_space<vmem>>) attributes {dimension_semantics = [#tpu.dimension_semantics<parallel>], iteration_bounds = array<i64: 2>, scalar_prefetch = 0 : i64, scratch_operands = 0 : i64, tpu.core_type = #tpu.core_type<tc>, window_params = [{transform_indices = @transform_0, window_bounds = array<i64: 1, 9, 9, 256>}, {transform_indices = @transform_1, window_bounds = array<i64: 1, 8, 8, 64>}]} {
    %c0 = arith.constant 0 : index
    %c0_0 = arith.constant 0 : index
    %c0_1 = arith.constant 0 : index
    %c0_2 = arith.constant 0 : index
    %0 = vector.load %arg1[%c0, %c0_0, %c0_1, %c0_2] : memref<1x9x9x256xf32, #tpu.memory_space<vmem>>, vector<1x9x9x256xf32>
    %1 = vector.shape_cast %0 : vector<1x9x9x256xf32> to vector<9x9x256xf32>
    %2 = vector.extract_strided_slice %1 {offsets = [0, 0, 0], sizes = [8, 8, 64], strides = [1, 1, 1]} : vector<9x9x256xf32> to vector<8x8x64xf32>
    %3 = vector.extract_strided_slice %1 {offsets = [0, 0, 64], sizes = [8, 8, 64], strides = [1, 1, 1]} : vector<9x9x256xf32> to vector<8x8x64xf32>
    %4 = arith.maximumf %2, %3 : vector<8x8x64xf32>
    %5 = vector.extract_strided_slice %1 {offsets = [0, 1, 0], sizes = [8, 8, 64], strides = [1, 1, 1]} : vector<9x9x256xf32> to vector<8x8x64xf32>
    %6 = arith.maximumf %4, %5 : vector<8x8x64xf32>
    %7 = vector.extract_strided_slice %1 {offsets = [0, 0, 128], sizes = [8, 8, 64], strides = [1, 1, 1]} : vector<9x9x256xf32> to vector<8x8x64xf32>
    %8 = arith.maximumf %6, %7 : vector<8x8x64xf32>
    %9 = vector.extract_strided_slice %1 {offsets = [0, 0, 192], sizes = [8, 8, 64], strides = [1, 1, 1]} : vector<9x9x256xf32> to vector<8x8x64xf32>
    %10 = arith.maximumf %8, %9 : vector<8x8x64xf32>
    %11 = vector.extract_strided_slice %1 {offsets = [0, 1, 128], sizes = [8, 8, 64], strides = [1, 1, 1]} : vector<9x9x256xf32> to vector<8x8x64xf32>
    %12 = arith.maximumf %10, %11 : vector<8x8x64xf32>
    %13 = vector.extract_strided_slice %1 {offsets = [1, 0, 0], sizes = [8, 8, 64], strides = [1, 1, 1]} : vector<9x9x256xf32> to vector<8x8x64xf32>
    %14 = arith.maximumf %12, %13 : vector<8x8x64xf32>
    %15 = vector.extract_strided_slice %1 {offsets = [1, 0, 64], sizes = [8, 8, 64], strides = [1, 1, 1]} : vector<9x9x256xf32> to vector<8x8x64xf32>
    %16 = arith.maximumf %14, %15 : vector<8x8x64xf32>
    %17 = vector.extract_strided_slice %1 {offsets = [1, 1, 0], sizes = [8, 8, 64], strides = [1, 1, 1]} : vector<9x9x256xf32> to vector<8x8x64xf32>
    %18 = arith.maximumf %16, %17 : vector<8x8x64xf32>
    %c0_3 = arith.constant 0 : index
    %c0_4 = arith.constant 0 : index
    %c0_5 = arith.constant 0 : index
    %c0_6 = arith.constant 0 : index
    %19 = vector.load %arg2[%c0_3, %c0_4, %c0_5, %c0_6] : memref<1x8x8x64xf32, #tpu.memory_space<vmem>>, vector<1x8x8x64xf32>
    %20 = vector.shape_cast %19 : vector<1x8x8x64xf32> to vector<8x8x64xf32>
    %21 = vector.shape_cast %18 : vector<8x8x64xf32> to vector<1x8x8x64xf32>
    tpu.vector_store %arg2[%c0_3, %c0_4, %c0_5, %c0_6], %21 {strides = array<i32>} : memref<1x8x8x64xf32, #tpu.memory_space<vmem>>, vector<1x8x8x64xf32>,
    return
  }
  func.func @transform_0(%arg0: i32) -> (i32, i32, i32, i32) {
    %c0_i32 = arith.constant 0 : i32
    %c0_i32_0 = arith.constant 0 : i32
    %c0_i32_1 = arith.constant 0 : i32
    %c0_i32_2 = arith.constant 0 : i32
    return %arg0, %c0_i32, %c0_i32_0, %c0_i32_1 : i32, i32, i32, i32
  }
  func.func @transform_1(%arg0: i32) -> (i32, i32, i32, i32) {
    %c0_i32 = arith.constant 0 : i32
    %c0_i32_0 = arith.constant 0 : i32
    %c0_i32_1 = arith.constant 0 : i32
    %c0_i32_2 = arith.constant 0 : i32
    return %arg0, %c0_i32, %c0_i32_0, %c0_i32_1 : i32, i32, i32, i32
  }
}

</mosaic_0001>

<bundles_post_ra>
// kernel: thermal_module_forward.3
= control target key start
LH: loop header
LB: loop body
LE: loop exit
PB: predicated region body
PF: predicated region fallthrough
CT: control target
= control target key end

     0   :  { %6 = vsyncpa [#allocation3], 0  ;;  %s935_s0 = inlined_call_operand.vmem [shape: f32[2,9,9,256], index: 0, kind: input, shape index: {}]   ;;  %s936_s1 = inlined_call_operand.hbm [shape: f32[2,8,8,64], index: 1, kind: output, shape index: {}]  }
   0x1   :  { %8 = vsyncpa [#allocation3 + $0x1], 0  ;;  %s585_s6 = smov 0   ;;  %s587_s7 = smov 0  }
   0x2   :  { %s589_s8 = smov 0   ;;  %s591_s9 = smov 0  }
   0x3 LB: > { %s606_s10 = sadd.s32 4294967295, %s569_s9   ;;  %s452_s11 = sadd.s32 4294967294, %s569_s9   ;;  %s569_s9 = sphi %s591_s9, %s942_s9   ;;  %s565_s8 = sphi %s589_s8, %s941_s8   ;;  %s561_s7 = sphi %s587_s7, %s940_s7   ;;  %s557_s6 = sphi %s585_s6, %s939_s6  }
   0x4   : > { %s610_s12 = sadd.s32 1, %s569_s9   ;;  %s47_s13 = sadd.s32 1, %s565_s8 }
   0x5   : > { %s44_s14 = ssub.s32 %s569_s9, %s610_s12  ;;  %p57_p0 = scmp.ne.s32.totalorder %s565_s8, %s561_s7 }
   0x6   : > { %p45_p1 = scmp.eq.s32.totalorder %s44_s14, 0  ;;  %p58_p2 = scmp.eq.s32.totalorder %s606_s10, 1 }
   0x7   : > { %p63_p3 = scmp.ne.s32.totalorder %s561_s7, %s557_s6  ;;  %p64_p4 = scmp.eq.s32.totalorder %s452_s11, 1 }
   0x8   : > { %s621_s15 = scalar_select %p45_p1, %s565_s8, %s47_s13  }
   0x9   : > { %p623_p5 = por %p58_p2, %p57_p0  ;;  %p627_p6 = por %p64_p4, %p63_p3 }
   0xa   : > { %p455_p7 = scmp.ge.s32.totalorder %s569_s9, 1  ;;  %p90_p8 = scmp.lt.s32.totalorder %s569_s9, 3 }
   0xc   : > { %p91_p9 = pnand %p455_p7, %p90_p8 }
   0xd   : > { %p110_p10 = scmp.lt.s32.totalorder (!%p91_p9), %s606_s10, 1  ;;  %s571_s23 = smov (!%p91_p9), 64   ;;  %vm197_vm0 = vcmask (!%p91_p9), 1046528   ;;  %vm367_vm1 = vcmask (!%p91_p9), 523264  }
   0xe   : > { %94 = sbr.rel (%p91_p9) target bundleno = 196 (0xc4), region = 24  ;;  %s107_s24 = sand.u32 (!%p91_p9), 1, %s561_s7  }
   0xf   : > { %s456_s25 = sshll.u32 (!%p91_p9), %s107_s24, 6  ;;  %s463_s27 = sshll.u32 (!%p91_p9), %s606_s10, 10 }
  0x10   : > { %s840_s26 = scalar_lea.vmem (!%p91_p9), [#allocation2], %s456_s25  ;;  %s883_s2 = scalar_lea.hbm (!%p91_p9), %s936_s1, %s463_s27 }
  0x11   : > { %s390_s28 = sshll.u32 (!%p91_p9), %s840_s26, 4  ;;  %s894_s3 = scalar_lea.sflag (!%p91_p9), [#allocation3], %s107_s24  ;;  %s885_s28 = int_to_ptr.vmem [resolvable:$true] %s390_s28 }
  0x12   : > { %s507_s4 = scalar_lea.vmem (!%p91_p9), %s885_s28, 1024  ;;  %s572_s5 = smov (!%p91_p9), [#allocation2]  }
  0x13   : > { %p508_p11 = scmp.ne.s32.totalorder (!%p91_p9), %s885_s28, %s507_s4 }
  0x15   : > { %s111_s18 = scalar_select %p110_p10, %s606_s10, 1 }
  0x16   : > { %p509_p12 = pnand %p508_p11, %p623_p5  ;;  %s511_s10 = sshll.u32 %s572_s5, 4  ;;  %s512_s10 = int_to_ptr.vmem [resolvable:$false] %s511_s10 }
  0x17   : > { %s464_s19 = smul.u32 288, %s111_s18  ;;  %s513_s11 = scalar_lea.vmem %s512_s10, 2048 }
  0x18   : > { %p510_p13 = pneg %p509_p12  ;;  %p514_p0 = scmp.lt.s32.totalorder %s885_s28, %s512_s10 }
  0x19   : > { %s638_s22 = scalar_lea.vmem %s935_s0, %s464_s19  ;;  %p515_p1 = scmp.lt.s32.totalorder %s513_s11, %s507_s4 }
  0x1a   : > { %v641_v0 = vld [vmem:[%s638_s22 + $0x40] sm:$0xff]  ;;  %v681_v8 = vld [vmem:[%s638_s22 + $0x28] sm:$0xff]  ;;  %v117_v19 = vld [vmem:[%s638_s22 + $0x10] sm:$0x1] }
  0x1b   : > { %v644_v1 = vld [vmem:[%s638_s22] sm:$0xff]  ;;  %161 = vrot.lane.b32.xlu1 %v641_v0, %s571_s23  ;;  %v684_v9 = vld [vmem:[%s638_s22 + $0x8] sm:$0xff]  ;;  %v121_v20 = vld [vmem:[%s638_s22 + $0x30] sm:$0x1]  ;;  %v199_v23 = vrot.slane %v117_v19, 1  ;;  %v204_v27 = vrot.slane %v641_v0, 1  ;;  %p516_p2 = por %p515_p1, %p514_p0 }
  0x1c   : > { %157 = vrot.lane.b32.xlu0 %v644_v1, %s571_s23  ;;  %v651_v2 = vld [vmem:[%s638_s22 + $0x60] sm:$0xff]  ;;  %v691_v10 = vld [vmem:[%s638_s22 + $0x68] sm:$0xff]  ;;  %v198_v21 = vrot.slane %v644_v1, 1  ;;  %v202_v25 = vrot.slane %v121_v20, 1  ;;  %v125_v29 = vld [vmem:[%s638_s22 + $0x50] sm:$0x1] }
  0x1d   : > { %v654_v3 = vld [vmem:[%s638_s22 + $0x20] sm:$0xff]  ;;  %v694_v11 = vld [vmem:[%s638_s22 + $0x48] sm:$0xff]  ;;  %v207_v28 = vrot.slane %v651_v2, 1  ;;  %v129_v30 = vld [vmem:[%s638_s22 + $0x70] sm:$0x1]  ;;  %v297_v36 = vrot.slane %v681_v8, 1  ;;  %p517_p3 = pnand %p516_p2, %p510_p13 }
  0x1e   : > { %v661_v4 = vld [vmem:[%s638_s22 + $0xa0] sm:$0xff]  ;;  %v701_v12 = vld [vmem:[%s638_s22 + $0xa8] sm:$0xff]  ;;  %v201_v22 = vrot.slane %v654_v3, 1  ;;  %v137_v35 = vld [vmem:[%s638_s22 + $0xb0] sm:$0x1]  ;;  %v294_v37 = vrot.slane %v684_v9, 1  ;;  %v200_v43 = vsel %vm197_vm0, %v198_v21, %v199_v23 }
  0x1f   : > { %163 = vrot.lane.b32.xlu1 %v651_v2, %s571_s23  ;;  %v664_v5 = vld [vmem:[%s638_s22 + $0x80] sm:$0xff]  ;;  %v704_v13 = vld [vmem:[%s638_s22 + $0x88] sm:$0xff]  ;;  %v213_v31 = vrot.slane %v661_v4, 1  ;;  %v133_v40 = vld [vmem:[%s638_s22 + $0x90] sm:$0x1]  ;;  %v205_v42 = vrot.slane %v125_v29, 1 }
  0x20   : > { %159 = vrot.lane.b32.xlu0 %v654_v3, %s571_s23  ;;  %v671_v6 = vld [vmem:[%s638_s22 + $0xe0] sm:$0xff]  ;;  %v711_v14 = vld [vmem:[%s638_s22 + $0xe8] sm:$0xff]  ;;  %v210_v32 = vrot.slane %v664_v5, 1  ;;  %v122_v41 = vld [vmem:[%s638_s22 + $0x38] sm:$0x1]  ;;  %v208_v44 = vrot.slane %v129_v30, 1  ;;  %v753_v45 = vsel %vm197_vm0, %v201_v22, %v202_v25 }
  0x21   : > { %v674_v7 = vld [vmem:[%s638_s22 + $0xc0] sm:$0xff]  ;;  %v714_v15 = vld [vmem:[%s638_s22 + $0xc8] sm:$0xff]  ;;  %v219_v33 = vrot.slane %v671_v6, 1  ;;  %v303_v48 = vrot.slane %v691_v10, 1  ;;  %v300_v49 = vrot.slane %v694_v11, 1  ;;  %v309_v50 = vrot.slane %v701_v12, 1 }
  0x22   : > { %v721_v16 = vld [vmem:[%s638_s22 + $0x100] sm:$0xff]  ;;  %v216_v34 = vrot.slane %v674_v7, 1  ;;  %v214_v51 = vrot.slane %v137_v35, 1  ;;  %v118_v52 = vld [vmem:[%s638_s22 + $0x18] sm:$0x1]  ;;  %v211_v53 = vrot.slane %v133_v40, 1  ;;  %v773_v63 = vsel %vm197_vm0, %v204_v27, %v205_v42 }
  0x23   : > { %167 = vrot.lane.b32.xlu1 %v661_v4, %s571_s23  ;;  %v145_v54 = vld [vmem:[%s638_s22 + $0xf0] sm:$0x1]  ;;  %v298_v56 = vrot.slane %v122_v41, 1  ;;  %v130_v61 = vld [vmem:[%s638_s22 + $0x78] sm:$0x1]  ;;  %v306_v62 = vrot.slane %v704_v13, 1 }
  0x24   : > { %165 = vrot.lane.b32.xlu0 %v664_v5, %s571_s23  ;;  %v141_v55 = vld [vmem:[%s638_s22 + $0xd0] sm:$0x1]  ;;  %v295_v20 = vrot.slane %v118_v52, 1  ;;  %v315_v21 = vrot.slane %v711_v14, 1  ;;  %v312_v22 = vrot.slane %v714_v15, 1  ;;  %v220_v23 = vrot.slane %v145_v54, 1 }
  0x25   : > { %v217_v25 = vrot.slane %v141_v55, 1  ;;  %v126_v29 = vld [vmem:[%s638_s22 + $0x58] sm:$0x1]  ;;  %v786_v27 = vsel %vm197_vm0, %v213_v31, %v214_v51  ;;  %v299_v30 = vsel %vm197_vm0, %v297_v36, %v298_v56  ;;  %v304_v35 = vrot.slane %v130_v61, 1 }
  0x26   : > { %v138_v42 = vld [vmem:[%s638_s22 + $0xb8] sm:$0x1]  ;;  %v301_v52 = vrot.slane %v126_v29, 1 }
  0x27   : > { %171 = vrot.lane.b32.xlu1 %v671_v6, %s571_s23 }
  0x28   : > { %169 = vrot.lane.b32.xlu0 %v674_v7, %s571_s23 }
  0x2b   : > { %256 = vrot.lane.b32.xlu1 %v681_v8, %s571_s23 }
  0x2c   : > { %254 = vrot.lane.b32.xlu0 %v684_v9, %s571_s23 }
  0x2f   : > { %260 = vrot.lane.b32.xlu1 %v691_v10, %s571_s23 }
  0x30   : > { %258 = vrot.lane.b32.xlu0 %v694_v11, %s571_s23 }
  0x33   : > { %264 = vrot.lane.b32.xlu1 %v701_v12, %s571_s23 }
  0x34   : > { %262 = vrot.lane.b32.xlu0 %v704_v13, %s571_s23 }
  0x37   : > { %268 = vrot.lane.b32.xlu1 %v711_v14, %s571_s23 }
  0x38   : > { %266 = vrot.lane.b32.xlu0 %v714_v15, %s571_s23 }
  0x3c   : > { %343 = vrot.lane.b32.xlu0 %v721_v16, %s571_s23 }
  0x8d   : > { %v725_v17 = vpop.permute.xlu1 %161 }
  0x8e   : > { %v158_v18 = vpop.permute.xlu0 %157  ;;  %v183_v57 = vmax.f32 %v641_v0, %v725_v17 }
  0x8f   : > { %v181_v38 = vmax.f32 %v644_v1, %v158_v18  ;;  %v776_v1 = vsel %vm197_vm0, %v207_v28, %v208_v44  ;;  %v789_v28 = vsel %vm197_vm0, %v210_v32, %v211_v53  ;;  %v296_v44 = vsel %vm197_vm0, %v294_v37, %v295_v20 }
  0x90   : > { %v804_v53 = vsel %vm197_vm0, %v219_v33, %v220_v23  ;;  %v305_v20 = vsel %vm197_vm0, %v303_v48, %v304_v35 }
  0x91   : > { %v731_v24 = vpop.permute.xlu1 %163  ;;  %v230_v58 = vmax.f32 %v181_v38, %v200_v43  ;;  %v232_v38 = vmax.f32 %v183_v57, %v773_v63  ;;  %v134_v43 = vld [vmem:[%s638_s22 + $0x98] sm:$0x1]  ;;  %v310_v57 = vrot.slane %v138_v42, 1 }
  0x92   : > { %v733_v26 = vpop.permute.xlu0 %159  ;;  %v184_v59 = vmax.f32 %v651_v2, %v731_v24  ;;  %v307_v37 = vrot.slane %v134_v43, 1 }
  0x93   : > { %v182_v39 = vmax.f32 %v654_v3, %v733_v26  ;;  %v238_v41 = vmax.f32 %v230_v58, %v684_v9  ;;  %v311_v48 = vsel %vm197_vm0, %v309_v50, %v310_v57 }
  0x95   : > { %v755_v46 = vpop.permute.xlu1 %167  ;;  %v231_v60 = vmax.f32 %v182_v39, %v753_v45  ;;  %v233_v39 = vmax.f32 %v184_v59, %v776_v1 }
  0x96   : > { %v757_v47 = vpop.permute.xlu0 %165  ;;  %v186_v31 = vmax.f32 %v661_v4, %v755_v46 }
  0x97   : > { %v239_v40 = vmax.f32 %v231_v60, %v681_v8  ;;  %v185_v32 = vmax.f32 %v664_v5, %v757_v47  ;;  %v807_v8 = vsel %vm197_vm0, %v216_v34, %v217_v25  ;;  %v241_v59 = vmax.f32 %v233_v39, %v691_v10  ;;  %v146_v39 = vld [vmem:[%s638_s22 + $0xf8] sm:$0x1] }
  0x98   : > { %v240_v34 = vmax.f32 %v232_v38, %v694_v11  ;;  %v235_v60 = vmax.f32 %v186_v31, %v786_v27  ;;  %v302_v25 = vsel %vm197_vm0, %v300_v49, %v301_v52  ;;  %v142_v11 = vld [vmem:[%s638_s22 + $0xd8] sm:$0x1]  ;;  %v308_v49 = vsel %vm197_vm0, %v306_v62, %v307_v37 }
  0x99   : > { %v778_v18 = vpop.permute.xlu1 %171  ;;  %v234_v61 = vmax.f32 %v185_v32, %v789_v28  ;;  %v313_v52 = vrot.slane %v142_v11, 1 }
  0x9a   : > { %v780_v19 = vpop.permute.xlu0 %169  ;;  %v188_v55 = vmax.f32 %v671_v6, %v778_v18  ;;  %v243_v31 = vmax.f32 %v235_v60, %v701_v12 }
  0x9b   : > { %v187_v56 = vmax.f32 %v674_v7, %v780_v19 }
  0x9c   : > { %v237_v38 = vmax.f32 %v188_v55, %v804_v53 }
  0x9d   : > { %v257_v36 = vpop.permute.xlu1 %256  ;;  %v236_v42 = vmax.f32 %v187_v56, %v807_v8 }
  0x9e   : > { %v255_v51 = vpop.permute.xlu0 %254  ;;  %v279_v9 = vmax.f32 %v239_v40, %v257_v36  ;;  %v242_v36 = vmax.f32 %v234_v61, %v704_v13 }
  0x9f   : > { %v278_v54 = vmax.f32 %v238_v41, %v255_v51  ;;  %v316_v51 = vrot.slane %v146_v39, 1 }
  0xa0   : > { %v327_v58 = vmax.f32 %v279_v9, %v299_v30 }
  0xa1   : > { %v326_v33 = vmax.f32 %v278_v54, %v296_v44  ;;  %v261_v23 = vpop.permute.xlu1 %260  ;;  %v317_v56 = vsel %vm197_vm0, %v315_v21, %v316_v51 }
  0xa2   : > { %v259_v29 = vpop.permute.xlu0 %258  ;;  %v335_v30 = vmax.f32 %v327_v58, %v641_v0  ;;  %v281_v41 = vmax.f32 %v241_v59, %v261_v23 }
  0xa3   : > { %v334_v40 = vmax.f32 %v326_v33, %v654_v3  ;;  %v280_v10 = vmax.f32 %v240_v34, %v259_v29  ;;  %v355_v34 = vrot.slane %v721_v16, 1 }
  0xa4   : > { %v347_v35 = vmax.f32 %v335_v30, %v725_v17  ;;  %v329_v43 = vmax.f32 %v281_v41, %v305_v20 }
  0xa5   : > { %v346_v0 = vmax.f32 %v334_v40, %v733_v26  ;;  %v328_v3 = vmax.f32 %v280_v10, %v302_v25  ;;  %v265_v32 = vpop.permute.xlu1 %264 }
  0xa6   : > { %v263_v44 = vpop.permute.xlu0 %262  ;;  %v360_v9 = vmax.f32 %v347_v35, %v773_v63  ;;  %v337_v62 = vmax.f32 %v329_v43, %v664_v5  ;;  %v283_v26 = vmax.f32 %v243_v31, %v265_v32  ;;  %v244_v5 = vmax.f32 %v236_v42, %v714_v15 }
  0xa7   : > { %v359_v50 = vmax.f32 %v346_v0, %v753_v45  ;;  %v336_v17 = vmax.f32 %v328_v3, %v651_v2  ;;  %v282_v54 = vmax.f32 %v242_v36, %v263_v44  ;;  %v245_v45 = vmax.f32 %v237_v38, %v711_v14  ;;  %v148_v2 = vld [vmem:[%s638_s22 + $0x110] sm:$0x1] }
  0xa8   : > { %369 = vst.msk [vmem:[%s840_s26 + $0x8] sm:$0xff] %vm367_vm1, %v360_v9  ;;  %v349_v12 = vmax.f32 %v337_v62, %v757_v47  ;;  %v331_v63 = vmax.f32 %v283_v26, %v311_v48  ;;  %v314_v47 = vsel %vm197_vm0, %v312_v22, %v313_v52  ;;  %v356_v60 = vrot.slane %v148_v2, 1 }
  0xa9   : > { %368 = vst.msk [vmem:[%s840_s26] sm:$0xff] %vm367_vm1, %v359_v50  ;;  %v348_v13 = vmax.f32 %v336_v17, %v731_v24  ;;  %v330_v55 = vmax.f32 %v282_v54, %v308_v49  ;;  %v269_v57 = vpop.permute.xlu1 %268 }
  0xaa   : > { %v267_v37 = vpop.permute.xlu0 %266  ;;  %v362_v24 = vmax.f32 %v349_v12, %v789_v28  ;;  %v285_v33 = vmax.f32 %v245_v45, %v269_v57  ;;  %v339_v14 = vmax.f32 %v331_v63, %v674_v7  ;;  %v357_v25 = vsel %vm197_vm0, %v355_v34, %v356_v60 }
  0xab   : > { %v361_v58 = vmax.f32 %v348_v13, %v776_v1  ;;  %v284_v59 = vmax.f32 %v244_v5, %v267_v37  ;;  %v338_v21 = vmax.f32 %v330_v55, %v661_v4 }
  0xac   : > { %371 = vst.msk [vmem:[%s840_s26 + $0x18] sm:$0xff] %vm367_vm1, %v362_v24  ;;  %v333_v15 = vmax.f32 %v285_v33, %v317_v56  ;;  %v351_v1 = vmax.f32 %v339_v14, %v780_v19 }
  0xad   : > { %370 = vst.msk [vmem:[%s840_s26 + $0x10] sm:$0xff] %vm367_vm1, %v361_v58  ;;  %v332_v22 = vmax.f32 %v284_v59, %v314_v47  ;;  %v350_v28 = vmax.f32 %v338_v21, %v755_v46 }
  0xae   : > { %v344_v61 = vpop.permute.xlu0 %343  ;;  %v341_v4 = vmax.f32 %v333_v15, %v721_v16  ;;  %v364_v7 = vmax.f32 %v351_v1, %v807_v8 }
  0xaf   : > { %v340_v20 = vmax.f32 %v332_v22, %v671_v6  ;;  %v363_v23 = vmax.f32 %v350_v28, %v786_v27 }
  0xb0   : > { %v353_v46 = vmax.f32 %v341_v4, %v344_v61  ;;  %373 = vst.msk [vmem:[%s840_s26 + $0x28] sm:$0xff] %vm367_vm1, %v364_v7 }
  0xb1   : > { %v352_v19 = vmax.f32 %v340_v20, %v778_v18  ;;  %372 = vst.msk [vmem:[%s840_s26 + $0x20] sm:$0xff] %vm367_vm1, %v363_v23 }
  0xb2   : > { %v366_v16 = vmax.f32 %v353_v46, %v357_v25 }
  0xb3   : > { %v365_v6 = vmax.f32 %v352_v19, %v804_v53 }
  0xb4   : > { %375 = vst.msk [vmem:[%s840_s26 + $0x38] sm:$0xff] %vm367_vm1, %v366_v16 }
  0xb5   : > { %374 = vst.msk [vmem:[%s840_s26 + $0x30] sm:$0xff] %vm367_vm1, %v365_v6 }
  0xb6   : > { %520 = shalt.err (!%p517_p3)
}
  0xb7   : > { %s521_s13 = scalar_lea.hbm %s883_s2, 1024  ;;  %s525_s19 = scalar_lea.hbm %s936_s1, 2048 }
  0xb8   : > { %p522_p4 = scmp.ne.s32.totalorder %s883_s2, %s521_s13  ;;  %p526_p9 = scmp.lt.u32.totalorder %s883_s2, %s936_s1 }
  0xb9   : > { %p527_p10 = scmp.lt.u32.totalorder %s525_s19, %s521_s13  ;;  %p529_p12 = scmp.lt.u32.totalorder %s521_s13, %s883_s2 }
  0xba   : > { %p523_p7 = pnand %p522_p4, %p623_p5 }
  0xbb   : > { %p528_p11 = por %p527_p10, %p526_p9 }
  0xbc   : > { %p524_p8 = pneg %p523_p7 }
  0xbd   : > { %p530_p13 = por %p529_p12, %p528_p11 }
  0xbf   : > { %p531_p0 = pnand %p530_p13, %p524_p8 }
  0xc1   : > { %534 = shalt.err (!%p531_p0)
}
  0xc2   : > { %s573_s22 = smov 128   ;;  %s574_s23 = smov 8  }
  0xc3   : > { %465 = dma.vmem_to_hbm [thread:$0]  (%p623_p5), %s885_s28, 1024, %s883_s2, %s894_s3, %s573_s22, %s573_s22, %s574_s23  }
  0xc4 PF: > { %p471_p1 = scmp.ge.s32.totalorder %s569_s9, 2  ;;  %s405_s24 = sand.u32 1, %s557_s6  }
  0xc5   : > { %s406_s25 = scalar_lea.sflag [#allocation3], %s405_s24 }
  0xc6   : > { %p468_p2 = pnand %p471_p1, %p627_p6 }
  0xc8   : > { %552 = dma.done.wait (!%p468_p2), %s406_s25, 1024  }
  0xc9   : > { %554 = vsyncadd (!%p468_p2), %s406_s25, 4294966272  ;;  %p11_p3 = scmp.ge.s32.totalorder %s610_s12, 4   ;;  %s939_s6 = smov %s561_s7 }
  0xca   : > { %s940_s7 = smov %s565_s8  ;;  %s941_s8 = smov %s621_s15 }
  0xcb   : > { %s942_s9 = smov %s610_s12  ;;  %13 = sbr.rel (!%p11_p3) target bundleno = 3 (0x3), region = 59 }
  0xd2   :  { %411 = vsyncpa [#allocation3], 1 }
  0xd3   :  { %413 = vsyncpa [#allocation3 + $0x1], 1 }

// kernel: thermal_module_forward.2
= control target key start
LH: loop header
LB: loop body
LE: loop exit
PB: predicated region body
PF: predicated region fallthrough
CT: control target
= control target key end

     0   :  { %s6801_s12 = smov 0   ;;  %s8757_s0 = inlined_call_operand.vmem [shape: bf16[2,19,19,12], index: 0, kind: input, shape index: {}]   ;;  %s8758_s1 = inlined_call_operand.vmem [shape: bf16[16,12,64], index: 1, kind: input, shape index: {}]   ;;  %s8759_s2 = inlined_call_operand.vmem [shape: f32[1,64], index: 2, kind: input, shape index: {}]   ;;  %s8760_s3 = inlined_call_operand.vmem [shape: f32[2,256,64], index: 3, kind: output, shape index: {}]  }
   0x1 LB: > { %s4985_s13 = sadd.s32 4294967295, %s6779_s12   ;;  %p4989_p0 = scmp.ge.s32.totalorder %s6779_s12, 1  ;;  %s6779_s12 = sphi %s6801_s12, %s13_s12  }
   0x2   : > { %p137_p1 = scmp.lt.s32.totalorder %s6779_s12, 3 }
   0x4   : > { %p138_p2 = pnand %p4989_p0, %p137_p1 }
   0x6   : > { %141 = sbr.rel (%p138_p2) target bundleno = 777 (0x309), region = 32 }
   0xd   : > { %vm723_vm0 = vcmask 1045504   ;;  %p161_p3 = scmp.lt.s32.totalorder %s4985_s13, 1  ;;  %v6715_v0 = vld [vmem:[%s8758_s1 + $0x40] sm:$0x3f]   ;;  %v6718_v1 = vld [vmem:[%s8758_s1 + $0x8] sm:$0x3f]  }
   0xe   : > { %6698 = vmatprep.subr.msk.bf16.mxu0 %vm723_vm0, %v6715_v0  ;;  %v3065_v2 = vsel %vm723_vm0, %v6715_v0, 0  ;;  %6690 = vmatprep.subr.msk.bf16.mxu1 %vm723_vm0, %v6718_v1  ;;  %v725_v3 = vsel %vm723_vm0, %v6718_v1, 0  ;;  %v6825_v4 = vld [vmem:[%s8758_s1] sm:$0x3f]   ;;  %v6835_v5 = vld [vmem:[%s8758_s1 + $0x48] sm:$0x3f]  }
   0xf   : > { %s9280_s13 = smov (!%p161_p3, %s4985_s13), 1  ;;  %5939 = vmatpush3.bf16.msra.mxu0 %v3065_v2  ;;  %5667 = vmatpush3.bf16.msra.mxu1 %v725_v3  ;;  %vm674_vm1 = vcmask 97280   ;;  %vm231_vm2 = vsmask.f32 3328  ;;  %vm232_vm3 = vsmask.f32 7440 }
  0x10   : > { %s6706_s18 = smul.u32 228, %s9280_s13  ;;  %6691 = vmatprep.subr.msk.bf16.mxu1 %vm723_vm0, %v6825_v4  ;;  %6699 = vmatprep.subr.msk.bf16.mxu0 %vm723_vm0, %v6835_v5  ;;  %vm6942_vm4 = vmor %vm231_vm2, %vm232_vm3  ;;  %v8973_v45 = vmov 0  ;;  %vm1201_vm5 = vcmask 1042432   ;;  %vm1202_vm6 = vcmask 1046532   ;;  %vm1616_vm8 = vsmask.f32 2304 }
  0x11   : > { %v8974_v45 = vsel %vm6942_vm4, 4294967295, %v8973_v45  ;;  %vm7529_vm7 = vmor %vm1201_vm5, %vm1202_vm6  ;;  %vm1617_vm9 = vsmask.f32 6416  ;;  %s5393_s27 = sshll.u32 %s9280_s13, 8  ;;  %vm4897_vm11 = vcmask 523264  }
  0x12   : > { %s6830_s23 = scalar_lea.vmem %s8757_s0, %s6706_s18  ;;  %8975 = vst [vmem:[#allocation9_spill] sm:$0xff] %v8974_v45  ;;  %vm7734_vm10 = vmor %vm1616_vm8, %vm1617_vm9  ;;  %s8657_s30 = scalar_lea.vmem %s8760_s3, %s5393_s27 }
  0x13   : > { %v6838_v6 = vld [vmem:[%s6830_s23 + $0x18] sm:$0xf]  ;;  %v6841_v7 = vld [vmem:[%s6830_s23 + $0x1c] sm:$0xf]  ;;  %v6852_v9 = vld [vmem:[%s6830_s23 + $0x24] sm:$0xf] }
  0x14   : > { %v6849_v8 = vcombine.low %v6838_v6, %v6841_v7  ;;  %v6855_v10 = vld [vmem:[%s6830_s23 + $0x28] sm:$0xf]  ;;  %v307_v11 = vshrl.u32 %v6852_v9, 16  ;;  %v310_v12 = vshll.u32 %v6852_v9, 16  ;;  %v6862_v13 = vld [vmem:[%s6830_s23 + $0x30] sm:$0xf] }
  0x15   : > { %8967 = vst [vmem:[#allocation3_spill] sm:$0xff] %v6862_v13  ;;  %v6865_v14 = vld [vmem:[%s6830_s23 + $0x34] sm:$0xf]  ;;  %v6869_v15 = vcombine.low %v6852_v9, %v6855_v10  ;;  %v6872_v16 = vld [vmem:[%s6830_s23] sm:$0xf]  ;;  %v8770_v21 = vshrl.u32 %v6838_v6, 16 }
  0x16   : > { %8966 = vst [vmem:[#allocation2_spill] sm:$0xff] %v6849_v8  ;;  %5940 = vmatprep.mubr.msk.bf16.mxu0 %vm674_vm1, %v6849_v8  ;;  %8968 = vst [vmem:[#allocation4_spill] sm:$0xff] %v6865_v14  ;;  %v6875_v17 = vld [vmem:[%s6830_s23 + $0x4] sm:$0xf]  ;;  %v6879_v18 = vrot.slane %v307_v11, 5  ;;  %v6883_v19 = vrot.slane %v310_v12, 6  ;;  %v6893_v22 = vcombine.low %v6862_v13, %v6865_v14 }
  0x17   : > { %8969 = vst [vmem:[#allocation5_spill] sm:$0xff] %v6869_v15  ;;  %v6886_v20 = vld [vmem:[%s6830_s23 + $0x8] sm:$0x3]  ;;  %5941 = vmatmul.mubr.msk.bf16.vlgmr.msra.gmra.mrb[0].mxu0 %vm674_vm1, %v6869_v15  ;;  %v8766_v24 = vshrl.u32 %v6872_v16, 16  ;;  %v8764_v25 = vshll.u32 %v6872_v16, 16  ;;  %v8762_v26 = vshll.u32 %v6875_v17, 16 }
  0x18   : > { %8970 = vst [vmem:[#allocation6_spill] sm:$0xff] %v6893_v22  ;;  %v8769_v27 = vshll.u32 %v6838_v6, 16  ;;  %v8768_v28 = vshrl.u32 %v6841_v7, 16  ;;  %5944 = vmatprep.mubr.msk.bf16.mxu0 %vm674_vm1, %v6893_v22  ;;  %v8763_v29 = vshrl.u32 %v6875_v17, 16  ;;  %v8761_v30 = vshll.u32 %v6886_v20, 16 }
  0x19   : > { %v237_v31 = vrot.slane %v8766_v24, 4  ;;  %v240_v32 = vrot.slane %v8764_v25, 5  ;;  %v246_v33 = vrot.slane %v8762_v26, 5  ;;  %v6913_v34 = vld [vmem:[%s6830_s23 + $0x3c] sm:$0xf]  ;;  %v6925_v38 = vrot.slane %v8770_v21, 4 }
  0x1a   : > { %8971 = vst [vmem:[#allocation7_spill] sm:$0xff] %v6913_v34  ;;  %v250_v35 = vrot.slane %v8763_v29, 4  ;;  %v6918_v36 = vld [vmem:[%s6830_s23 + $0x40] sm:$0xf]  ;;  %v6921_v37 = vld [vmem:[%s6830_s23 + $0xc] sm:$0xf] }
  0x1b   : > { %8972 = vst [vmem:[#allocation8_spill] sm:$0xff] %v6918_v36  ;;  %v8767_v39 = vshll.u32 %v6841_v7, 16  ;;  %v241_v40 = vor.u32 %v240_v32, %v237_v31  ;;  %v6929_v41 = vld [vmem:[%s6830_s23 + $0x10] sm:$0xf]  ;;  %v177_v42 = vld [vmem:[%s6830_s23 + $0x14] sm:$0x3]  ;;  %v6950_v49 = vcombine.low %v6913_v34, %v6918_v36 }
  0x1c   : > { %v6934_v43 = vrot.slane %v8769_v27, 5  ;;  %v6938_v44 = vrot.slane %v8768_v28, 4  ;;  %v251_v46 = vor.u32 %v250_v35, %v246_v33  ;;  %v256_v47 = vrot.slane %v8761_v30, 5 }
  0x1d   : > { %v242_v48 = vrot.slane %v241_v40, 4  ;;  %8976 = vst [vmem:[#allocation10_spill] sm:$0xff] %v6950_v49  ;;  %v259_v50 = vshrl.u32 %v6921_v37, 16  ;;  %v262_v51 = vshll.u32 %v6921_v37, 16  ;;  %v268_v53 = vshll.u32 %v6929_v41, 16 }
  0x1e   : > { %v252_v52 = vrot.slane %v251_v46, 4  ;;  %v272_v54 = vshrl.u32 %v6929_v41, 16  ;;  %v278_v55 = vshll.u32 %v177_v42, 16  ;;  %v320_v56 = vshrl.u32 %v6855_v10, 16 }
  0x1f   : > { %v247_v57 = vsel %vm6942_vm4, %v242_v48, %v246_v33  ;;  %5945 = vmatmul.mubr.msk.bf16.gmra.mrb[4].mxu0 %vm674_vm1, %v6950_v49  ;;  %v261_v58 = vrot.slane %v259_v50, 4  ;;  %v264_v59 = vrot.slane %v262_v51, 5  ;;  %v270_v61 = vrot.slane %v268_v53, 5 }
  0x20   : > { %v257_v60 = vsel %vm6942_vm4, %v252_v52, %v256_v47  ;;  %v274_v62 = vrot.slane %v272_v54, 4  ;;  %v280_v63 = vrot.slane %v278_v55, 5  ;;  %v6963_v2 = vrot.slane %v259_v50, 5  ;;  %v6974_v50 = vld [vmem:[%s6830_s23 + $0x48] sm:$0xf] }
  0x21   : > { %v4995_v0 = vcombine.low %v247_v57, %v257_v60  ;;  %v265_v1 = vor.u32 %v264_v59, %v261_v58  ;;  %v6965_v3 = vrot.slane %v262_v51, 6  ;;  %v1638_v32 = vrot.slane %v272_v54, 5  ;;  %8980 = vst [vmem:[#allocation14_spill] sm:$0xff] %v6974_v50  ;;  %v6983_v54 = vld [vmem:[%s6830_s23 + $0x4c] sm:$0xf] }
  0x22   : > { %8977 = vst [vmem:[#allocation11_spill] sm:$0xff] %v6963_v2  ;;  %v275_v31 = vor.u32 %v274_v62, %v270_v61  ;;  %v1639_v33 = vrot.slane %v268_v53, 6  ;;  %v1643_v35 = vshrl.u32 %v177_v42, 16  ;;  %v8771_v40 = vshrl.u32 %v6862_v13, 16  ;;  %8983 = vst [vmem:[#allocation17_spill] sm:$0xff] %v6983_v54 }
  0x23   : > { %8978 = vst [vmem:[#allocation12_spill] sm:$0xff] %v6965_v3  ;;  %5668 = vmatprep.mubr.msk.bf16.mxu1 %vm674_vm1, %v4995_v0  ;;  %v266_v46 = vrot.slane %v265_v1, 4  ;;  %v6971_v48 = vrot.slane %v278_v55, 6  ;;  %v3299_v42 = vsel %vm723_vm0, %v6835_v5, 0  ;;  %v1668_v57 = vrot.slane %v320_v56, 5 }
  0x24   : > { %v276_v51 = vrot.slane %v275_v31, 4  ;;  %v6976_v52 = vor.u32 %v1639_v33, %v1638_v32  ;;  %v6978_v53 = vrot.slane %v1643_v35, 5  ;;  %v8772_v58 = vshll.u32 %v6862_v13, 16  ;;  %5973 = vmatpush3.bf16.msra.mxu0 %v3299_v42  ;;  %v6990_v60 = vld [vmem:[%s6830_s23 + $0x20] sm:$0x3] }
  0x25   : > { %8979 = vst [vmem:[#allocation13_spill] sm:$0xff] %v6971_v48  ;;  %v8773_v55 = vshrl.u32 %v6865_v14, 16  ;;  %v271_v59 = vsel %vm6942_vm4, %v266_v46, %v270_v61  ;;  %v8776_v62 = vshrl.u32 %v6913_v34, 16  ;;  %v1022_v1 = vsel %vm723_vm0, %v6825_v4, 0  ;;  %v7000_v31 = vld [vmem:[%s6830_s23 + $0x54] sm:$0xf] }
  0x26   : > { %8981 = vst [vmem:[#allocation15_spill] sm:$0xff] %v6976_v52  ;;  %8982 = vst [vmem:[#allocation16_spill] sm:$0xff] %v6978_v53  ;;  %v281_v0 = vsel %vm6942_vm4, %v276_v51, %v280_v63  ;;  %v7003_v32 = vld [vmem:[%s6830_s23 + $0x58] sm:$0xf]  ;;  %v7009_v33 = vcombine.low %v6974_v50, %v6983_v54  ;;  %v289_v35 = vor.u32 %v6934_v43, %v6925_v38  ;;  %v294_v63 = vrot.slane %v8767_v39, 5 }
  0x27   : > { %8984 = vst [vmem:[#allocation18_spill] sm:$0xff] %v7000_v31  ;;  %8985 = vst [vmem:[#allocation19_spill] sm:$0xff] %v7003_v32  ;;  %v7005_v61 = vcombine.low %v271_v59, %v281_v0  ;;  %v8777_v46 = vshll.u32 %v6913_v34, 16  ;;  %v8778_v4 = vshrl.u32 %v6918_v36, 16  ;;  %v8765_v42 = vshll.u32 %v6990_v60, 16 }
  0x28   : > { %8987 = vst [vmem:[#allocation21_spill] sm:$0xff] %v7009_v33  ;;  %v7020_v59 = vld [vmem:[%s6830_s23 + $0x2c] sm:$0x3]  ;;  %5948 = vmatprep.mubr.msk.bf16.mxu0 %vm674_vm1, %v7009_v33  ;;  %v290_v38 = vrot.slane %v289_v35, 4  ;;  %v299_v43 = vor.u32 %v6938_v44, %v294_v63  ;;  %v7029_v0 = vcombine.low %v7000_v31, %v7003_v32  ;;  %v309_v5 = vrot.slane %v307_v11, 4 }
  0x29   : > { %8986 = vst [vmem:[#allocation20_spill] sm:$0xff] %v7005_v61  ;;  %5669 = vmatmul.mubr.msk.bf16.vlgmr.msra.gmra.mrb[0].mxu1 %vm674_vm1, %v7005_v61  ;;  %v304_v47 = vrot.slane %v8765_v42, 5  ;;  %v312_v30 = vrot.slane %v310_v12, 5  ;;  %v316_v26 = vshll.u32 %v6855_v10, 16  ;;  %v322_v35 = vrot.slane %v320_v56, 4 }
  0x2a   : > { %8988 = vst [vmem:[#allocation22_spill] sm:$0xff] %v7029_v0  ;;  %5701 = vmatpush3.bf16.msra.mxu1 %v1022_v1  ;;  %v295_v29 = vsel %vm6942_vm4, %v290_v38, %v294_v63  ;;  %v300_v25 = vrot.slane %v299_v43, 4  ;;  %5949 = vmatmul.mubr.msk.bf16.gmra.mrb[8].mxu0 %vm674_vm1, %v7029_v0  ;;  %v326_v11 = vshll.u32 %v7020_v59, 16  ;;  %v7045_v1 = vld [vmem:[%s6830_s23 + $0x60] sm:$0xf]  ;;  %v1673_v23 = vshrl.u32 %v7020_v59, 16 }
  0x2b   : > { %8989 = vst [vmem:[#allocation23_spill] sm:$0xff] %v7045_v1  ;;  %v313_v42 = vor.u32 %v312_v30, %v309_v5  ;;  %v318_v24 = vrot.slane %v316_v26, 5  ;;  %v1669_v12 = vrot.slane %v316_v26, 6  ;;  %v7049_v56 = vld [vmem:[%s6830_s23 + $0x64] sm:$0xf]  ;;  %v9016_v53 = vshll.u32 %v7000_v31, 16 }
  0x2c   : > { %8990 = vst [vmem:[#allocation24_spill] sm:$0xff] %v7049_v56  ;;  %v305_v63 = vsel %vm6942_vm4, %v300_v25, %v304_v47  ;;  %v328_v38 = vrot.slane %v326_v11, 5  ;;  %v7054_v43 = vrot.slane %v326_v11, 6  ;;  %v7062_v44 = vrot.slane %v1673_v23, 5  ;;  %v7069_v47 = vld [vmem:[%s6830_s23 + $0x38] sm:$0x3] }
  0x2d   : > { %v7056_v28 = vcombine.low %v295_v29, %v305_v63  ;;  %v314_v27 = vrot.slane %v313_v42, 4  ;;  %v323_v30 = vor.u32 %v322_v35, %v318_v24  ;;  %v7058_v5 = vor.u32 %v1669_v12, %v1668_v57  ;;  %8995 = vst [vmem:[#allocation29_spill] sm:$0xff] %v7069_v47  ;;  %v7079_v23 = vld [vmem:[%s6830_s23 + $0x6c] sm:$0xf]  ;;  %v7104_v39 = vld [vmem:[%s6830_s23 + $0x44] sm:$0x3] }
  0x2e   : > { %8991 = vst [vmem:[#allocation25_spill] sm:$0xff] %v7054_v43  ;;  %8993 = vst [vmem:[#allocation27_spill] sm:$0xff] %v7062_v44  ;;  %v7066_v25 = vcombine.low %v7045_v1, %v7049_v56  ;;  %v333_v35 = vrot.slane %v8771_v40, 4  ;;  %v336_v12 = vrot.slane %v8772_v58, 5  ;;  %v8775_v63 = vshll.u32 %v6865_v14, 16 }
  0x2f   : > { %8992 = vst [vmem:[#allocation26_spill] sm:$0xff] %v7056_v28  ;;  %5672 = vmatprep.mubr.msk.bf16.mxu1 %vm674_vm1, %v7056_v28  ;;  %v319_v57 = vsel %vm6942_vm4, %v314_v27, %v318_v24  ;;  %v324_v42 = vrot.slane %v323_v30, 4  ;;  %8996 = vst [vmem:[#allocation30_spill] sm:$0xff] %v7079_v23  ;;  %v346_v24 = vrot.slane %v8773_v55, 4  ;;  %v7091_v27 = vld [vmem:[%s6830_s23 + $0x70] sm:$0xf] }
  0x30   : > { %8994 = vst [vmem:[#allocation28_spill] sm:$0xff] %v7066_v25  ;;  %5952 = vmatprep.mubr.msk.bf16.mxu0 %vm674_vm1, %v7066_v25  ;;  %8997 = vst [vmem:[#allocation31_spill] sm:$0xff] %v7091_v27  ;;  %v8774_v29 = vshll.u32 %v7069_v47, 16  ;;  %v337_v26 = vor.u32 %v336_v12, %v333_v35  ;;  %v342_v55 = vrot.slane %v8775_v63, 5  ;;  %v357_v11 = vrot.slane %v8776_v62, 4 }
  0x31   : > { %v329_v30 = vsel %vm6942_vm4, %v324_v42, %v328_v38  ;;  %8999 = vst [vmem:[#allocation33_spill] sm:$0xff] %v7104_v39  ;;  %v7110_v42 = vcombine.low %v7079_v23, %v7091_v27  ;;  %v370_v63 = vrot.slane %v8778_v4, 4  ;;  %v7125_v58 = vld [vmem:[%s6830_s23 + $0x7c] sm:$0xf]  ;;  %v7138_v62 = vld [vmem:[%s6830_s23 + $0x50] sm:$0x3] }
  0x32   : > { %v7098_v21 = vcombine.low %v319_v57, %v329_v30  ;;  %v352_v38 = vrot.slane %v8774_v29, 5  ;;  %v360_v57 = vrot.slane %v8777_v46, 5  ;;  %v7117_v30 = vld [vmem:[%s6830_s23 + $0x78] sm:$0xf]  ;;  %v338_v35 = vrot.slane %v337_v26, 4  ;;  %9002 = vst [vmem:[#allocation36_spill] sm:$0xff] %v7125_v58 }
  0x33   : > { %9000 = vst [vmem:[#allocation34_spill] sm:$0xff] %v7110_v42  ;;  %9001 = vst [vmem:[#allocation35_spill] sm:$0xff] %v7117_v30  ;;  %v347_v12 = vor.u32 %v346_v24, %v342_v55  ;;  %v8784_v29 = vshll.u32 %v6918_v36, 16  ;;  %5953 = vmatmul.mubr.msk.bf16.gmra.mrb[12].mxu0 %vm674_vm1, %v7110_v42  ;;  %v8785_v26 = vshll.u32 %v7104_v39, 16  ;;  %v7154_v4 = vld [vmem:[%s6830_s23 + $0x84] sm:$0xf] }
  0x34   : > { %8998 = vst [vmem:[#allocation32_spill] sm:$0xff] %v7098_v21  ;;  %5673 = vmatmul.mubr.msk.bf16.gmra.mrb[4].mxu1 %vm674_vm1, %v7098_v21  ;;  %v361_v46 = vor.u32 %v360_v57, %v357_v11  ;;  %v343_v24 = vsel %vm6942_vm4, %v338_v35, %v342_v55  ;;  %9003 = vst [vmem:[#allocation37_spill] sm:$0xff] %v7138_v62  ;;  %v7144_v11 = vcombine.low %v7117_v30, %v7125_v58  ;;  %v7247_v42 = vld [vmem:[%s6830_s23 + $0xa0] sm:$0xf]  ;;  %v7274_v52 = vld [vmem:[%s6830_s23 + $0xa8] sm:$0xf] }
  0x35   : > { %v348_v51 = vrot.slane %v347_v12, 4  ;;  %v366_v61 = vrot.slane %v8784_v29, 5  ;;  %v376_v34 = vrot.slane %v8785_v26, 5  ;;  %v9005_v57 = vshrl.u32 %v6974_v50, 16  ;;  %9007 = vst [vmem:[#allocation39_spill] sm:$0xff] %v7154_v4  ;;  %9024 = vst [vmem:[#allocation48_spill] sm:$0xff] %v7247_v42 }
  0x36   : > { %v362_v40 = vrot.slane %v361_v46, 4  ;;  %9004 = vst [vmem:[#allocation38_spill] sm:$0xff] %v7144_v11  ;;  %v9006_v12 = vshll.u32 %v6974_v50, 16  ;;  %v8794_v46 = vshll.u32 %v6983_v54, 16  ;;  %v7157_v26 = vld [vmem:[%s6830_s23 + $0x88] sm:$0xf]  ;;  %5956 = vmatprep.mubr.msk.bf16.mxu0 %vm674_vm1, %v7144_v11 }
  0x37   : > { %v381_v14 = vrot.slane %v9005_v57, 4  ;;  %v353_v55 = vsel %vm6942_vm4, %v348_v51, %v352_v38  ;;  %v371_v35 = vor.u32 %v370_v63, %v366_v61  ;;  %9008 = vst [vmem:[#allocation40_spill] sm:$0xff] %v7157_v26  ;;  %v9010_v57 = vshrl.u32 %v6983_v54, 16  ;;  %v7169_v63 = vld [vmem:[%s8758_s1 + $0x10] sm:$0x3f]   ;;  %9029 = vst [vmem:[#allocation51_spill] sm:$0xff] %v7274_v52 }
  0x38   : > { %v384_v29 = vrot.slane %v9006_v12, 5  ;;  %v7159_v36 = vcombine.low %v343_v24, %v353_v55  ;;  %v367_v38 = vsel %vm6942_vm4, %v362_v40, %v366_v61  ;;  %v390_v55 = vrot.slane %v8794_v46, 5  ;;  %v7176_v50 = vld [vmem:[%s6830_s23 + $0x5c] sm:$0x3]  ;;  %6692 = vmatprep.subr.msk.bf16.mxu1 %vm723_vm0, %v7169_v63  ;;  %v7203_v54 = vld [vmem:[%s6830_s23 + $0x94] sm:$0xf] }
  0x39   : > { %v394_v13 = vrot.slane %v9010_v57, 4  ;;  %v372_v12 = vrot.slane %v371_v35, 4  ;;  %9011 = vst [vmem:[#allocation42_spill] sm:$0xff] %v7176_v50  ;;  %v9012_v39 = vshll.u32 %v7138_v62, 16  ;;  %v7186_v61 = vcombine.low %v7154_v4, %v7157_v26  ;;  %v7200_v57 = vld [vmem:[%s6830_s23 + $0x90] sm:$0xf] }
  0x3a   : > { %9009 = vst [vmem:[#allocation41_spill] sm:$0xff] %v7159_v36  ;;  %v385_v24 = vor.u32 %v384_v29, %v381_v14  ;;  %5676 = vmatprep.mubr.msk.bf16.mxu1 %vm674_vm1, %v7159_v36  ;;  %v7193_v14 = vld [vmem:[%s8758_s1 + $0x50] sm:$0x3f]   ;;  %v9014_v51 = vshrl.u32 %v7000_v31, 16  ;;  %v408_v48 = vrot.slane %v9016_v53, 5  ;;  %v8813_v31 = vshll.u32 %v7176_v50, 16 }
  0x3b   : > { %v400_v40 = vrot.slane %v9012_v39, 5  ;;  %9013 = vst [vmem:[#allocation43_spill] sm:$0xff] %v7186_v61  ;;  %v377_v29 = vsel %vm6942_vm4, %v372_v12, %v376_v34  ;;  %v395_v46 = vor.u32 %v394_v13, %v390_v55  ;;  %5957 = vmatmul.mubr.msk.bf16.gmra.mrb[16].mxu0 %vm674_vm1, %v7186_v61  ;;  %v9017_v13 = vshrl.u32 %v7003_v32, 16  ;;  %6700 = vmatprep.subr.msk.bf16.mxu0 %vm723_vm0, %v7193_v14  ;;  %v7421_v43 = vld [vmem:[%s6830_s23 + $0xa4] sm:$0x3] }
  0x3c   : > { %v386_v35 = vrot.slane %v385_v24, 4  ;;  %v405_v39 = vrot.slane %v9014_v51, 4  ;;  %v7205_v62 = vcombine.low %v367_v38, %v377_v29  ;;  %v7215_v24 = vld [vmem:[%s6830_s23 + $0x68] sm:$0x3]  ;;  %v9019_v61 = vshll.u32 %v7003_v32, 16  ;;  %9057 = vst [vmem:[#allocation66_spill] sm:$0xff] %v7421_v43 }
  0x3d   : > { %v418_v12 = vrot.slane %v9017_v13, 4  ;;  %9018 = vst [vmem:[#allocation45_spill] sm:$0xff] %v7215_v24  ;;  %v396_v29 = vrot.slane %v395_v46, 4  ;;  %v7230_v51 = vld [vmem:[%s6830_s23 + $0x9c] sm:$0xf]  ;;  %v9021_v53 = vshrl.u32 %v7045_v1, 16 }
  0x3e   : > { %9015 = vst [vmem:[#allocation44_spill] sm:$0xff] %v7205_v62  ;;  %v391_v38 = vsel %vm6942_vm4, %v386_v35, %v390_v55  ;;  %5677 = vmatmul.mubr.msk.bf16.gmra.mrb[8].mxu1 %vm674_vm1, %v7205_v62  ;;  %v409_v34 = vor.u32 %v408_v48, %v405_v39  ;;  %v414_v47 = vrot.slane %v9019_v61, 5  ;;  %v424_v55 = vrot.slane %v8813_v31, 5 }
  0x3f   : > { %v401_v46 = vsel %vm6942_vm4, %v396_v29, %v400_v40  ;;  %v7238_v35 = vcombine.low %v7200_v57, %v7203_v54  ;;  %v429_v13 = vrot.slane %v9021_v53, 4  ;;  %v9023_v32 = vshll.u32 %v7045_v1, 16 }
  0x40   : > { %v7242_v48 = vcombine.low %v391_v38, %v401_v46  ;;  %v410_v39 = vrot.slane %v409_v34, 4  ;;  %v419_v61 = vor.u32 %v418_v12, %v414_v47  ;;  %v9025_v53 = vshrl.u32 %v7049_v56, 16  ;;  %v7257_v12 = vld [vmem:[%s6830_s23 + $0x74] sm:$0x3] }
  0x41   : > { %9020 = vst [vmem:[#allocation46_spill] sm:$0xff] %v7238_v35  ;;  %v432_v11 = vrot.slane %v9023_v32, 5  ;;  %5960 = vmatprep.mubr.msk.bf16.mxu0 %vm674_vm1, %v7238_v35  ;;  %v8821_v34 = vshll.u32 %v7215_v24, 16  ;;  %9026 = vst [vmem:[#allocation49_spill] sm:$0xff] %v7257_v12  ;;  %v9027_v1 = vshll.u32 %v7049_v56, 16  ;;  %v7271_v35 = vcombine.low %v7230_v51, %v7247_v42 }
  0x42   : > { %9022 = vst [vmem:[#allocation47_spill] sm:$0xff] %v7242_v48  ;;  %v442_v38 = vrot.slane %v9025_v53, 4  ;;  %5680 = vmatprep.mubr.msk.bf16.mxu1 %vm674_vm1, %v7242_v48  ;;  %v415_v32 = vsel %vm6942_vm4, %v410_v39, %v414_v47  ;;  %v420_v46 = vrot.slane %v419_v61, 4  ;;  %v7277_v47 = vld [vmem:[%s6830_s23 + $0xac] sm:$0xf]  ;;  %v9030_v39 = vshrl.u32 %v7079_v23, 16 }
  0x43   : > { %v433_v40 = vor.u32 %v432_v11, %v429_v13  ;;  %v438_v53 = vrot.slane %v9027_v1, 5  ;;  %v448_v50 = vrot.slane %v8821_v34, 5  ;;  %9028 = vst [vmem:[#allocation50_spill] sm:$0xff] %v7271_v35  ;;  %v9031_v1 = vshll.u32 %v7079_v23, 16  ;;  %5961 = vmatmul.mubr.msk.bf16.gmra.mrb[20].mxu0 %vm674_vm1, %v7271_v35  ;;  %v7308_v35 = vld [vmem:[%s6830_s23 + $0xb8] sm:$0xf] }
  0x44   : > { %v425_v11 = vsel %vm6942_vm4, %v420_v46, %v424_v55  ;;  %v453_v61 = vrot.slane %v9030_v39, 4  ;;  %v8830_v24 = vshll.u32 %v7091_v27, 16  ;;  %v9033_v56 = vshrl.u32 %v7091_v27, 16 }
  0x45   : > { %v434_v13 = vrot.slane %v433_v40, 4  ;;  %v456_v29 = vrot.slane %v9031_v1, 5  ;;  %v7285_v34 = vcombine.low %v415_v32, %v425_v11  ;;  %v443_v31 = vor.u32 %v442_v38, %v438_v53  ;;  %v7293_v40 = vld [vmem:[%s6830_s23 + $0x80] sm:$0x3] }
  0x46   : > { %v466_v55 = vrot.slane %v9033_v56, 4  ;;  %9034 = vst [vmem:[#allocation53_spill] sm:$0xff] %v7293_v40  ;;  %v8835_v23 = vshll.u32 %v7257_v12, 16  ;;  %v462_v1 = vrot.slane %v8830_v24, 5  ;;  %v7305_v56 = vld [vmem:[%s6830_s23 + $0xb4] sm:$0xf] }
  0x47   : > { %9032 = vst [vmem:[#allocation52_spill] sm:$0xff] %v7285_v34  ;;  %v457_v39 = vor.u32 %v456_v29, %v453_v61  ;;  %5681 = vmatmul.mubr.msk.bf16.gmra.mrb[12].mxu1 %vm674_vm1, %v7285_v34  ;;  %v439_v38 = vsel %vm6942_vm4, %v434_v13, %v438_v53  ;;  %v444_v32 = vrot.slane %v443_v31, 4  ;;  %v7314_v61 = vcombine.low %v7274_v52, %v7277_v47 }
  0x48   : > { %v472_v29 = vrot.slane %v8835_v23, 5  ;;  %v9036_v31 = vshrl.u32 %v7117_v30, 16  ;;  %v467_v24 = vor.u32 %v466_v55, %v462_v1  ;;  %v9037_v11 = vshll.u32 %v7117_v30, 16  ;;  %v7335_v30 = vld [vmem:[%s6830_s23 + $0x8c] sm:$0x3] }
  0x49   : > { %v458_v46 = vrot.slane %v457_v39, 4  ;;  %9035 = vst [vmem:[#allocation54_spill] sm:$0xff] %v7314_v61  ;;  %v449_v13 = vsel %vm6942_vm4, %v444_v32, %v448_v50  ;;  %v8841_v39 = vshll.u32 %v7125_v58, 16  ;;  %5964 = vmatprep.mubr.msk.bf16.mxu0 %vm674_vm1, %v7314_v61  ;;  %v9039_v23 = vshrl.u32 %v7125_v58, 16  ;;  %9040 = vst [vmem:[#allocation56_spill] sm:$0xff] %v7335_v30 }
  0x4a   : > { %v477_v53 = vrot.slane %v9036_v31, 4  ;;  %v480_v27 = vrot.slane %v9037_v11, 5  ;;  %v7323_v12 = vcombine.low %v439_v38, %v449_v13  ;;  %v8842_v31 = vshll.u32 %v7293_v40, 16  ;;  %v7338_v38 = vld [vmem:[%s6830_s23 + $0xc0] sm:$0xf] }
  0x4b   : > { %v490_v2 = vrot.slane %v9039_v23, 4  ;;  %v463_v50 = vsel %vm6942_vm4, %v458_v46, %v462_v1  ;;  %v468_v55 = vrot.slane %v467_v24, 4  ;;  %v486_v11 = vrot.slane %v8841_v39, 5  ;;  %9041 = vst [vmem:[#allocation57_spill] sm:$0xff] %v7338_v38  ;;  %v7351_v24 = vld [vmem:[%s6830_s23 + $0xc4] sm:$0xf] }
  0x4c   : > { %9038 = vst [vmem:[#allocation55_spill] sm:$0xff] %v7323_v12  ;;  %v481_v32 = vor.u32 %v480_v27, %v477_v53  ;;  %5684 = vmatprep.mubr.msk.bf16.mxu1 %vm674_vm1, %v7323_v12  ;;  %v496_v61 = vrot.slane %v8842_v31, 5  ;;  %v7348_v27 = vcombine.low %v7305_v56, %v7308_v35  ;;  %9043 = vst [vmem:[#allocation59_spill] sm:$0xff] %v7351_v24  ;;  %v9044_v39 = vshrl.u32 %v7154_v4, 16 }
  0x4d   : > { %v473_v46 = vsel %vm6942_vm4, %v468_v55, %v472_v29  ;;  %v491_v53 = vor.u32 %v490_v2, %v486_v11  ;;  %v9046_v31 = vshll.u32 %v7154_v4, 16  ;;  %v8854_v58 = vshll.u32 %v7157_v26, 16  ;;  %v7374_v55 = vld [vmem:[%s6830_s23 + $0x98] sm:$0x3] }
  0x4e   : > { %9042 = vst [vmem:[#allocation58_spill] sm:$0xff] %v7348_v27  ;;  %v482_v1 = vrot.slane %v481_v32, 4  ;;  %v501_v13 = vrot.slane %v9044_v39, 4  ;;  %v7357_v23 = vcombine.low %v463_v50, %v473_v46  ;;  %5965 = vmatmul.mubr.msk.bf16.gmra.mrb[24].mxu0 %vm674_vm1, %v7348_v27  ;;  %v9047_v3 = vshrl.u32 %v7157_v26, 16  ;;  %v7377_v32 = vld [vmem:[%s6830_s23 + $0xcc] sm:$0xf] }
  0x4f   : > { %v504_v40 = vrot.slane %v9046_v31, 5  ;;  %v492_v29 = vrot.slane %v491_v53, 4  ;;  %v7371_v50 = vcombine.low %v7338_v38, %v7351_v24  ;;  %9049 = vst [vmem:[#allocation62_spill] sm:$0xff] %v7377_v32  ;;  %v9051_v4 = vshll.u32 %v7335_v30, 16 }
  0x50   : > { %9045 = vst [vmem:[#allocation60_spill] sm:$0xff] %v7357_v23  ;;  %v514_v25 = vrot.slane %v9047_v3, 4  ;;  %v487_v2 = vsel %vm6942_vm4, %v482_v1, %v486_v11  ;;  %5685 = vmatmul.mubr.msk.bf16.gmra.mrb[16].mxu1 %vm674_vm1, %v7357_v23  ;;  %v510_v11 = vrot.slane %v8854_v58, 5  ;;  %v7386_v1 = vld [vmem:[%s6830_s23 + $0xd0] sm:$0xf]  ;;  %v9052_v31 = vshrl.u32 %v7200_v57, 16 }
  0x51   : > { %9048 = vst [vmem:[#allocation61_spill] sm:$0xff] %v7371_v50  ;;  %v505_v46 = vor.u32 %v504_v40, %v501_v13  ;;  %9050 = vst [vmem:[#allocation63_spill] sm:$0xff] %v7386_v1  ;;  %v497_v39 = vsel %vm6942_vm4, %v492_v29, %v496_v61  ;;  %v520_v27 = vrot.slane %v9051_v4, 5  ;;  %5968 = vmatprep.mubr.msk.bf16.mxu0 %vm674_vm1, %v7371_v50  ;;  %v9054_v26 = vshll.u32 %v7200_v57, 16 }
  0x52   : > { %v525_v3 = vrot.slane %v9052_v31, 4  ;;  %v7397_v40 = vcombine.low %v487_v2, %v497_v39  ;;  %v515_v58 = vor.u32 %v514_v25, %v510_v11  ;;  %v8865_v44 = vshll.u32 %v7203_v54, 16 }
  0x53   : > { %v506_v13 = vrot.slane %v505_v46, 4  ;;  %v528_v53 = vrot.slane %v9054_v26, 5  ;;  %v9055_v61 = vshrl.u32 %v7203_v54, 16  ;;  %v8866_v4 = vshll.u32 %v7374_v55, 16 }
  0x54   : > { %9053 = vst [vmem:[#allocation64_spill] sm:$0xff] %v7397_v40  ;;  %v7407_v50 = vcombine.low %v7377_v32, %v7386_v1  ;;  %5688 = vmatprep.mubr.msk.bf16.mxu1 %vm674_vm1, %v7397_v40  ;;  %v516_v26 = vrot.slane %v515_v58, 4  ;;  %v9058_v58 = vshrl.u32 %v7230_v51, 16  ;;  %v9061_v46 = vshrl.u32 %v7247_v42, 16 }
  0x55   : > { %v538_v29 = vrot.slane %v9055_v61, 4  ;;  %v511_v25 = vsel %vm6942_vm4, %v506_v13, %v510_v11  ;;  %v529_v39 = vor.u32 %v528_v53, %v525_v3  ;;  %v534_v61 = vrot.slane %v8865_v44, 5 }
  0x56   : > { %9056 = vst [vmem:[#allocation65_spill] sm:$0xff] %v7407_v50  ;;  %v544_v30 = vrot.slane %v8866_v4, 5  ;;  %v521_v2 = vsel %vm6942_vm4, %v516_v26, %v520_v27  ;;  %5969 = vmatmul.mubr.msk.bf16.gmra.mrb[28].mxu0 %vm674_vm1, %v7407_v50  ;;  %v549_v3 = vrot.slane %v9058_v58, 4  ;;  %v9059_v11 = vshll.u32 %v7230_v51, 16  ;;  %v7439_v27 = vld [vmem:[%s6830_s23 + $0xb0] sm:$0x3] }
  0x57   : > { %v530_v0 = vrot.slane %v529_v39, 4  ;;  %v7431_v13 = vcombine.low %v511_v25, %v521_v2  ;;  %v539_v44 = vor.u32 %v538_v29, %v534_v61  ;;  %v8873_v4 = vshll.u32 %v7247_v42, 16  ;;  %5974 = vmatprep.mubr.msk.bf16.mxu0 %vm674_vm1, %v7056_v28 }
  0x58   : > { %v552_v53 = vrot.slane %v9059_v11, 5  ;;  %v562_v31 = vrot.slane %v9061_v46, 4  ;;  %v8876_v58 = vshll.u32 %v7421_v43, 16  ;;  %v9062_v2 = vshrl.u32 %v7274_v52, 16 }
  0x59   : > { %9060 = vst [vmem:[#allocation67_spill] sm:$0xff] %v7431_v13  ;;  %v535_v26 = vsel %vm6942_vm4, %v530_v0, %v534_v61  ;;  %5689 = vmatmul.mubr.msk.bf16.gmra.mrb[20].mxu1 %vm674_vm1, %v7431_v13  ;;  %v540_v25 = vrot.slane %v539_v44, 4  ;;  %v558_v46 = vrot.slane %v8873_v4, 5  ;;  %v9063_v11 = vshll.u32 %v7274_v52, 16 }
  0x5a   : > { %v553_v39 = vor.u32 %v552_v53, %v549_v3  ;;  %v573_v29 = vrot.slane %v9062_v2, 4  ;;  %v8890_v50 = vshll.u32 %v7277_v47, 16  ;;  %v568_v61 = vrot.slane %v8876_v58, 5 }
  0x5b   : > { %v576_v28 = vrot.slane %v9063_v11, 5  ;;  %v9064_v3 = vshrl.u32 %v7277_v47, 16  ;;  %v8889_v2 = vshll.u32 %v7439_v27, 16  ;;  %v545_v44 = vsel %vm6942_vm4, %v540_v25, %v544_v30  ;;  %v7463_v11 = vld [vmem:[%s6830_s23 + $0xbc] sm:$0x3] }
  0x5c   : > { %v554_v0 = vrot.slane %v553_v39, 4  ;;  %v563_v33 = vor.u32 %v562_v31, %v558_v46  ;;  %v582_v4 = vrot.slane %v8890_v50, 5  ;;  %v7465_v52 = vcombine.low %v535_v26, %v545_v44  ;;  %v7492_v44 = vld [vmem:[%s8758_s1 + $0x58] sm:$0x3f]  }
  0x5d   : > { %v586_v53 = vrot.slane %v9064_v3, 4  ;;  %v577_v49 = vor.u32 %v576_v28, %v573_v29  ;;  %v592_v3 = vrot.slane %v8889_v2, 5  ;;  %v9066_v58 = vshrl.u32 %v7305_v56, 16 }
  0x5e   : > { %9065 = vst [vmem:[#allocation68_spill] sm:$0xff] %v7465_v52  ;;  %v559_v39 = vsel %vm6942_vm4, %v554_v0, %v558_v46  ;;  %v564_v42 = vrot.slane %v563_v33, 4  ;;  %v9067_v28 = vshll.u32 %v7305_v56, 16  ;;  %5692 = vmatprep.mubr.msk.bf16.mxu1 %vm674_vm1, %v7465_v52  ;;  %5975 = vmatmul.mubr.msk.bf16.vlgmr.msra.gmra.mrb[0].mxu0 %vm674_vm1, %v7098_v21  ;;  %v8888_v26 = vshll.u32 %v7308_v35, 16  ;;  %v9095_v21 = vld [vmem:[#allocation10_spill] sm:$0xff] }
  0x5f   : > { %v597_v43 = vrot.slane %v9066_v58, 4  ;;  %v578_v30 = vrot.slane %v577_v49, 4  ;;  %v587_v31 = vor.u32 %v586_v53, %v582_v4  ;;  %v9068_v25 = vshrl.u32 %v7308_v35, 16  ;;  %5978 = vmatprep.mubr.msk.bf16.mxu0 %vm674_vm1, %v7159_v36 }
  0x60   : > { %v600_v29 = vrot.slane %v9067_v28, 5  ;;  %v8881_v0 = vshll.u32 %v7463_v11, 16  ;;  %v569_v49 = vsel %vm6942_vm4, %v564_v42, %v568_v61  ;;  %v9082_v2 = vshrl.u32 %v6841_v7, 16 }
  0x61   : > { %v610_v46 = vrot.slane %v9068_v25, 4  ;;  %v583_v33 = vsel %vm6942_vm4, %v578_v30, %v582_v4  ;;  %v588_v58 = vrot.slane %v587_v31, 4  ;;  %v7494_v28 = vcombine.low %v559_v39, %v569_v49 }
  0x62   : > { %v601_v53 = vor.u32 %v600_v29, %v597_v43  ;;  %v606_v25 = vrot.slane %v8888_v26, 5  ;;  %v3517_v43 = vsel %vm723_vm0, %v7193_v14, 0  ;;  %v1227_v4 = vrot.slane %v6855_v10, 5 }
  0x63   : > { %9069 = vst [vmem:[#allocation69_spill] sm:$0xff] %v7494_v28  ;;  %v593_v42 = vsel %vm6942_vm4, %v588_v58, %v592_v3  ;;  %5693 = vmatmul.mubr.msk.bf16.gmra.mrb[24].mxu1 %vm674_vm1, %v7494_v28  ;;  %v616_v39 = vrot.slane %v8881_v0, 5  ;;  %6007 = vmatpush3.bf16.msra.mxu0 %v3517_v43  ;;  %v5063_v3 = vrot.slane %v6838_v6, 9  ;;  %v1220_v29 = vrot.slane %v6841_v7, 5 }
  0x64   : > { %v602_v61 = vrot.slane %v601_v53, 4  ;;  %v7505_v30 = vcombine.low %v583_v33, %v593_v42  ;;  %v611_v31 = vor.u32 %v610_v46, %v606_v25  ;;  %6701 = vmatprep.subr.msk.bf16.mxu0 %vm723_vm0, %v7492_v44  ;;  %v5064_v46 = vrot.slane %v6852_v9, 9 }
  0x65   : > { %v1229_v49 = vrot.slane %v1227_v4, 4  ;;  %v1230_v33 = vrot.slane %v7020_v59, 5  ;;  %v9072_v9 = vmov 0  ;;  %v1222_v59 = vrot.slane %v1220_v29, 4 }
  0x66   : > { %9070 = vst [vmem:[#allocation70_spill] sm:$0xff] %v7505_v30  ;;  %5696 = vmatprep.mubr.msk.bf16.mxu1 %vm674_vm1, %v7505_v30  ;;  %v607_v14 = vsel %vm6942_vm4, %v602_v61, %v606_v25  ;;  %v612_v10 = vrot.slane %v611_v31, 4  ;;  %5979 = vmatmul.mubr.msk.bf16.gmra.mrb[4].mxu0 %vm674_vm1, %v7205_v62  ;;  %v5028_v25 = vcombine.low %v6872_v16, %v6875_v17  ;;  %v9073_v9 = vsel %vm7529_vm7, 4294967295, %v9072_v9 }
  0x67   : > { %5982 = vmatprep.mubr.msk.bf16.mxu0 %vm674_vm1, %v7242_v48  ;;  %9074 = vst [vmem:[#allocation72_spill] sm:$0xff] %v9073_v9  ;;  %v1223_v42 = vrot.slane %v6990_v60, 5  ;;  %v1221_v61 = vsel %vm7529_vm7, %v5063_v3, %v1220_v29  ;;  %v1228_v43 = vsel %vm7529_vm7, %v5064_v46, %v1227_v4  ;;  %v1231_v31 = vsel %vm7529_vm7, %v1229_v49, %v1230_v33  ;;  %v7566_v49 = vld [vmem:[%s8758_s1 + $0x18] sm:$0x3f]  }
  0x68   : > { %v617_v58 = vsel %vm6942_vm4, %v612_v10, %v616_v39  ;;  %v8884_v0 = vshll.u32 %v7338_v38, 16  ;;  %v8883_v3 = vshrl.u32 %v7351_v24, 16  ;;  %v7554_v4 = vcombine.low %v6921_v37, %v6929_v41 }
  0x69   : > { %v7523_v53 = vcombine.low %v607_v14, %v617_v58  ;;  %v1224_v39 = vsel %vm7529_vm7, %v1222_v59, %v1223_v42  ;;  %v7545_v14 = vcombine.low %v1228_v43, %v1231_v31  ;;  %v8885_v58 = vshrl.u32 %v7338_v38, 16  ;;  %v7583_v42 = vld [vmem:[%s6830_s23 + $0xc8] sm:$0x3] }
  0x6a   : > { %v7547_v10 = vcombine.low %v1221_v61, %v1224_v39  ;;  %9077 = vst [vmem:[#allocation75_spill] sm:$0xff] %v7554_v4  ;;  %v8882_v29 = vshll.u32 %v7351_v24, 16  ;;  %v1421_v46 = vsel %vm723_vm0, %v7169_v63, 0  ;;  %v2377_v41 = vrot.slane %v8884_v0, 5  ;;  %9078 = vst [vmem:[#allocation76_spill] sm:$0xff] %v7583_v42 }
  0x6b   : > { %9071 = vst [vmem:[#allocation71_spill] sm:$0xff] %v7523_v53  ;;  %5697 = vmatmul.mubr.msk.bf16.gmra.mrb[28].mxu1 %vm674_vm1, %v7523_v53  ;;  %9075 = vst [vmem:[#allocation73_spill] sm:$0xff] %v7545_v14  ;;  %v2374_v37 = vrot.slane %v8885_v58, 4  ;;  %v8886_v33 = vshrl.u32 %v7377_v32, 16  ;;  %v2387_v59 = vrot.slane %v8883_v3, 4  ;;  %v8896_v61 = vshrl.u32 %v7386_v1, 16 }
  0x6c   : > { %5702 = vmatprep.mubr.msk.bf16.mxu1 %vm674_vm1, %v5028_v25  ;;  %9076 = vst [vmem:[#allocation74_spill] sm:$0xff] %v7547_v10  ;;  %v8887_v25 = vshll.u32 %v7377_v32, 16  ;;  %v2383_v63 = vrot.slane %v8882_v29, 5  ;;  %v8893_v43 = vshll.u32 %v7386_v1, 16  ;;  %v7599_v0 = vld [vmem:[%s6830_s23 + $0xd4] sm:$0x3] }
  0x6d   : > { %v2378_v31 = vor.u32 %v2377_v41, %v2374_v37  ;;  %9079 = vst [vmem:[#allocation77_spill] sm:$0xff] %v7599_v0  ;;  %v9080_v58 = vshrl.u32 %v6838_v6, 16  ;;  %v1628_v41 = vshrl.u32 %v6886_v20, 16  ;;  %v7618_v50 = vrot.slane %v9082_v2, 5 }
  0x6e   : > { %5983 = vmatmul.mubr.msk.bf16.gmra.mrb[8].mxu0 %vm674_vm1, %v7285_v34  ;;  %v2388_v39 = vor.u32 %v2387_v59, %v2383_v63  ;;  %v3266_v3 = vrot.slane %v8887_v25, 5  ;;  %v7608_v59 = vrot.slane %v8893_v43, 5  ;;  %v9081_v25 = vshll.u32 %v6838_v6, 16 }
  0x6f   : > { %5986 = vmatprep.mubr.msk.bf16.mxu0 %vm674_vm1, %v7323_v12  ;;  %v7603_v37 = vrot.slane %v9080_v58, 5  ;;  %v9083_v58 = vshll.u32 %v6841_v7, 16  ;;  %v8905_v6 = vshll.u32 %v7599_v0, 16  ;;  %v9086_v7 = vshrl.u32 %v6872_v16, 16 }
  0x70   : > { %v7614_v26 = vrot.slane %v9081_v25, 6  ;;  %v2389_v43 = vrot.slane %v2388_v39, 4  ;;  %v9085_v25 = vor.u32 %v6883_v19, %v6879_v18  ;;  %v9088_v39 = vshrl.u32 %v6875_v17, 16 }
  0x71   : > { %v7622_v29 = vrot.slane %v9083_v58, 6  ;;  %v7636_v58 = vrot.slane %v9086_v7, 5  ;;  %v7652_v19 = vrot.slane %v1628_v41, 5  ;;  %v1293_v41 = vrot.slane %v7374_v55, 5 }
  0x72   : > { %v7632_v2 = vrot.slane %v9085_v25, 4  ;;  %v7644_v48 = vrot.slane %v9088_v39, 5  ;;  %v1290_v39 = vrot.slane %v7203_v54, 5  ;;  %v1304_v62 = vrot.slane %v7277_v47, 5 }
  0x73   : > { %5703 = vmatmul.mubr.msk.bf16.vlgmr.msra.gmra.mrb[0].mxu1 %vm674_vm1, %v7554_v4 }
  0x74   : > { %5735 = vmatpush3.bf16.msra.mxu1 %v1421_v46  ;;  %5706 = vmatprep.mubr.msk.bf16.mxu1 %vm674_vm1, %v6849_v8  ;;  %v3263_v46 = vrot.slane %v8886_v33, 4  ;;  %v3276_v33 = vrot.slane %v8896_v61, 4  ;;  %v1306_v4 = vrot.slane %v1304_v62, 4 }
  0x75   : > { %6693 = vmatprep.subr.msk.bf16.mxu1 %vm723_vm0, %v7566_v49 }
  0x76   : > { %5987 = vmatmul.mubr.msk.bf16.gmra.mrb[12].mxu0 %vm674_vm1, %v7357_v23  ;;  %v9084_v23 = vshll.u32 %v7583_v42, 16  ;;  %v3267_v12 = vor.u32 %v3266_v3, %v3263_v46  ;;  %v9090_v3 = vshll.u32 %v6886_v20, 16 }
  0x77   : > { %5990 = vmatprep.mubr.msk.bf16.mxu0 %vm674_vm1, %v7397_v40  ;;  %v2379_v40 = vrot.slane %v2378_v31, 4  ;;  %v9087_v31 = vshll.u32 %v6872_v16, 16  ;;  %v3277_v16 = vor.u32 %v3276_v33, %v7608_v59  ;;  %v7672_v33 = vrot.slane %v8905_v6, 5 }
  0x78   : > { %v2393_v61 = vrot.slane %v9084_v23, 5  ;;  %v9089_v23 = vshll.u32 %v6875_v17, 16  ;;  %v7656_v46 = vrot.slane %v9090_v3, 6  ;;  %v7668_v20 = vrot.slane %v3267_v12, 4  ;;  %v9091_v3 = vld [vmem:[#allocation48_spill] sm:$0xff]  ;;  %v9092_v12 = vld [vmem:[#allocation66_spill] sm:$0xff] }
  0x79   : > { %v7640_v34 = vrot.slane %v9087_v31, 6  ;;  %v2384_v7 = vsel %vm6942_vm4, %v2379_v40, %v2383_v63  ;;  %v5073_v31 = vrot.slane %v7200_v57, 9  ;;  %v1292_v63 = vrot.slane %v1290_v39, 4 }
  0x7a   : > { %v7650_v18 = vrot.slane %v9089_v23, 6  ;;  %v2394_v17 = vsel %vm6942_vm4, %v2389_v43, %v2393_v61  ;;  %v5074_v23 = vrot.slane %v7230_v51, 9  ;;  %v1297_v25 = vrot.slane %v9091_v3, 5 }
  0x7b   : > { %5707 = vmatmul.mubr.msk.bf16.gmra.mrb[4].mxu1 %vm674_vm1, %v6869_v15  ;;  %v1291_v40 = vsel %vm7529_vm7, %v5073_v31, %v1290_v39  ;;  %v7681_v61 = vrot.slane %v3277_v16, 4  ;;  %v1300_v43 = vrot.slane %v9092_v12, 5  ;;  %v7686_v36 = vcombine.low %v2384_v7, %v2394_v17  ;;  %v9096_v7 = vld [vmem:[#allocation21_spill] sm:$0xff] }
  0x7c   : > { %5710 = vmatprep.mubr.msk.bf16.mxu1 %vm674_vm1, %v6893_v22  ;;  %v1298_v31 = vsel %vm7529_vm7, %v5074_v23, %v1297_v25  ;;  %v1299_v39 = vrot.slane %v1297_v25, 4  ;;  %v1307_v22 = vrot.slane %v7439_v27, 5  ;;  %v1311_v25 = vrot.slane %v7308_v35, 5 }
  0x7d   : > { %9094 = vst [vmem:[#allocation48_spill] sm:$0xff] %v7686_v36 }
  0x7e   : > { %5991 = vmatmul.mubr.msk.bf16.gmra.mrb[16].mxu0 %vm674_vm1, %v7431_v13  ;;  %v9093_v13 = vld [vmem:[#allocation51_spill] sm:$0xff]  ;;  %v1301_v17 = vsel %vm7529_vm7, %v1299_v39, %v1300_v43  ;;  %v1313_v39 = vrot.slane %v1311_v25, 4 }
  0x7f   : > { %5994 = vmatprep.mubr.msk.bf16.mxu0 %vm674_vm1, %v7465_v52  ;;  %v5075_v6 = vrot.slane %v9093_v13, 9  ;;  %v1294_v52 = vsel %vm7529_vm7, %v1292_v63, %v1293_v41  ;;  %v5076_v41 = vrot.slane %v7305_v56, 9  ;;  %v1314_v63 = vrot.slane %v7463_v11, 5 }
  0x80   : > { %v7694_v16 = vcombine.low %v1291_v40, %v1294_v52  ;;  %v7706_v52 = vcombine.low %v1298_v31, %v1301_v17  ;;  %v2608_v40 = vrot.slane %v7351_v24, 5  ;;  %v9138_v24 = vld [vmem:[#allocation53_spill] sm:$0xff] }
  0x81   : > { %v1305_v8 = vsel %vm7529_vm7, %v5075_v6, %v1304_v62  ;;  %v1308_v6 = vsel %vm7529_vm7, %v1306_v4, %v1307_v22  ;;  %v5187_v62 = vrot.slane %v7338_v38, 9  ;;  %v1312_v43 = vsel %vm7529_vm7, %v5076_v41, %v1311_v25 }
  0x82   : > { %v7712_v23 = vcombine.low %v1305_v8, %v1308_v6  ;;  %v2610_v17 = vrot.slane %v2608_v40, 4  ;;  %v5268_v22 = vrot.slane %v7377_v32, 9  ;;  %v3497_v4 = vrot.slane %v7386_v1, 5  ;;  %v9137_v32 = vld [vmem:[#allocation35_spill] sm:$0xff] }
  0x83   : > { %5711 = vmatmul.mubr.msk.bf16.gmra.mrb[8].mxu1 %vm674_vm1, %v9095_v21  ;;  %v2609_v31 = vsel %vm7529_vm7, %v5187_v62, %v2608_v40  ;;  %v1315_v8 = vsel %vm7529_vm7, %v1313_v39, %v1314_v63  ;;  %v3500_v41 = vrot.slane %v7599_v0, 5  ;;  %v1651_v63 = vor.u32 %v7614_v26, %v7603_v37  ;;  %v9102_v26 = vld [vmem:[#allocation25_spill] sm:$0xff]  ;;  %v9103_v37 = vld [vmem:[#allocation27_spill] sm:$0xff]  ;;  %v9132_v0 = vld [vmem:[#allocation36_spill] sm:$0xff] }
  0x84   : > { %5714 = vmatprep.mubr.msk.bf16.mxu1 %vm674_vm1, %v9096_v7  ;;  %v2611_v7 = vrot.slane %v7583_v42, 5  ;;  %v7728_v25 = vcombine.low %v1312_v43, %v1315_v8  ;;  %v3498_v62 = vsel %vm7529_vm7, %v5268_v22, %v3497_v4  ;;  %v3499_v40 = vrot.slane %v3497_v4, 4  ;;  %v9100_v8 = vld [vmem:[#allocation22_spill] sm:$0xff] }
  0x85   : > { %v1655_v43 = vor.u32 %v7622_v29, %v7618_v50  ;;  %v1658_v39 = vshrl.u32 %v6990_v60, 16  ;;  %v9104_v4 = vor.u32 %v9102_v26, %v9103_v37  ;;  %v9105_v50 = vrot.slane %v7058_v5, 4  ;;  %v9108_v37 = vld [vmem:[#allocation12_spill] sm:$0xff] }
  0x86   : > { %5995 = vmatmul.mubr.msk.bf16.gmra.mrb[20].mxu0 %vm674_vm1, %v7494_v28  ;;  %v2612_v6 = vsel %vm7529_vm7, %v2610_v17, %v2611_v7  ;;  %v3501_v7 = vsel %vm7529_vm7, %v3499_v40, %v3500_v41  ;;  %v9101_v17 = vshll.u32 %v6990_v60, 16  ;;  %v1652_v60 = vrot.slane %v1651_v63, 4 }
  0x87   : > { %5998 = vmatprep.mubr.msk.bf16.mxu0 %vm674_vm1, %v7505_v30  ;;  %v7738_v30 = vcombine.low %v2609_v31, %v2612_v6  ;;  %v1671_v31 = vsel %vm7734_vm10, %v7632_v2, %v7058_v5  ;;  %v1678_v29 = vsel %vm7734_vm10, %v9105_v50, %v9104_v4  ;;  %v9106_v6 = vld [vmem:[#allocation28_spill] sm:$0xff]  ;;  %v7764_v41 = vcombine.low %v3498_v62, %v3501_v7  ;;  %v9109_v5 = vld [vmem:[#allocation11_spill] sm:$0xff] }
  0x88   : > { %v1661_v22 = vrot.slane %v9101_v17, 6  ;;  %v1657_v40 = vrot.slane %v1655_v43, 4  ;;  %v1660_v17 = vrot.slane %v1658_v39, 5  ;;  %v1656_v2 = vsel %vm7734_vm10, %v1652_v60, %v1655_v43  ;;  %v6751_v50 = vld [vmem:[%s6830_s23 + $0x30] sm:$0xf] }
  0x89   : > { %9099 = vst [vmem:[#allocation66_spill] sm:$0xff] %v7738_v30  ;;  %9107 = vst [vmem:[#allocation51_spill] sm:$0xff] %v7764_v41  ;;  %v9110_v21 = vor.u32 %v9108_v37, %v9109_v5  ;;  %v1621_v62 = vor.u32 %v7640_v34, %v7636_v58  ;;  %v1625_v63 = vor.u32 %v7650_v18, %v7644_v48  ;;  %v6750_v58 = vld [vmem:[%s6830_s23 + $0x34] sm:$0xf]  ;;  %v1276_v1 = vrot.slane %v9132_v0, 5 }
  0x8a   : > { %v1662_v26 = vor.u32 %v1661_v22, %v1660_v17  ;;  %v3273_v43 = vsel %vm6942_vm4, %v7668_v20, %v7608_v59  ;;  %v1632_v48 = vor.u32 %v7656_v46, %v7652_v19  ;;  %v1234_v18 = vrot.slane %v6750_v58, 5  ;;  %v9112_v20 = vld [vmem:[#allocation34_spill] sm:$0xff]  ;;  %v9117_v37 = vld [vmem:[#allocation16_spill] sm:$0xff] }
  0x8b   : > { %5715 = vmatmul.mubr.msk.bf16.gmra.mrb[12].mxu1 %vm674_vm1, %v9100_v8  ;;  %v7766_v8 = vcombine.low %v1671_v31, %v1678_v29  ;;  %v1637_v15 = vrot.slane %v9110_v21, 4  ;;  %v3283_v21 = vsel %vm6942_vm4, %v7681_v61, %v7672_v33  ;;  %v1622_v7 = vrot.slane %v1621_v62, 4  ;;  %v9111_v31 = vld [vmem:[#allocation15_spill] sm:$0xff]  ;;  %v9114_v46 = vld [vmem:[#allocation38_spill] sm:$0xff] }
  0x8c   : > { %5718 = vmatprep.mubr.msk.bf16.mxu1 %vm674_vm1, %v9106_v6  ;;  %v1663_v34 = vsel %vm7734_vm10, %v1657_v40, %v1662_v26  ;;  %v1627_v22 = vrot.slane %v1625_v63, 4  ;;  %v1642_v59 = vrot.slane %v9111_v31, 4  ;;  %v7799_v4 = vcombine.low %v3273_v43, %v3283_v21  ;;  %v9115_v40 = vld [vmem:[#allocation29_spill] sm:$0xff]  ;;  %v6752_v43 = vld [vmem:[%s6830_s23 + $0x40] sm:$0xf] }
  0x8d   : > { %v7794_v39 = vcombine.low %v1656_v2, %v1663_v34  ;;  %v1626_v33 = vsel %vm7734_vm10, %v1622_v7, %v1625_v63  ;;  %v5065_v29 = vrot.slane %v6751_v50, 9  ;;  %v1236_v60 = vrot.slane %v1234_v18, 4  ;;  %v9116_v26 = vld [vmem:[#allocation13_spill] sm:$0xff]  ;;  %v9119_v7 = vld [vmem:[#allocation43_spill] sm:$0xff] }
  0x8e   : > { %5999 = vmatmul.mubr.msk.bf16.gmra.mrb[24].mxu0 %vm674_vm1, %v7523_v53  ;;  %9113 = vst [vmem:[#allocation25_spill] sm:$0xff] %v7799_v4  ;;  %v1633_v19 = vsel %vm7734_vm10, %v1627_v22, %v1632_v48  ;;  %v1237_v17 = vrot.slane %v9115_v40, 5  ;;  %v1641_v2 = vsel %vm7734_vm10, %v1637_v15, %v9111_v31  ;;  %v9118_v5 = vor.u32 %v9116_v26, %v9117_v37  ;;  %v6753_v48 = vld [vmem:[%s6830_s23 + $0x4c] sm:$0xf]  ;;  %v6754_v22 = vld [vmem:[%s6830_s23 + $0x4] sm:$0xf] }
  0x8f   : > { %6002 = vmatprep.mubr.msk.bf16.mxu0 %vm674_vm1, %v7686_v36  ;;  %v7807_v61 = vcombine.low %v1626_v33, %v1633_v19  ;;  %v1241_v21 = vrot.slane %v6752_v43, 5  ;;  %v1235_v15 = vsel %vm7529_vm7, %v5065_v29, %v1234_v18  ;;  %v1248_v58 = vrot.slane %v6753_v48, 5  ;;  %v6755_v19 = vld [vmem:[%s6830_s23 + $0x3c] sm:$0xf]  ;;  %v7847_v43 = vld [vmem:[%s8758_s1 + $0x60] sm:$0x3f]  }
  0x90   : > { %v1648_v62 = vsel %vm7734_vm10, %v1642_v59, %v9118_v5  ;;  %v1238_v34 = vsel %vm7529_vm7, %v1236_v60, %v1237_v17  ;;  %v1206_v31 = vrot.slane %v6754_v22, 5  ;;  %v9120_v59 = vld [vmem:[#allocation46_spill] sm:$0xff]  ;;  %v5066_v50 = vrot.slane %v6755_v19, 9  ;;  %v9122_v29 = vld [vmem:[#allocation33_spill] sm:$0xff]  ;;  %v6756_v17 = vld [vmem:[%s6830_s23 + $0x48] sm:$0xf] }
  0x91   : > { %v7821_v63 = vcombine.low %v1641_v2, %v1648_v62  ;;  %v7836_v33 = vcombine.low %v1235_v15, %v1238_v34  ;;  %v1243_v18 = vrot.slane %v1241_v21, 4  ;;  %v1244_v2 = vrot.slane %v9122_v29, 5  ;;  %v9123_v5 = vld [vmem:[#allocation37_spill] sm:$0xff]  ;;  %v6757_v15 = vld [vmem:[%s6830_s23] sm:$0xf]  ;;  %v9124_v53 = vld [vmem:[#allocation24_spill] sm:$0xff] }
  0x92   : > { %v3742_v60 = vsel %vm723_vm0, %v7492_v44, 0  ;;  %v5067_v26 = vrot.slane %v6756_v17, 9  ;;  %v1250_v37 = vrot.slane %v1248_v58, 4  ;;  %v1251_v62 = vrot.slane %v9123_v5, 5  ;;  %v6758_v44 = vld [vmem:[%s6830_s23 + $0x8] sm:$0x3] }
  0x93   : > { %5719 = vmatmul.mubr.msk.bf16.gmra.mrb[16].mxu1 %vm674_vm1, %v9112_v20  ;;  %9121 = vst [vmem:[#allocation27_spill] sm:$0xff] %v7836_v33  ;;  %v5061_v34 = vrot.slane %v6757_v15, 9  ;;  %v1209_v48 = vrot.slane %v6758_v44, 5  ;;  %v1242_v22 = vsel %vm7529_vm7, %v5066_v50, %v1241_v21  ;;  %v1245_v19 = vsel %vm7529_vm7, %v1243_v18, %v1244_v2  ;;  %v6759_v17 = vld [vmem:[%s6830_s23 + $0x58] sm:$0xf]  ;;  %v9125_v21 = vld [vmem:[#allocation50_spill] sm:$0xff] }
  0x94   : > { %5722 = vmatprep.mubr.msk.bf16.mxu1 %vm674_vm1, %v9114_v46  ;;  %v1255_v45 = vrot.slane %v6759_v17, 5  ;;  %v1249_v15 = vsel %vm7529_vm7, %v5067_v26, %v1248_v58  ;;  %v1252_v36 = vsel %vm7529_vm7, %v1250_v37, %v1251_v62  ;;  %v1262_v44 = vrot.slane %v9124_v53, 5  ;;  %v6760_v2 = vld [vmem:[%s6830_s23 + $0x10] sm:$0xf]  ;;  %v6761_v37 = vld [vmem:[%s6830_s23 + $0x54] sm:$0xf] }
  0x95   : > { %v1207_v50 = vsel %vm7529_vm7, %v5061_v34, %v1206_v31  ;;  %v7871_v18 = vcombine.low %v1242_v22, %v1245_v19  ;;  %v1213_v58 = vrot.slane %v6760_v2, 5  ;;  %v7876_v26 = vcombine.low %v1249_v15, %v1252_v36  ;;  %v6762_v46 = vld [vmem:[%s6830_s23 + $0x60] sm:$0xf]  ;;  %v9130_v22 = vld [vmem:[#allocation45_spill] sm:$0xff]  ;;  %v6763_v20 = vld [vmem:[%s6830_s23 + $0x14] sm:$0x3] }
  0x96   : > { %6003 = vmatmul.mubr.msk.bf16.gmra.mrb[28].mxu0 %vm674_vm1, %v7799_v4  ;;  %v1208_v4 = vrot.slane %v1206_v31, 4  ;;  %v5068_v62 = vrot.slane %v6761_v37, 9  ;;  %v1257_v17 = vrot.slane %v1255_v45, 4  ;;  %v5069_v31 = vrot.slane %v6762_v46, 9  ;;  %v6764_v36 = vld [vmem:[%s6830_s23 + $0xc] sm:$0xf] }
  0x97   : > { %6008 = vmatprep.mubr.msk.bf16.mxu0 %vm674_vm1, %v7547_v10  ;;  %9126 = vst [vmem:[#allocation12_spill] sm:$0xff] %v7871_v18  ;;  %9128 = vst [vmem:[#allocation11_spill] sm:$0xff] %v7876_v26  ;;  %v1264_v34 = vrot.slane %v1262_v44, 4  ;;  %v1265_v19 = vrot.slane %v9130_v22, 5  ;;  %v1216_v2 = vrot.slane %v6763_v20, 5  ;;  %v5062_v15 = vrot.slane %v6764_v36, 9 }
  0x98   : > { %v1215_v37 = vrot.slane %v1213_v58, 4  ;;  %v1263_v20 = vsel %vm7529_vm7, %v5069_v31, %v1262_v44  ;;  %v6765_v44 = vld [vmem:[%s6830_s23 + $0x6c] sm:$0xf]  ;;  %v5071_v42 = vrot.slane %v9137_v32, 9  ;;  %v1279_v38 = vrot.slane %v9138_v24, 5 }
  0x99   : > { %v1266_v36 = vsel %vm7529_vm7, %v1264_v34, %v1265_v19  ;;  %v9136_v34 = vld [vmem:[#allocation49_spill] sm:$0xff] }
  0x9a   : > { %v1272_v19 = vrot.slane %v9136_v34, 5 }
  0x9b   : > { %5723 = vmatmul.mubr.msk.bf16.gmra.mrb[20].mxu1 %vm674_vm1, %v9119_v7 }
  0x9c   : > { %5726 = vmatprep.mubr.msk.bf16.mxu1 %vm674_vm1, %v9120_v59  ;;  %v9129_v59 = vld [vmem:[#allocation42_spill] sm:$0xff] }
  0x9d   : > { %v1258_v7 = vrot.slane %v9129_v59, 5 }
  0x9e   : > { %6009 = vmatmul.mubr.msk.bf16.vlgmr.msra.gmra.mrb[0].mxu0 %vm674_vm1, %v7545_v14 }
  0x9f   : > { %6012 = vmatprep.mubr.msk.bf16.mxu0 %vm674_vm1, %v7836_v33  ;;  %6041 = vmatpush3.bf16.msra.mxu0 %v3742_v60  ;;  %v9127_v60 = vld [vmem:[#allocation54_spill] sm:$0xff]  ;;  %v1259_v46 = vsel %vm7529_vm7, %v1257_v17, %v1258_v7  ;;  %v5070_v17 = vrot.slane %v6765_v44, 9 }
  0xa0   : > { %6702 = vmatprep.subr.msk.bf16.mxu0 %vm723_vm0, %v7847_v43 }
  0xa3   : > { %5727 = vmatmul.mubr.msk.bf16.gmra.mrb[24].mxu1 %vm674_vm1, %v9125_v21  ;;  %v1210_v21 = vsel %vm7529_vm7, %v1208_v4, %v1209_v48  ;;  %v1256_v4 = vsel %vm7529_vm7, %v5068_v62, %v1255_v45  ;;  %v9131_v48 = vld [vmem:[#allocation31_spill] sm:$0xff]  ;;  %v1217_v45 = vsel %vm7529_vm7, %v1215_v37, %v1216_v2  ;;  %v7909_v62 = vcombine.low %v1263_v20, %v1266_v36  ;;  %v7935_v36 = vld [vmem:[%s8758_s1 + $0x20] sm:$0x3f]  }
  0xa4   : > { %5730 = vmatprep.mubr.msk.bf16.mxu1 %vm674_vm1, %v9127_v60  ;;  %v5079_v60 = vcombine.low %v1207_v50, %v1210_v21  ;;  %v1269_v6 = vrot.slane %v9131_v48, 5  ;;  %v9133_v21 = vld [vmem:[#allocation58_spill] sm:$0xff]  ;;  %v1214_v50 = vsel %vm7529_vm7, %v5062_v15, %v1213_v58  ;;  %v7906_v7 = vcombine.low %v1256_v4, %v1259_v46  ;;  %v9140_v15 = vld [vmem:[#allocation40_spill] sm:$0xff] }
  0xa5   : > { %9135 = vst [vmem:[#allocation29_spill] sm:$0xff] %v7909_v62  ;;  %v7915_v58 = vcombine.low %v1214_v50, %v1217_v45  ;;  %v1283_v37 = vrot.slane %v9140_v15, 5  ;;  %v1964_v4 = vsel %vm723_vm0, %v7566_v49, 0  ;;  %v1277_v46 = vsel %vm7529_vm7, %v5071_v42, %v1276_v1 }
  0xa6   : > { %6013 = vmatmul.mubr.msk.bf16.gmra.mrb[4].mxu0 %vm674_vm1, %v7871_v18  ;;  %9134 = vst [vmem:[#allocation15_spill] sm:$0xff] %v7906_v7  ;;  %v1271_v31 = vrot.slane %v1269_v6, 4 }
  0xa7   : > { %6016 = vmatprep.mubr.msk.bf16.mxu0 %vm674_vm1, %v7876_v26  ;;  %9139 = vst [vmem:[#allocation13_spill] sm:$0xff] %v7915_v58  ;;  %v1285_v50 = vrot.slane %v1283_v37, 4 }
  0xa8   : > { %v1273_v2 = vsel %vm7529_vm7, %v1271_v31, %v1272_v19  ;;  %v9145_v31 = vld [vmem:[#allocation3_spill] sm:$0xff] }
  0xa9   : > { %v9146_v19 = vshrl.u32 %v9145_v31, 16 }
  0xab   : > { %5731 = vmatmul.mubr.msk.bf16.gmra.mrb[28].mxu1 %vm674_vm1, %v9133_v21  ;;  %v1278_v21 = vrot.slane %v1276_v1, 4  ;;  %v9143_v1 = vld [vmem:[#allocation39_spill] sm:$0xff] }
  0xac   : > { %5736 = vmatprep.mubr.msk.bf16.mxu1 %vm674_vm1, %v5079_v60  ;;  %v1270_v60 = vsel %vm7529_vm7, %v5070_v17, %v1269_v6  ;;  %v5072_v42 = vrot.slane %v9143_v1, 9 }
  0xad   : > { %v1280_v20 = vsel %vm7529_vm7, %v1278_v21, %v1279_v38  ;;  %v7939_v6 = vcombine.low %v1270_v60, %v1273_v2  ;;  %v9144_v38 = vld [vmem:[#allocation56_spill] sm:$0xff]  ;;  %v1679_v60 = vrot.slane %v9146_v19, 5  ;;  %v9147_v2 = vshll.u32 %v9145_v31, 16 }
  0xae   : > { %6017 = vmatmul.mubr.msk.bf16.gmra.mrb[8].mxu0 %vm674_vm1, %v7906_v7  ;;  %v7943_v49 = vcombine.low %v1277_v46, %v1280_v20  ;;  %v1286_v21 = vrot.slane %v9144_v38, 5  ;;  %v1284_v45 = vsel %vm7529_vm7, %v5072_v42, %v1283_v37  ;;  %v9151_v31 = vshll.u32 %v9115_v40, 16 }
  0xaf   : > { %6020 = vmatprep.mubr.msk.bf16.mxu0 %vm674_vm1, %v7909_v62  ;;  %9141 = vst [vmem:[#allocation16_spill] sm:$0xff] %v7939_v6  ;;  %v1680_v37 = vrot.slane %v9147_v2, 6 }
  0xb0   : > { %9142 = vst [vmem:[#allocation33_spill] sm:$0xff] %v7943_v49  ;;  %v1287_v44 = vsel %vm7529_vm7, %v1285_v50, %v1286_v21  ;;  %v6766_v21 = vld [vmem:[%s6830_s23 + $0x38] sm:$0x3]  ;;  %v1691_v2 = vrot.slane %v9151_v31, 6 }
  0xb1   : > { %v7959_v17 = vcombine.low %v1284_v45, %v1287_v44  ;;  %v1688_v45 = vshrl.u32 %v6766_v21, 16  ;;  %v1681_v44 = vor.u32 %v1680_v37, %v1679_v60 }
  0xb3   : > { %5737 = vmatmul.mubr.msk.bf16.vlgmr.msra.gmra.mrb[0].mxu1 %vm674_vm1, %v7915_v58  ;;  %v1690_v9 = vrot.slane %v1688_v45, 5  ;;  %v1682_v40 = vrot.slane %v1681_v44, 4 }
  0xb4   : > { %5769 = vmatpush3.bf16.msra.mxu1 %v1964_v4  ;;  %5740 = vmatprep.mubr.msk.bf16.mxu1 %vm674_vm1, %v7547_v10  ;;  %v9148_v4 = vld [vmem:[#allocation4_spill] sm:$0xff]  ;;  %v9152_v10 = vld [vmem:[#allocation7_spill] sm:$0xff] }
  0xb5   : > { %6694 = vmatprep.subr.msk.bf16.mxu1 %vm723_vm0, %v7935_v36  ;;  %v9149_v46 = vshrl.u32 %v9148_v4, 16  ;;  %v9150_v42 = vshll.u32 %v9148_v4, 16  ;;  %v9153_v58 = vshrl.u32 %v9152_v10, 16  ;;  %v9154_v4 = vshll.u32 %v9152_v10, 16 }
  0xb6   : > { %6021 = vmatmul.mubr.msk.bf16.gmra.mrb[12].mxu0 %vm674_vm1, %v7939_v6  ;;  %v1692_v60 = vor.u32 %v1691_v2, %v1690_v9 }
  0xb7   : > { %6024 = vmatprep.mubr.msk.bf16.mxu0 %vm674_vm1, %v7943_v49  ;;  %v1683_v20 = vrot.slane %v9149_v46, 5  ;;  %v1684_v50 = vrot.slane %v9150_v42, 6  ;;  %v1694_v46 = vrot.slane %v9153_v58, 5  ;;  %v1695_v42 = vrot.slane %v9154_v4, 6 }
  0xb9   : > { %v1685_v19 = vor.u32 %v1684_v50, %v1683_v20  ;;  %v1696_v10 = vor.u32 %v1695_v42, %v1694_v46  ;;  %v9158_v50 = vshll.u32 %v9122_v29, 16 }
  0xbb   : > { %5741 = vmatmul.mubr.msk.bf16.gmra.mrb[4].mxu1 %vm674_vm1, %v7545_v14  ;;  %v6767_v14 = vld [vmem:[%s6830_s23 + $0x44] sm:$0x3]  ;;  %v1687_v58 = vrot.slane %v1685_v19, 4  ;;  %v1706_v45 = vrot.slane %v9158_v50, 6  ;;  %v1697_v46 = vrot.slane %v1696_v10, 4 }
  0xbc   : > { %5744 = vmatprep.mubr.msk.bf16.mxu1 %vm674_vm1, %v7836_v33 }
  0xbe   : > { %6025 = vmatmul.mubr.msk.bf16.gmra.mrb[16].mxu0 %vm674_vm1, %v7959_v17 }
  0xbf   : > { %6028 = vmatprep.mubr.msk.bf16.mxu0 %vm674_vm1, %v7694_v16 }
  0xc3   : > { %5745 = vmatmul.mubr.msk.bf16.gmra.mrb[8].mxu1 %vm674_vm1, %v7871_v18 }
  0xc4   : > { %5748 = vmatprep.mubr.msk.bf16.mxu1 %vm674_vm1, %v7876_v26  ;;  %v9155_v26 = vld [vmem:[#allocation8_spill] sm:$0xff] }
  0xc5   : > { %v9156_v21 = vshrl.u32 %v9155_v26, 16 }
  0xc6   : > { %6029 = vmatmul.mubr.msk.bf16.gmra.mrb[20].mxu0 %vm674_vm1, %v7706_v52 }
  0xc7   : > { %6032 = vmatprep.mubr.msk.bf16.mxu0 %vm674_vm1, %v7712_v23  ;;  %v1698_v18 = vrot.slane %v9156_v21, 5  ;;  %v9162_v21 = vld [vmem:[#allocation17_spill] sm:$0xff] }
  0xc8   : > { %v9164_v9 = vshll.u32 %v9162_v21, 16 }
  0xca   : > { %v1714_v2 = vrot.slane %v9164_v9, 6 }
  0xcb   : > { %5749 = vmatmul.mubr.msk.bf16.gmra.mrb[12].mxu1 %vm674_vm1, %v7906_v7  ;;  %v9157_v7 = vshll.u32 %v9155_v26, 16 }
  0xcc   : > { %5752 = vmatprep.mubr.msk.bf16.mxu1 %vm674_vm1, %v7909_v62  ;;  %v1703_v62 = vshrl.u32 %v6767_v14, 16  ;;  %v9159_v14 = vld [vmem:[#allocation14_spill] sm:$0xff] }
  0xcd   : > { %v1699_v33 = vrot.slane %v9157_v7, 6  ;;  %v9160_v26 = vshrl.u32 %v9159_v14, 16  ;;  %v9161_v31 = vshll.u32 %v9159_v14, 16 }
  0xce   : > { %6033 = vmatmul.mubr.msk.bf16.gmra.mrb[24].mxu0 %vm674_vm1, %v7728_v25  ;;  %v1705_v20 = vrot.slane %v1703_v62, 5  ;;  %v1693_v62 = vsel %vm7734_vm10, %v1687_v58, %v1692_v60  ;;  %v9169_v60 = vld [vmem:[#allocation19_spill] sm:$0xff] }
  0xcf   : > { %6036 = vmatprep.mubr.msk.bf16.mxu0 %vm674_vm1, %v7738_v30  ;;  %v1700_v37 = vor.u32 %v1699_v33, %v1698_v18  ;;  %v1709_v7 = vrot.slane %v9160_v26, 5  ;;  %v1710_v4 = vrot.slane %v9161_v31, 6  ;;  %v9163_v30 = vshrl.u32 %v9162_v21, 16  ;;  %v6768_v33 = vld [vmem:[%s6830_s23 + $0x50] sm:$0x3]  ;;  %v9166_v21 = vld [vmem:[#allocation18_spill] sm:$0xff] }
  0xd0   : > { %v1718_v29 = vshrl.u32 %v6768_v33, 16  ;;  %v1686_v18 = vsel %vm7734_vm10, %v1682_v40, %v1685_v19  ;;  %v1707_v50 = vor.u32 %v1706_v45, %v1705_v20  ;;  %v9167_v9 = vshrl.u32 %v9166_v21, 16 }
  0xd1   : > { %v1713_v44 = vrot.slane %v9163_v30, 5  ;;  %v1702_v42 = vrot.slane %v1700_v37, 4  ;;  %v9165_v30 = vshll.u32 %v9123_v5, 16  ;;  %v1711_v26 = vor.u32 %v1710_v4, %v1709_v7 }
  0xd2   : > { %v1724_v33 = vrot.slane %v9167_v9, 5  ;;  %v9168_v19 = vshll.u32 %v9166_v21, 16  ;;  %v1720_v58 = vrot.slane %v1718_v29, 5  ;;  %v9170_v10 = vshrl.u32 %v9169_v60, 16 }
  0xd3   : > { %5753 = vmatmul.mubr.msk.bf16.gmra.mrb[16].mxu1 %vm674_vm1, %v7939_v6  ;;  %v1721_v14 = vrot.slane %v9165_v30, 6  ;;  %v1715_v31 = vor.u32 %v1714_v2, %v1713_v44  ;;  %v9171_v20 = vshll.u32 %v9169_v60, 16  ;;  %v6769_v30 = vld [vmem:[%s6830_s23 + $0x5c] sm:$0x3]  ;;  %v8037_v4 = vcombine.low %v1686_v18, %v1693_v62  ;;  %v9172_v44 = vld [vmem:[#allocation23_spill] sm:$0xff] }
  0xd4   : > { %5756 = vmatprep.mubr.msk.bf16.mxu1 %vm674_vm1, %v7943_v49  ;;  %v1725_v40 = vrot.slane %v9168_v19, 6  ;;  %v1728_v5 = vrot.slane %v9170_v10, 5  ;;  %v1733_v7 = vshrl.u32 %v6769_v30, 16  ;;  %v9173_v2 = vshrl.u32 %v9172_v44, 16 }
  0xd5   : > { %v1729_v45 = vrot.slane %v9171_v20, 6  ;;  %v9174_v21 = vshll.u32 %v9172_v44, 16  ;;  %v9175_v29 = vshrl.u32 %v9124_v53, 16  ;;  %v9176_v10 = vshll.u32 %v9124_v53, 16  ;;  %v6770_v20 = vld [vmem:[%s6830_s23 + $0x68] sm:$0x3] }
  0xd6   : > { %6037 = vmatmul.mubr.msk.bf16.gmra.mrb[28].mxu0 %vm674_vm1, %v7764_v41  ;;  %v1739_v9 = vrot.slane %v9173_v2, 5  ;;  %v1701_v41 = vsel %vm7734_vm10, %v1697_v46, %v1700_v37  ;;  %v1748_v6 = vshrl.u32 %v6770_v20, 16  ;;  %v1708_v18 = vsel %vm7734_vm10, %v1702_v42, %v1707_v50  ;;  %v8063_v42 = vld [vmem:[%s8758_s1 + $0x68] sm:$0x3f]  }
  0xd7   : > { %6042 = vmatprep.mubr.msk.bf16.mxu0 %vm674_vm1, %v7794_v39  ;;  %v1740_v19 = vrot.slane %v9174_v21, 6  ;;  %v1743_v49 = vrot.slane %v9175_v29, 5  ;;  %v1744_v60 = vrot.slane %v9176_v10, 6  ;;  %v1712_v62 = vrot.slane %v1711_v26, 4 }
  0xd8   : > { %v1717_v30 = vrot.slane %v1715_v31, 4  ;;  %v1726_v44 = vor.u32 %v1725_v40, %v1724_v33  ;;  %v1722_v37 = vor.u32 %v1721_v14, %v1720_v58  ;;  %v1730_v46 = vor.u32 %v1729_v45, %v1728_v5  ;;  %v9179_v58 = vld [vmem:[#allocation30_spill] sm:$0xff] }
  0xd9   : > { %v1735_v2 = vrot.slane %v1733_v7, 5  ;;  %v9177_v53 = vshll.u32 %v9129_v59, 16  ;;  %v3954_v29 = vsel %vm723_vm0, %v7847_v43, 0  ;;  %v1741_v10 = vor.u32 %v1740_v19, %v1739_v9 }
  0xda   : > { %v1745_v50 = vor.u32 %v1744_v60, %v1743_v49  ;;  %v1750_v26 = vrot.slane %v1748_v6, 5  ;;  %v9178_v33 = vshll.u32 %v9130_v22, 16  ;;  %v8069_v14 = vcombine.low %v1701_v41, %v1708_v18 }
  0xdb   : > { %5757 = vmatmul.mubr.msk.bf16.gmra.mrb[20].mxu1 %vm674_vm1, %v7959_v17  ;;  %v1736_v21 = vrot.slane %v9177_v53, 6  ;;  %v1716_v59 = vsel %vm7734_vm10, %v1712_v62, %v1715_v31  ;;  %v1727_v43 = vrot.slane %v1726_v44, 4  ;;  %v1723_v6 = vsel %vm7734_vm10, %v1717_v30, %v1722_v37  ;;  %v6771_v30 = vld [vmem:[%s6830_s23 + $0x74] sm:$0x3] }
  0xdc   : > { %5760 = vmatprep.mubr.msk.bf16.mxu1 %vm674_vm1, %v7694_v16  ;;  %v1751_v40 = vrot.slane %v9178_v33, 6  ;;  %v1732_v49 = vrot.slane %v1730_v46, 4  ;;  %v9180_v5 = vshrl.u32 %v9179_v58, 16  ;;  %v1742_v41 = vrot.slane %v1741_v10, 4 }
  0xdd   : > { %v1737_v22 = vor.u32 %v1736_v21, %v1735_v2  ;;  %v9181_v7 = vshll.u32 %v9179_v58, 16  ;;  %v9182_v31 = vshrl.u32 %v9131_v48, 16  ;;  %v9183_v60 = vshll.u32 %v9131_v48, 16  ;;  %v6772_v58 = vld [vmem:[%s6830_s23 + $0x80] sm:$0x3] }
  0xde   : > { %6043 = vmatmul.mubr.msk.bf16.vlgmr.msra.gmra.mrb[0].mxu0 %vm674_vm1, %v7766_v8  ;;  %v1754_v45 = vrot.slane %v9180_v5, 5  ;;  %v1747_v18 = vrot.slane %v1745_v50, 4  ;;  %v1752_v62 = vor.u32 %v1751_v40, %v1750_v26  ;;  %v1763_v44 = vshrl.u32 %v6771_v30, 16 }
  0xdf   : > { %6046 = vmatprep.mubr.msk.bf16.mxu0 %vm674_vm1, %v8037_v4  ;;  %6075 = vmatpush3.bf16.msra.mxu0 %v3954_v29  ;;  %v1755_v9 = vrot.slane %v9181_v7, 6  ;;  %v1758_v19 = vrot.slane %v9182_v31, 5  ;;  %v1759_v20 = vrot.slane %v9183_v60, 6  ;;  %v9184_v37 = vshrl.u32 %v9137_v32, 16 }
  0xe0   : > { %6703 = vmatprep.subr.msk.bf16.mxu0 %vm723_vm0, %v8063_v42  ;;  %v9185_v53 = vshll.u32 %v9137_v32, 16  ;;  %v9186_v29 = vshrl.u32 %v9132_v0, 16  ;;  %v9187_v10 = vshll.u32 %v9132_v0, 16  ;;  %v1778_v5 = vshrl.u32 %v6772_v58, 16 }
  0xe1   : > { %v1769_v2 = vrot.slane %v9184_v37, 5  ;;  %v8101_v26 = vcombine.low %v1716_v59, %v1723_v6  ;;  %v1731_v40 = vsel %vm7734_vm10, %v1727_v43, %v1730_v46  ;;  %v1738_v32 = vsel %vm7734_vm10, %v1732_v49, %v1737_v22 }
  0xe2   : > { %v1770_v21 = vrot.slane %v9185_v53, 6  ;;  %v1773_v48 = vrot.slane %v9186_v29, 5  ;;  %v1774_v33 = vrot.slane %v9187_v10, 6  ;;  %v1756_v7 = vor.u32 %v1755_v9, %v1754_v45 }
  0xe3   : > { %5761 = vmatmul.mubr.msk.bf16.gmra.mrb[24].mxu1 %vm674_vm1, %v7706_v52  ;;  %v9188_v31 = vshll.u32 %v9136_v34, 16  ;;  %v1746_v0 = vsel %vm7734_vm10, %v1742_v41, %v1745_v50  ;;  %v1753_v30 = vsel %vm7734_vm10, %v1747_v18, %v1752_v62  ;;  %v1760_v37 = vor.u32 %v1759_v20, %v1758_v19 }
  0xe4   : > { %5764 = vmatprep.mubr.msk.bf16.mxu1 %vm674_vm1, %v7712_v23  ;;  %v1765_v53 = vrot.slane %v1763_v44, 5  ;;  %v1771_v59 = vor.u32 %v1770_v21, %v1769_v2  ;;  %v1775_v46 = vor.u32 %v1774_v33, %v1773_v48  ;;  %v1780_v43 = vrot.slane %v1778_v5, 5 }
  0xe5   : > { %v1766_v60 = vrot.slane %v9188_v31, 6  ;;  %v9189_v6 = vshll.u32 %v9138_v24, 16  ;;  %v9190_v34 = vshrl.u32 %v9143_v1, 16  ;;  %v9191_v22 = vshll.u32 %v9143_v1, 16 }
  0xe6   : > { %6047 = vmatmul.mubr.msk.bf16.gmra.mrb[4].mxu0 %vm674_vm1, %v8069_v14  ;;  %v9192_v41 = vshrl.u32 %v9140_v15, 16  ;;  %v9193_v19 = vshll.u32 %v9140_v15, 16  ;;  %v8127_v18 = vcombine.low %v1731_v40, %v1738_v32  ;;  %v1793_v24 = vshrl.u32 %v9144_v38, 16 }
  0xe7   : > { %v1781_v49 = vrot.slane %v9189_v6, 6  ;;  %6050 = vmatprep.mubr.msk.bf16.mxu0 %vm674_vm1, %v8101_v26  ;;  %v1784_v50 = vrot.slane %v9190_v34, 5  ;;  %v1785_v45 = vrot.slane %v9191_v22, 6  ;;  %v9194_v62 = vshrl.u32 %v7200_v57, 16 }
  0xe8   : > { %v1788_v9 = vrot.slane %v9192_v41, 5  ;;  %v1789_v20 = vrot.slane %v9193_v19, 6  ;;  %v9195_v2 = vshll.u32 %v7200_v57, 16  ;;  %v1757_v29 = vrot.slane %v1756_v7, 4 }
  0xe9   : > { %v1799_v44 = vrot.slane %v9194_v62, 5  ;;  %v9196_v1 = vshrl.u32 %v7203_v54, 16  ;;  %v9197_v10 = vshll.u32 %v7203_v54, 16  ;;  %v1808_v15 = vshrl.u32 %v7374_v55, 16 }
  0xea   : > { %v1800_v21 = vrot.slane %v9195_v2, 6  ;;  %v8141_v58 = vcombine.low %v1746_v0, %v1753_v30  ;;  %v1762_v5 = vrot.slane %v1760_v37, 4  ;;  %v1767_v40 = vor.u32 %v1766_v60, %v1765_v53 }
  0xeb   : > { %v1803_v48 = vrot.slane %v9196_v1, 5  ;;  %v1804_v33 = vrot.slane %v9197_v10, 6  ;;  %5765 = vmatmul.mubr.msk.bf16.gmra.mrb[28].mxu1 %vm674_vm1, %v7728_v25  ;;  %v1772_v32 = vrot.slane %v1771_v59, 4  ;;  %v1777_v57 = vrot.slane %v1775_v46, 4 }
  0xec   : > { %5770 = vmatprep.mubr.msk.bf16.mxu1 %vm674_vm1, %v7807_v61  ;;  %v1782_v7 = vor.u32 %v1781_v49, %v1780_v43  ;;  %v1786_v31 = vor.u32 %v1785_v45, %v1784_v50  ;;  %v1790_v6 = vor.u32 %v1789_v20, %v1788_v9  ;;  %v1795_v34 = vrot.slane %v1793_v24, 5  ;;  %v8170_v20 = vld [vmem:[%s8758_s1 + $0x28] sm:$0x3f]  }
  0xed   : > { %v9198_v54 = vshll.u32 %v9144_v38, 16  ;;  %v1801_v41 = vor.u32 %v1800_v21, %v1799_v44  ;;  %v1805_v19 = vor.u32 %v1804_v33, %v1803_v48  ;;  %v1810_v62 = vrot.slane %v1808_v15, 5 }
  0xee   : > { %v9199_v0 = vshll.u32 %v7374_v55, 16  ;;  %v2176_v60 = vsel %vm723_vm0, %v7935_v36, 0  ;;  %6051 = vmatmul.mubr.msk.bf16.gmra.mrb[8].mxu0 %vm674_vm1, %v8127_v18  ;;  %v1761_v61 = vsel %vm7734_vm10, %v1757_v29, %v1760_v37  ;;  %v1768_v53 = vsel %vm7734_vm10, %v1762_v5, %v1767_v40 }
  0xef   : > { %v1796_v22 = vrot.slane %v9198_v54, 6  ;;  %6054 = vmatprep.mubr.msk.bf16.mxu0 %vm674_vm1, %v8141_v58  ;;  %v1776_v38 = vsel %vm7734_vm10, %v1772_v32, %v1775_v46  ;;  %v1783_v55 = vsel %vm7734_vm10, %v1777_v57, %v1782_v7  ;;  %v1787_v59 = vrot.slane %v1786_v31, 4 }
  0xf0   : > { %v1811_v30 = vrot.slane %v9199_v0, 6  ;;  %v1792_v36 = vrot.slane %v1790_v6, 4  ;;  %v1802_v49 = vrot.slane %v1801_v41, 4  ;;  %v9200_v50 = vshrl.u32 %v7230_v51, 16 }
  0xf1   : > { %v1797_v43 = vor.u32 %v1796_v22, %v1795_v34  ;;  %v9201_v37 = vshll.u32 %v7230_v51, 16  ;;  %v1807_v24 = vrot.slane %v1805_v19, 4  ;;  %v9202_v44 = vshrl.u32 %v9091_v3, 16 }
  0xf2   : > { %v1814_v45 = vrot.slane %v9200_v50, 5  ;;  %v1812_v46 = vor.u32 %v1811_v30, %v1810_v62  ;;  %v9203_v21 = vshll.u32 %v9091_v3, 16  ;;  %v8178_v1 = vcombine.low %v1761_v61, %v1768_v53 }
  0xf3   : > { %v1815_v9 = vrot.slane %v9201_v37, 6  ;;  %v1818_v2 = vrot.slane %v9202_v44, 5  ;;  %5771 = vmatmul.mubr.msk.bf16.vlgmr.msra.gmra.mrb[0].mxu1 %vm674_vm1, %v7821_v63  ;;  %v8180_v51 = vcombine.low %v1776_v38, %v1783_v55  ;;  %v1823_v48 = vshrl.u32 %v9092_v12, 16 }
  0xf4   : > { %v1819_v29 = vrot.slane %v9203_v21, 6  ;;  %v9204_v10 = vshrl.u32 %v9093_v13, 16  ;;  %5803 = vmatpush3.bf16.msra.mxu1 %v2176_v60  ;;  %5774 = vmatprep.mubr.msk.bf16.mxu1 %vm674_vm1, %v7794_v39  ;;  %v9205_v15 = vshll.u32 %v9093_v13, 16  ;;  %v9206_v5 = vshrl.u32 %v7277_v47, 16 }
  0xf5   : > { %v9207_v32 = vshll.u32 %v7277_v47, 16  ;;  %v1838_v7 = vshrl.u32 %v7439_v27, 16  ;;  %v1791_v31 = vsel %vm7734_vm10, %v1787_v59, %v1790_v6  ;;  %v1798_v34 = vsel %vm7734_vm10, %v1792_v36, %v1797_v43  ;;  %6695 = vmatprep.subr.msk.bf16.mxu1 %vm723_vm0, %v8170_v20 }
  0xf6   : > { %v1829_v33 = vrot.slane %v9204_v10, 5  ;;  %v1830_v3 = vrot.slane %v9205_v15, 6  ;;  %v1833_v40 = vrot.slane %v9206_v5, 5  ;;  %v1806_v13 = vsel %vm7734_vm10, %v1802_v49, %v1805_v19  ;;  %6055 = vmatmul.mubr.msk.bf16.gmra.mrb[12].mxu0 %vm674_vm1, %v8178_v1 }
  0xf7   : > { %v1834_v57 = vrot.slane %v9207_v32, 6  ;;  %v1813_v54 = vsel %vm7734_vm10, %v1807_v24, %v1812_v46  ;;  %v1816_v22 = vor.u32 %v1815_v9, %v1814_v45  ;;  %v1820_v47 = vor.u32 %v1819_v29, %v1818_v2  ;;  %6058 = vmatprep.mubr.msk.bf16.mxu0 %vm674_vm1, %v8180_v51 }
  0xf8   : > { %v1825_v41 = vrot.slane %v1823_v48, 5  ;;  %v9208_v6 = vshll.u32 %v9092_v12, 16  ;;  %v1831_v0 = vor.u32 %v1830_v3, %v1829_v33  ;;  %v1840_v60 = vrot.slane %v1838_v7, 5  ;;  %v9217_v33 = vld [vmem:[#allocation59_spill] sm:$0xff] }
  0xf9   : > { %v1835_v30 = vor.u32 %v1834_v57, %v1833_v40  ;;  %v9209_v19 = vshll.u32 %v7439_v27, 16  ;;  %v8212_v53 = vcombine.low %v1791_v31, %v1798_v34  ;;  %v8214_v38 = vcombine.low %v1806_v13, %v1813_v54  ;;  %v9220_v40 = vld [vmem:[#allocation76_spill] sm:$0xff] }
  0xfa   : > { %v1826_v62 = vrot.slane %v9208_v6, 6  ;;  %v1817_v55 = vrot.slane %v1816_v22, 4  ;;  %v1822_v59 = vrot.slane %v1820_v47, 4  ;;  %v9210_v36 = vshrl.u32 %v7305_v56, 16 }
  0xfb   : > { %v1841_v61 = vrot.slane %v9209_v19, 6  ;;  %v9211_v12 = vshll.u32 %v7305_v56, 16  ;;  %5775 = vmatmul.mubr.msk.bf16.gmra.mrb[4].mxu1 %vm674_vm1, %v7766_v8  ;;  %v9212_v45 = vshrl.u32 %v7308_v35, 16  ;;  %v9213_v37 = vshll.u32 %v7308_v35, 16  ;;  %v9214_v56 = vld [vmem:[#allocation57_spill] sm:$0xff] }
  0xfc   : > { %v1844_v43 = vrot.slane %v9210_v36, 5  ;;  %v1827_v50 = vor.u32 %v1826_v62, %v1825_v41  ;;  %v1853_v24 = vshrl.u32 %v7463_v11, 16  ;;  %5778 = vmatprep.mubr.msk.bf16.mxu1 %vm674_vm1, %v8037_v4  ;;  %v1832_v46 = vrot.slane %v1831_v0, 4 }
  0xfd   : > { %v1845_v49 = vrot.slane %v9211_v12, 6  ;;  %v1848_v27 = vrot.slane %v9212_v45, 5  ;;  %v1849_v9 = vrot.slane %v9213_v37, 6  ;;  %v1837_v44 = vrot.slane %v1835_v30, 4  ;;  %v9226_v45 = vld [vmem:[#allocation63_spill] sm:$0xff] }
  0xfe   : > { %v1842_v2 = vor.u32 %v1841_v61, %v1840_v60  ;;  %v9215_v21 = vshrl.u32 %v9214_v56, 16  ;;  %v9216_v48 = vshll.u32 %v9214_v56, 16  ;;  %v9218_v15 = vshrl.u32 %v9217_v33, 16  ;;  %6059 = vmatmul.mubr.msk.bf16.gmra.mrb[16].mxu0 %vm674_vm1, %v8212_v53 }
  0xff   : > { %v9219_v35 = vshll.u32 %v9217_v33, 16  ;;  %v2832_v32 = vshrl.u32 %v9220_v40, 16  ;;  %v1821_v57 = vsel %vm7734_vm10, %v1817_v55, %v1820_v47  ;;  %v1846_v7 = vor.u32 %v1845_v49, %v1844_v43  ;;  %6062 = vmatprep.mubr.msk.bf16.mxu0 %vm674_vm1, %v8214_v38 }
 0x100   : > { %v2823_v29 = vrot.slane %v9215_v21, 5  ;;  %v2824_v10 = vrot.slane %v9216_v48, 6  ;;  %v2827_v3 = vrot.slane %v9218_v15, 5  ;;  %v1828_v31 = vsel %vm7734_vm10, %v1822_v59, %v1827_v50 }
 0x101   : > { %v2828_v5 = vrot.slane %v9219_v35, 6  ;;  %v1850_v34 = vor.u32 %v1849_v9, %v1848_v27  ;;  %v1855_v13 = vrot.slane %v1853_v24, 5  ;;  %v9221_v54 = vshll.u32 %v7463_v11, 16 }
 0x102   : > { %v1836_v41 = vsel %vm7734_vm10, %v1832_v46, %v1835_v30  ;;  %v1843_v47 = vsel %vm7734_vm10, %v1837_v44, %v1842_v2  ;;  %v2825_v6 = vor.u32 %v2824_v10, %v2823_v29  ;;  %v2834_v0 = vrot.slane %v2832_v32, 5  ;;  %v9223_v30 = vld [vmem:[#allocation62_spill] sm:$0xff]  ;;  %v9229_v46 = vld [vmem:[#allocation77_spill] sm:$0xff] }
 0x103   : > { %v1856_v22 = vrot.slane %v9221_v54, 6  ;;  %v2829_v62 = vor.u32 %v2828_v5, %v2827_v3  ;;  %v9222_v60 = vshll.u32 %v9220_v40, 16  ;;  %v8254_v61 = vcombine.low %v1821_v57, %v1828_v31  ;;  %5779 = vmatmul.mubr.msk.bf16.gmra.mrb[8].mxu1 %vm674_vm1, %v8069_v14 }
 0x104   : > { %v1847_v55 = vrot.slane %v1846_v7, 4  ;;  %v8258_v11 = vcombine.low %v1836_v41, %v1843_v47  ;;  %v1852_v59 = vrot.slane %v1850_v34, 4  ;;  %v9224_v43 = vshrl.u32 %v9223_v30, 16  ;;  %5782 = vmatprep.mubr.msk.bf16.mxu1 %vm674_vm1, %v8101_v26  ;;  %v9231_v41 = vld [vmem:[#allocation5_spill] sm:$0xff] }
 0x105   : > { %v2835_v19 = vrot.slane %v9222_v60, 6  ;;  %v1857_v36 = vor.u32 %v1856_v22, %v1855_v13  ;;  %v9225_v49 = vshll.u32 %v9223_v30, 16  ;;  %v9227_v27 = vshrl.u32 %v9226_v45, 16  ;;  %v9235_v60 = vld [vmem:[#allocation22_spill] sm:$0xff]  ;;  %v6746_v30 = vld [vmem:[%s8758_s1 + $0x30] sm:$0x3f]  }
 0x106   : > { %v3712_v12 = vrot.slane %v9224_v43, 5  ;;  %v9228_v9 = vshll.u32 %v9226_v45, 16  ;;  %v3721_v44 = vshrl.u32 %v9229_v46, 16  ;;  %v2826_v2 = vrot.slane %v2825_v6, 4  ;;  %6063 = vmatmul.mubr.msk.bf16.gmra.mrb[20].mxu0 %vm674_vm1, %v8254_v61  ;;  %v6747_v6 = vld [vmem:[%s8758_s1 + $0x70] sm:$0x3f]  }
 0x107   : > { %v3713_v50 = vrot.slane %v9225_v49, 6  ;;  %v3716_v37 = vrot.slane %v9227_v27, 5  ;;  %v2831_v56 = vrot.slane %v2829_v62, 4  ;;  %v2836_v21 = vor.u32 %v2835_v19, %v2834_v0  ;;  %6066 = vmatprep.mubr.msk.bf16.mxu0 %vm674_vm1, %v8258_v11  ;;  %v9233_v0 = vld [vmem:[#allocation10_spill] sm:$0xff]  ;;  %v9236_v19 = vld [vmem:[#allocation75_spill] sm:$0xff] }
 0x108   : > { %v3717_v24 = vrot.slane %v9228_v9, 6  ;;  %v1851_v29 = vsel %vm7734_vm10, %v1847_v55, %v1850_v34  ;;  %v1858_v48 = vsel %vm7734_vm10, %v1852_v59, %v1857_v36  ;;  %v3723_v15 = vrot.slane %v3721_v44, 5  ;;  %v9237_v55 = vld [vmem:[#allocation28_spill] sm:$0xff]  ;;  %v9238_v59 = vld [vmem:[#allocation34_spill] sm:$0xff]  ;;  %v9241_v49 = vld [vmem:[#allocation43_spill] sm:$0xff] }
 0x109   : > { %v3714_v10 = vor.u32 %v3713_v50, %v3712_v12  ;;  %v9230_v3 = vshll.u32 %v9229_v46, 16  ;;  %v2830_v5 = vsel %vm7734_vm10, %v2826_v2, %v2829_v62  ;;  %v2837_v40 = vsel %vm7734_vm10, %v2831_v56, %v2836_v21  ;;  %v9232_v62 = vld [vmem:[#allocation6_spill] sm:$0xff]  ;;  %v9247_v9 = vld [vmem:[#allocation65_spill] sm:$0xff]  ;;  %v9248_v2 = vld [vmem:[#allocation32_spill] sm:$0xff] }
 0x10a   : > { %v3718_v33 = vor.u32 %v3717_v24, %v3716_v37  ;;  %v8287_v32 = vcombine.low %v1851_v29, %v1858_v48  ;;  %v8291_v57 = vcombine.low %v2830_v5, %v2837_v40  ;;  %v4188_v47 = vsel %vm723_vm0, %v8063_v42, 0  ;;  %v9234_v42 = vld [vmem:[#allocation21_spill] sm:$0xff]  ;;  %v9239_v43 = vld [vmem:[#allocation2_spill] sm:$0xff]  ;;  %v9250_v48 = vld [vmem:[#allocation44_spill] sm:$0xff] }
 0x10b   : > { %v3724_v35 = vrot.slane %v9230_v3, 6  ;;  %5783 = vmatmul.mubr.msk.bf16.gmra.mrb[12].mxu1 %vm674_vm1, %v8127_v18  ;;  %v3715_v7 = vrot.slane %v3714_v10, 4  ;;  %v2410_v36 = vsel %vm723_vm0, %v8170_v20, 0  ;;  %v9240_v12 = vld [vmem:[#allocation38_spill] sm:$0xff]  ;;  %v9246_v37 = vld [vmem:[#allocation61_spill] sm:$0xff]  ;;  %v4406_v56 = vsel %vm723_vm0, %v6747_v6, 0 }
 0x10c   : > { %5786 = vmatprep.mubr.msk.bf16.mxu1 %vm674_vm1, %v8141_v58  ;;  %v3720_v31 = vrot.slane %v3718_v33, 4  ;;  %v9242_v20 = vld [vmem:[#allocation46_spill] sm:$0xff]  ;;  %v8380_v24 = vld [vmem:[%s6830_s23 + $0xd8] sm:$0xf]  ;;  %v8383_v46 = vld [vmem:[%s6830_s23 + $0xdc] sm:$0xf] }
 0x10d   : > { %v3725_v34 = vor.u32 %v3724_v35, %v3723_v15  ;;  %v3719_v13 = vsel %vm7734_vm10, %v3715_v7, %v3718_v33  ;;  %v9243_v50 = vld [vmem:[#allocation50_spill] sm:$0xff]  ;;  %v5311_v44 = vcombine.low %v8380_v24, %v8383_v46  ;;  %v6749_v21 = vld [vmem:[%s8758_s1 + $0x78] sm:$0x3f]   ;;  %v9251_v10 = vld [vmem:[#allocation47_spill] sm:$0xff]  ;;  %v2628_v5 = vsel %vm723_vm0, %v6746_v30, 0 }
 0x10e   : > { %6067 = vmatmul.mubr.msk.bf16.gmra.mrb[24].mxu0 %vm674_vm1, %v8287_v32  ;;  %v9244_v45 = vld [vmem:[#allocation54_spill] sm:$0xff]  ;;  %v9249_v29 = vld [vmem:[#allocation41_spill] sm:$0xff]  ;;  %v9252_v33 = vld [vmem:[#allocation52_spill] sm:$0xff] }
 0x10f   : > { %6070 = vmatprep.mubr.msk.bf16.mxu0 %vm674_vm1, %v8291_v57  ;;  %v3726_v54 = vsel %vm7734_vm10, %v3720_v31, %v3725_v34  ;;  %v9245_v27 = vld [vmem:[#allocation58_spill] sm:$0xff]  ;;  %v9253_v15 = vld [vmem:[#allocation20_spill] sm:$0xff]  ;;  %v9254_v3 = vld [vmem:[#allocation55_spill] sm:$0xff] }
 0x110   : > { %v8303_v22 = vcombine.low %v3719_v13, %v3726_v54  ;;  %v9255_v35 = vld [vmem:[#allocation60_spill] sm:$0xff]  ;;  %v6748_v40 = vld [vmem:[%s8758_s1 + $0x38] sm:$0x3f]   ;;  %v9256_v7 = vld [vmem:[#allocation26_spill] sm:$0xff]  ;;  %v4150_v54 = vshrl.u32 %v8380_v24, 16 }
 0x111   : > { %v9257_v31 = vld [vmem:[#allocation64_spill] sm:$0xff]  ;;  %v9258_v34 = vld [vmem:[#allocation67_spill] sm:$0xff] }
 0x112   : > { %v9259_v13 = vld [vmem:[#allocation68_spill] sm:$0xff] }
 0x113   : > { %5787 = vmatmul.mubr.msk.bf16.gmra.mrb[16].mxu1 %vm674_vm1, %v8178_v1 }
 0x114   : > { %5790 = vmatprep.mubr.msk.bf16.mxu1 %vm674_vm1, %v8180_v51 }
 0x116   : > { %6071 = vmatmul.mubr.msk.bf16.gmra.mrb[28].mxu0 %vm674_vm1, %v8303_v22 }
 0x117   : > { %6076 = vmatprep.mubr.msk.bf16.mxu0 %vm674_vm1, %v9231_v41 }
 0x11b   : > { %5791 = vmatmul.mubr.msk.bf16.gmra.mrb[20].mxu1 %vm674_vm1, %v8212_v53 }
 0x11c   : > { %5794 = vmatprep.mubr.msk.bf16.mxu1 %vm674_vm1, %v8214_v38 }
 0x11e   : > { %6077 = vmatmul.mubr.msk.bf16.vlgmr.msra.gmra.mrb[0].mxu0 %vm674_vm1, %v9232_v62 }
 0x11f   : > { %6080 = vmatprep.mubr.msk.bf16.mxu0 %vm674_vm1, %v9233_v0  ;;  %6109 = vmatpush3.bf16.msra.mxu0 %v4188_v47  ;;  %v4163_v47 = vshrl.u32 %v8383_v46, 16 }
 0x120   : > { %6704 = vmatprep.subr.msk.bf16.mxu0 %vm723_vm0, %v6747_v6  ;;  %v9260_v6 = vld [vmem:[#allocation69_spill] sm:$0xff] }
 0x123   : > { %5795 = vmatmul.mubr.msk.bf16.gmra.mrb[24].mxu1 %vm674_vm1, %v8254_v61 }
 0x124   : > { %5798 = vmatprep.mubr.msk.bf16.mxu1 %vm674_vm1, %v8258_v11 }
 0x126   : > { %6081 = vmatmul.mubr.msk.bf16.gmra.mrb[4].mxu0 %vm674_vm1, %v9234_v42 }
 0x127   : > { %6084 = vmatprep.mubr.msk.bf16.mxu0 %vm674_vm1, %v9235_v60 }
 0x12b   : > { %5799 = vmatmul.mubr.msk.bf16.gmra.mrb[28].mxu1 %vm674_vm1, %v8287_v32 }
 0x12c   : > { %5804 = vmatprep.mubr.msk.bf16.mxu1 %vm674_vm1, %v9236_v19  ;;  %v4165_v19 = vrot.slane %v4163_v47, 4 }
 0x12e   : > { %6085 = vmatmul.mubr.msk.bf16.gmra.mrb[8].mxu0 %vm674_vm1, %v9237_v55 }
 0x12f   : > { %6088 = vmatprep.mubr.msk.bf16.mxu0 %vm674_vm1, %v9238_v59 }
 0x133   : > { %5805 = vmatmul.mubr.msk.bf16.vlgmr.msra.gmra.mrb[0].mxu1 %vm674_vm1, %v9239_v43 }
 0x134   : > { %5837 = vmatpush3.bf16.msra.mxu1 %v2410_v36  ;;  %5808 = vmatprep.mubr.msk.bf16.mxu1 %vm674_vm1, %v9231_v41  ;;  %v4153_v41 = vshll.u32 %v8380_v24, 16  ;;  %v9262_v36 = vld [vmem:[#allocation71_spill] sm:$0xff] }
 0x135   : > { %6696 = vmatprep.subr.msk.bf16.mxu1 %vm723_vm0, %v6746_v30 }
 0x136   : > { %6089 = vmatmul.mubr.msk.bf16.gmra.mrb[12].mxu0 %vm674_vm1, %v9240_v12 }
 0x137   : > { %6092 = vmatprep.mubr.msk.bf16.mxu0 %vm674_vm1, %v9241_v49 }
 0x13b   : > { %5809 = vmatmul.mubr.msk.bf16.gmra.mrb[4].mxu1 %vm674_vm1, %v9232_v62  ;;  %v4159_v62 = vshll.u32 %v8383_v46, 16 }
 0x13c   : > { %5812 = vmatprep.mubr.msk.bf16.mxu1 %vm674_vm1, %v9233_v0  ;;  %v4152_v0 = vrot.slane %v4150_v54, 4 }
 0x13e   : > { %6093 = vmatmul.mubr.msk.bf16.gmra.mrb[16].mxu0 %vm674_vm1, %v9242_v20 }
 0x13f   : > { %6096 = vmatprep.mubr.msk.bf16.mxu0 %vm674_vm1, %v9243_v50 }
 0x143   : > { %5813 = vmatmul.mubr.msk.bf16.gmra.mrb[8].mxu1 %vm674_vm1, %v9234_v42  ;;  %v4155_v42 = vrot.slane %v4153_v41, 5 }
 0x144   : > { %5816 = vmatprep.mubr.msk.bf16.mxu1 %vm674_vm1, %v9235_v60  ;;  %v4161_v60 = vrot.slane %v4159_v62, 5 }
 0x145   : > { %v4156_v30 = vor.u32 %v4155_v42, %v4152_v0  ;;  %v9276_v0 = vld [vmem:[#allocation66_spill] sm:$0xff]  ;;  %v9277_v42 = vld [vmem:[#allocation51_spill] sm:$0xff] }
 0x146   : > { %6097 = vmatmul.mubr.msk.bf16.gmra.mrb[20].mxu0 %vm674_vm1, %v9244_v45  ;;  %v4166_v43 = vor.u32 %v4165_v19, %v4161_v60 }
 0x147   : > { %6100 = vmatprep.mubr.msk.bf16.mxu0 %vm674_vm1, %v9245_v27 }
 0x14b   : > { %5817 = vmatmul.mubr.msk.bf16.gmra.mrb[12].mxu1 %vm674_vm1, %v9237_v55  ;;  %v8461_v55 = vld [vmem:[%s6830_s23 + $0xe0] sm:$0x3] }
 0x14c   : > { %5820 = vmatprep.mubr.msk.bf16.mxu1 %vm674_vm1, %v9238_v59  ;;  %v9261_v59 = vld [vmem:[#allocation70_spill] sm:$0xff] }
 0x14e   : > { %6101 = vmatmul.mubr.msk.bf16.gmra.mrb[24].mxu0 %vm674_vm1, %v9246_v37 }
 0x14f   : > { %6104 = vmatprep.mubr.msk.bf16.mxu0 %vm674_vm1, %v9247_v9 }
 0x153   : > { %5821 = vmatmul.mubr.msk.bf16.gmra.mrb[16].mxu1 %vm674_vm1, %v9240_v12  ;;  %v4169_v12 = vshll.u32 %v8461_v55, 16 }
 0x154   : > { %5824 = vmatprep.mubr.msk.bf16.mxu1 %vm674_vm1, %v9241_v49  ;;  %v4157_v49 = vrot.slane %v4156_v30, 4 }
 0x156   : > { %6105 = vmatmul.mubr.msk.bf16.gmra.mrb[28].mxu0 %vm674_vm1, %v5311_v44  ;;  %v4162_v9 = vsel %vm6942_vm4, %v4157_v49, %v4161_v60 }
 0x157   : > { %6110 = vmatprep.mubr.msk.bf16.mxu0 %vm674_vm1, %v9248_v2 }
 0x15b   : > { %5825 = vmatmul.mubr.msk.bf16.gmra.mrb[20].mxu1 %vm674_vm1, %v9242_v20  ;;  %v4167_v20 = vrot.slane %v4166_v43, 4 }
 0x15c   : > { %5828 = vmatprep.mubr.msk.bf16.mxu1 %vm674_vm1, %v9243_v50  ;;  %v4171_v50 = vrot.slane %v4169_v12, 5 }
 0x15e   : > { %6111 = vmatmul.mubr.msk.bf16.vlgmr.msra.gmra.mrb[0].mxu0 %vm674_vm1, %v9249_v29  ;;  %v4172_v44 = vsel %vm6942_vm4, %v4167_v20, %v4171_v50 }
 0x15f   : > { %6114 = vmatprep.mubr.msk.bf16.mxu0 %vm674_vm1, %v9250_v48  ;;  %6143 = vmatpush3.bf16.msra.mxu0 %v4406_v56  ;;  %v9266_v56 = vld [vmem:[#allocation73_spill] sm:$0xff] }
 0x160   : > { %6705 = vmatprep.subr.msk.bf16.mxu0 %vm723_vm0, %v6749_v21 }
 0x163   : > { %5829 = vmatmul.mubr.msk.bf16.gmra.mrb[24].mxu1 %vm674_vm1, %v9244_v45  ;;  %v9263_v45 = vld [vmem:[#allocation48_spill] sm:$0xff] }
 0x164   : > { %5832 = vmatprep.mubr.msk.bf16.mxu1 %vm674_vm1, %v9245_v27  ;;  %v9264_v27 = vld [vmem:[#allocation25_spill] sm:$0xff] }
 0x166   : > { %6115 = vmatmul.mubr.msk.bf16.gmra.mrb[4].mxu0 %vm674_vm1, %v9251_v10 }
 0x167   : > { %6118 = vmatprep.mubr.msk.bf16.mxu0 %vm674_vm1, %v9252_v33 }
 0x16b   : > { %5833 = vmatmul.mubr.msk.bf16.gmra.mrb[28].mxu1 %vm674_vm1, %v9246_v37 }
 0x16c   : > { %5838 = vmatprep.mubr.msk.bf16.mxu1 %vm674_vm1, %v9253_v15  ;;  %v9270_v15 = vld [vmem:[#allocation15_spill] sm:$0xff] }
 0x16e   : > { %6119 = vmatmul.mubr.msk.bf16.gmra.mrb[8].mxu0 %vm674_vm1, %v9254_v3 }
 0x16f   : > { %6122 = vmatprep.mubr.msk.bf16.mxu0 %vm674_vm1, %v9255_v35 }
 0x173   : > { %5839 = vmatmul.mubr.msk.bf16.vlgmr.msra.gmra.mrb[0].mxu1 %vm674_vm1, %v9256_v7  ;;  %v9274_v7 = vld [vmem:[#allocation74_spill] sm:$0xff] }
 0x174   : > { %5871 = vmatpush3.bf16.msra.mxu1 %v2628_v5  ;;  %5842 = vmatprep.mubr.msk.bf16.mxu1 %vm674_vm1, %v9248_v2  ;;  %v5331_v2 = vcombine.low %v4162_v9, %v4172_v44  ;;  %v2853_v5 = vsel %vm723_vm0, %v6748_v40, 0 }
 0x175   : > { %6697 = vmatprep.subr.msk.bf16.mxu1 %vm723_vm0, %v6748_v40  ;;  %v4386_v40 = vrot.slane %v8383_v46, 5 }
 0x176   : > { %6123 = vmatmul.mubr.msk.bf16.gmra.mrb[12].mxu0 %vm674_vm1, %v9257_v31 }
 0x177   : > { %6126 = vmatprep.mubr.msk.bf16.mxu0 %vm674_vm1, %v9258_v34 }
 0x17b   : > { %5843 = vmatmul.mubr.msk.bf16.gmra.mrb[4].mxu1 %vm674_vm1, %v9249_v29  ;;  %v4631_v29 = vsel %vm723_vm0, %v6749_v21, 0  ;;  %v9271_v21 = vld [vmem:[#allocation13_spill] sm:$0xff] }
 0x17c   : > { %5846 = vmatprep.mubr.msk.bf16.mxu1 %vm674_vm1, %v9250_v48  ;;  %v9267_v48 = vld [vmem:[#allocation27_spill] sm:$0xff] }
 0x17e   : > { %6127 = vmatmul.mubr.msk.bf16.gmra.mrb[16].mxu0 %vm674_vm1, %v9259_v13 }
 0x17f   : > { %6130 = vmatprep.mubr.msk.bf16.mxu0 %vm674_vm1, %v9260_v6 }
 0x183   : > { %5847 = vmatmul.mubr.msk.bf16.gmra.mrb[8].mxu1 %vm674_vm1, %v9251_v10  ;;  %v9268_v10 = vld [vmem:[#allocation12_spill] sm:$0xff] }
 0x184   : > { %5850 = vmatprep.mubr.msk.bf16.mxu1 %vm674_vm1, %v9252_v33  ;;  %v9269_v33 = vld [vmem:[#allocation11_spill] sm:$0xff] }
 0x186   : > { %6131 = vmatmul.mubr.msk.bf16.gmra.mrb[20].mxu0 %vm674_vm1, %v9261_v59 }
 0x187   : > { %6134 = vmatprep.mubr.msk.bf16.mxu0 %vm674_vm1, %v9262_v36 }
 0x18b   : > { %5851 = vmatmul.mubr.msk.bf16.gmra.mrb[12].mxu1 %vm674_vm1, %v9254_v3  ;;  %v9272_v3 = vld [vmem:[#allocation29_spill] sm:$0xff] }
 0x18c   : > { %5854 = vmatprep.mubr.msk.bf16.mxu1 %vm674_vm1, %v9255_v35  ;;  %v9273_v35 = vld [vmem:[#allocation16_spill] sm:$0xff] }
 0x18e   : > { %6135 = vmatmul.mubr.msk.bf16.gmra.mrb[24].mxu0 %vm674_vm1, %v9263_v45 }
 0x18f   : > { %6138 = vmatprep.mubr.msk.bf16.mxu0 %vm674_vm1, %v9264_v27 }
 0x193   : > { %5855 = vmatmul.mubr.msk.bf16.gmra.mrb[16].mxu1 %vm674_vm1, %v9257_v31  ;;  %v9275_v31 = vld [vmem:[#allocation33_spill] sm:$0xff] }
 0x194   : > { %5858 = vmatprep.mubr.msk.bf16.mxu1 %vm674_vm1, %v9258_v34  ;;  %v5349_v34 = vrot.slane %v8380_v24, 9 }
 0x196   : > { %6139 = vmatmul.mubr.msk.bf16.gmra.mrb[28].mxu0 %vm674_vm1, %v5331_v2  ;;  %v4387_v19 = vsel %vm7529_vm7, %v5349_v34, %v4386_v40 }
 0x197   : > { %6144 = vmatprep.mubr.msk.bf16.mxu0 %vm674_vm1, %v9266_v56 }
 0x19b   : > { %5859 = vmatmul.mubr.msk.bf16.gmra.mrb[20].mxu1 %vm674_vm1, %v9259_v13  ;;  %v4388_v13 = vrot.slane %v4386_v40, 4 }
 0x19c   : > { %5862 = vmatprep.mubr.msk.bf16.mxu1 %vm674_vm1, %v9260_v6  ;;  %v4389_v6 = vrot.slane %v8461_v55, 5 }
 0x19e   : > { %6145 = vmatmul.mubr.msk.bf16.vlgmr.msra.gmra.mrb[0].mxu0 %vm674_vm1, %v9267_v48 }
 0x19f   : > { %6148 = vmatprep.mubr.msk.bf16.mxu0 %vm674_vm1, %v9268_v10  ;;  %6177 = vmatpush3.bf16.msra.mxu0 %v4631_v29 }
 0x1a3   : > { %5863 = vmatmul.mubr.msk.bf16.gmra.mrb[24].mxu1 %vm674_vm1, %v9261_v59  ;;  %v4390_v59 = vsel %vm7529_vm7, %v4388_v13, %v4389_v6 }
 0x1a4   : > { %5866 = vmatprep.mubr.msk.bf16.mxu1 %vm674_vm1, %v9262_v36  ;;  %v5352_v36 = vcombine.low %v4387_v19, %v4390_v59 }
 0x1a6   : > { %6149 = vmatmul.mubr.msk.bf16.gmra.mrb[4].mxu0 %vm674_vm1, %v9269_v33 }
 0x1a7   : > { %6152 = vmatprep.mubr.msk.bf16.mxu0 %vm674_vm1, %v9270_v15 }
 0x1ab   : > { %5867 = vmatmul.mubr.msk.bf16.gmra.mrb[28].mxu1 %vm674_vm1, %v9263_v45 }
 0x1ac   : > { %5872 = vmatprep.mubr.msk.bf16.mxu1 %vm674_vm1, %v9271_v21 }
 0x1ae   : > { %6153 = vmatmul.mubr.msk.bf16.gmra.mrb[8].mxu0 %vm674_vm1, %v9272_v3 }
 0x1af   : > { %6156 = vmatprep.mubr.msk.bf16.mxu0 %vm674_vm1, %v9273_v35 }
 0x1b3   : > { %5873 = vmatmul.mubr.msk.bf16.vlgmr.msra.gmra.mrb[0].mxu1 %vm674_vm1, %v9274_v7 }
 0x1b4   : > { %5905 = vmatpush3.bf16.msra.mxu1 %v2853_v5  ;;  %5876 = vmatprep.mubr.msk.bf16.mxu1 %vm674_vm1, %v9266_v56 }
 0x1b6   : > { %6157 = vmatmul.mubr.msk.bf16.gmra.mrb[12].mxu0 %vm674_vm1, %v9275_v31 }
 0x1b7   : > { %6160 = vmatprep.mubr.msk.bf16.mxu0 %vm674_vm1, %v7959_v17 }
 0x1bb   : > { %5877 = vmatmul.mubr.msk.bf16.gmra.mrb[4].mxu1 %vm674_vm1, %v9267_v48 }
 0x1bc   : > { %5880 = vmatprep.mubr.msk.bf16.mxu1 %vm674_vm1, %v9268_v10 }
 0x1be   : > { %6161 = vmatmul.mubr.msk.bf16.gmra.mrb[16].mxu0 %vm674_vm1, %v7694_v16 }
 0x1bf   : > { %6164 = vmatprep.mubr.msk.bf16.mxu0 %vm674_vm1, %v7706_v52 }
 0x1c3   : > { %5881 = vmatmul.mubr.msk.bf16.gmra.mrb[8].mxu1 %vm674_vm1, %v9269_v33 }
 0x1c4   : > { %5884 = vmatprep.mubr.msk.bf16.mxu1 %vm674_vm1, %v9270_v15 }
 0x1c6   : > { %6165 = vmatmul.mubr.msk.bf16.gmra.mrb[20].mxu0 %vm674_vm1, %v7712_v23 }
 0x1c7   : > { %6168 = vmatprep.mubr.msk.bf16.mxu0 %vm674_vm1, %v7728_v25 }
 0x1cb   : > { %5885 = vmatmul.mubr.msk.bf16.gmra.mrb[12].mxu1 %vm674_vm1, %v9272_v3 }
 0x1cc   : > { %5888 = vmatprep.mubr.msk.bf16.mxu1 %vm674_vm1, %v9273_v35 }
 0x1ce   : > { %6169 = vmatmul.mubr.msk.bf16.gmra.mrb[24].mxu0 %vm674_vm1, %v9276_v0 }
 0x1cf   : > { %6172 = vmatprep.mubr.msk.bf16.mxu0 %vm674_vm1, %v9277_v42 }
 0x1d3   : > { %5889 = vmatmul.mubr.msk.bf16.gmra.mrb[16].mxu1 %vm674_vm1, %v9275_v31 }
 0x1d4   : > { %5892 = vmatprep.mubr.msk.bf16.mxu1 %vm674_vm1, %v7959_v17 }
 0x1d6   : > { %6173 = vmatmul.mubr.msk.bf16.gmra.mrb[28].mxu0 %vm674_vm1, %v5352_v36 }
 0x1d7   : > { %6178 = vmatprep.mubr.msk.bf16.mxu0 %vm674_vm1, %v7766_v8 }
 0x1db   : > { %5893 = vmatmul.mubr.msk.bf16.gmra.mrb[20].mxu1 %vm674_vm1, %v7694_v16  ;;  %v4601_v16 = vrot.slane %v4150_v54, 5 }
 0x1dc   : > { %5896 = vmatprep.mubr.msk.bf16.mxu1 %vm674_vm1, %v7706_v52  ;;  %v4602_v52 = vrot.slane %v4153_v41, 6 }
 0x1de   : > { %6179 = vmatmul.mubr.msk.bf16.vlgmr.msra.gmra.mrb[0].mxu0 %vm674_vm1, %v8037_v4 }
 0x1df   : > { %6182 = vmatprep.mubr.msk.bf16.mxu0 %vm674_vm1, %v8069_v14 }
 0x1e3   : > { %5897 = vmatmul.mubr.msk.bf16.gmra.mrb[24].mxu1 %vm674_vm1, %v7712_v23  ;;  %v4605_v23 = vrot.slane %v4163_v47, 5 }
 0x1e4   : > { %5900 = vmatprep.mubr.msk.bf16.mxu1 %vm674_vm1, %v7728_v25  ;;  %v4606_v25 = vrot.slane %v4159_v62, 6 }
 0x1e6   : > { %6183 = vmatmul.mubr.msk.bf16.gmra.mrb[4].mxu0 %vm674_vm1, %v8101_v26 }
 0x1e7   : > { %6186 = vmatprep.mubr.msk.bf16.mxu0 %vm674_vm1, %v8127_v18 }
 0x1eb   : > { %5901 = vmatmul.mubr.msk.bf16.gmra.mrb[28].mxu1 %vm674_vm1, %v9276_v0 }
 0x1ec   : > { %5906 = vmatprep.mubr.msk.bf16.mxu1 %vm674_vm1, %v7821_v63  ;;  %v4607_v63 = vor.u32 %v4606_v25, %v4605_v23 }
 0x1ee   : > { %6187 = vmatmul.mubr.msk.bf16.gmra.mrb[8].mxu0 %vm674_vm1, %v8141_v58 }
 0x1ef   : > { %6190 = vmatprep.mubr.msk.bf16.mxu0 %vm674_vm1, %v8178_v1 }
 0x1f3   : > { %5907 = vmatmul.mubr.msk.bf16.vlgmr.msra.gmra.mrb[0].mxu1 %vm674_vm1, %v7794_v39  ;;  %v4603_v39 = vor.u32 %v4602_v52, %v4601_v16 }
 0x1f4   : > { %5910 = vmatprep.mubr.msk.bf16.mxu1 %vm674_vm1, %v7766_v8  ;;  %v4610_v8 = vshrl.u32 %v8461_v55, 16 }
 0x1f6   : > { %6191 = vmatmul.mubr.msk.bf16.gmra.mrb[12].mxu0 %vm674_vm1, %v8180_v51  ;;  %v4612_v17 = vrot.slane %v4610_v8, 5 }
 0x1f7   : > { %6194 = vmatprep.mubr.msk.bf16.mxu0 %vm674_vm1, %v8212_v53 }
 0x1fb   : > { %5911 = vmatmul.mubr.msk.bf16.gmra.mrb[4].mxu1 %vm674_vm1, %v8037_v4  ;;  %v4613_v4 = vrot.slane %v4169_v12, 6 }
 0x1fc   : > { %5914 = vmatprep.mubr.msk.bf16.mxu1 %vm674_vm1, %v8069_v14  ;;  %v4604_v14 = vrot.slane %v4603_v39, 4 }
 0x1fe   : > { %6195 = vmatmul.mubr.msk.bf16.gmra.mrb[16].mxu0 %vm674_vm1, %v8214_v38  ;;  %v4608_v24 = vsel %vm7734_vm10, %v4604_v14, %v4607_v63 }
 0x1ff   : > { %6198 = vmatprep.mubr.msk.bf16.mxu0 %vm674_vm1, %v8254_v61 }
 0x203   : > { %5915 = vmatmul.mubr.msk.bf16.gmra.mrb[8].mxu1 %vm674_vm1, %v8101_v26  ;;  %v4609_v26 = vrot.slane %v4607_v63, 4 }
 0x204   : > { %5918 = vmatprep.mubr.msk.bf16.mxu1 %vm674_vm1, %v8127_v18  ;;  %v4614_v18 = vor.u32 %v4613_v4, %v4612_v17 }
 0x206   : > { %6199 = vmatmul.mubr.msk.bf16.gmra.mrb[20].mxu0 %vm674_vm1, %v8258_v11  ;;  %v4615_v46 = vsel %vm7734_vm10, %v4609_v26, %v4614_v18 }
 0x207   : > { %6202 = vmatprep.mubr.msk.bf16.mxu0 %vm674_vm1, %v8287_v32 }
 0x20b   : > { %5919 = vmatmul.mubr.msk.bf16.gmra.mrb[12].mxu1 %vm674_vm1, %v8141_v58  ;;  %v5372_v58 = vcombine.low %v4608_v24, %v4615_v46 }
 0x20c   : > { %5922 = vmatprep.mubr.msk.bf16.mxu1 %vm674_vm1, %v8178_v1 }
 0x20e   : > { %6203 = vmatmul.mubr.msk.bf16.gmra.mrb[24].mxu0 %vm674_vm1, %v8291_v57 }
 0x20f   : > { %6206 = vmatprep.mubr.msk.bf16.mxu0 %vm674_vm1, %v8303_v22 }
 0x213   : > { %5923 = vmatmul.mubr.msk.bf16.gmra.mrb[16].mxu1 %vm674_vm1, %v8180_v51 }
 0x214   : > { %5926 = vmatprep.mubr.msk.bf16.mxu1 %vm674_vm1, %v8212_v53 }
 0x216   : > { %6207 = vmatmul.mubr.msk.bf16.gmra.mrb[28].mxu0 %vm674_vm1, %v5372_v58 }
 0x21b   : > { %5927 = vmatmul.mubr.msk.bf16.gmra.mrb[20].mxu1 %vm674_vm1, %v8214_v38 }
 0x21c   : > { %5930 = vmatprep.mubr.msk.bf16.mxu1 %vm674_vm1, %v8254_v61 }
 0x223   : > { %5931 = vmatmul.mubr.msk.bf16.gmra.mrb[24].mxu1 %vm674_vm1, %v8258_v11 }
 0x224   : > { %5934 = vmatprep.mubr.msk.bf16.mxu1 %vm674_vm1, %v8287_v32  ;;  %v8650_v32 = vld [vmem:[%s8759_s2] ss:$0 sm:$0xff] }
 0x22b   : > { %5935 = vmatmul.mubr.msk.bf16.gmra.mrb[28].mxu1 %vm674_vm1, %v8291_v57 }
 0x2b1   : > { %v6180_v28 = vpop.f32.mrb[0].mxu0 }
 0x2b2   : > { %v4667_v1 = vpop.f32.mrb[1].mxu0 }
 0x2b3   : > { %v6181_v51 = vpop.f32.mrb[2].mxu0 }
 0x2b4   : > { %v4670_v53 = vpop.f32.mrb[3].mxu0 }
 0x2b9   : > { %v6184_v22 = vpop.f32.mrb[4].mxu0 }
 0x2ba   : > { %v4683_v54 = vpop.f32.mrb[5].mxu0 }
 0x2bb   : > { %v6185_v38 = vpop.f32.mrb[6].mxu0 }
 0x2bc   : > { %v4686_v41 = vpop.f32.mrb[7].mxu0 }
 0x2c1   : > { %v6188_v47 = vpop.f32.mrb[8].mxu0 }
 0x2c2   : > { %v4699_v61 = vpop.f32.mrb[9].mxu0 }
 0x2c3   : > { %v6189_v62 = vpop.f32.mrb[10].mxu0 }
 0x2c4   : > { %v4702_v55 = vpop.f32.mrb[11].mxu0 }
 0x2c6   : > { %v5908_v11 = vpop.f32.mrb[0].mxu1 }
 0x2c7   : > { %v6210_v57 = vadd.f32 %v6180_v28, %v5908_v11  ;;  %v2889_v30 = vpop.f32.mrb[1].mxu1 }
 0x2c8   : > { %v6211_v43 = vadd.f32 %v4667_v1, %v2889_v30  ;;  %v5909_v12 = vpop.f32.mrb[2].mxu1 }
 0x2c9   : > { %v4835_v49 = vadd.f32 %v6210_v57, %v8650_v32  ;;  %v6212_v20 = vadd.f32 %v6181_v51, %v5909_v12  ;;  %v2892_v50 = vpop.f32.mrb[3].mxu1  ;;  %v6192_v37 = vpop.f32.mrb[12].mxu0 }
 0x2ca   : > { %v4833_v45 = vadd.f32 %v6211_v43, %v8650_v32  ;;  %v6213_v27 = vadd.f32 %v4670_v53, %v2892_v50  ;;  %v4715_v2 = vpop.f32.mrb[13].mxu0 }
 0x2cb   : > { %v4867_v9 = vmax.f32 %v4835_v49, 0.0  ;;  %v4836_v44 = vadd.f32 %v6212_v20, %v8650_v32  ;;  %v6193_v48 = vpop.f32.mrb[14].mxu0 }
 0x2cc   : > { %v4865_v56 = vmax.f32 %v4833_v45, 0.0  ;;  %v4834_v29 = vadd.f32 %v6213_v27, %v8650_v32  ;;  %v4718_v33 = vpop.f32.mrb[15].mxu0 }
 0x2cd   : > { %4900 = vst.msk [vmem:[%s8657_s30 + $0x10] sm:$0xff] %vm4897_vm11, %v4867_v9  ;;  %v4868_v10 = vmax.f32 %v4836_v44, 0.0 }
 0x2ce   : > { %4898 = vst.msk [vmem:[%s8657_s30] sm:$0xff] %vm4897_vm11, %v4865_v56  ;;  %v4866_v15 = vmax.f32 %v4834_v29, 0.0  ;;  %v5912_v21 = vpop.f32.mrb[4].mxu1 }
 0x2cf   : > { %4901 = vst.msk [vmem:[%s8657_s30 + $0x18] sm:$0xff] %vm4897_vm11, %v4868_v10  ;;  %v6214_v3 = vadd.f32 %v6184_v22, %v5912_v21  ;;  %v2905_v35 = vpop.f32.mrb[5].mxu1 }
 0x2d0   : > { %4899 = vst.msk [vmem:[%s8657_s30 + $0x8] sm:$0xff] %vm4897_vm11, %v4866_v15  ;;  %v6215_v5 = vadd.f32 %v4683_v54, %v2905_v35  ;;  %v5913_v7 = vpop.f32.mrb[6].mxu1 }
 0x2d1   : > { %v4839_v31 = vadd.f32 %v6214_v3, %v8650_v32  ;;  %v6216_v40 = vadd.f32 %v6185_v38, %v5913_v7  ;;  %v2908_v34 = vpop.f32.mrb[7].mxu1  ;;  %v6196_v0 = vpop.f32.mrb[16].mxu0 }
 0x2d2   : > { %v4837_v13 = vadd.f32 %v6215_v5, %v8650_v32  ;;  %v6217_v6 = vadd.f32 %v4686_v41, %v2908_v34  ;;  %v4731_v19 = vpop.f32.mrb[17].mxu0 }
 0x2d3   : > { %v4871_v42 = vmax.f32 %v4839_v31, 0.0  ;;  %v4840_v60 = vadd.f32 %v6216_v40, %v8650_v32  ;;  %v6197_v16 = vpop.f32.mrb[18].mxu0 }
 0x2d4   : > { %v4869_v59 = vmax.f32 %v4837_v13, 0.0  ;;  %v4838_v36 = vadd.f32 %v6217_v6, %v8650_v32  ;;  %v4734_v23 = vpop.f32.mrb[19].mxu0 }
 0x2d5   : > { %4904 = vst.msk [vmem:[%s8657_s30 + $0x30] sm:$0xff] %vm4897_vm11, %v4871_v42  ;;  %v4872_v52 = vmax.f32 %v4840_v60, 0.0 }
 0x2d6   : > { %4902 = vst.msk [vmem:[%s8657_s30 + $0x20] sm:$0xff] %vm4897_vm11, %v4869_v59  ;;  %v4870_v25 = vmax.f32 %v4838_v36, 0.0  ;;  %v5916_v8 = vpop.f32.mrb[8].mxu1 }
 0x2d7   : > { %4905 = vst.msk [vmem:[%s8657_s30 + $0x38] sm:$0xff] %vm4897_vm11, %v4872_v52  ;;  %v6218_v39 = vadd.f32 %v6188_v47, %v5916_v8  ;;  %v2921_v63 = vpop.f32.mrb[9].mxu1 }
 0x2d8   : > { %4903 = vst.msk [vmem:[%s8657_s30 + $0x28] sm:$0xff] %vm4897_vm11, %v4870_v25  ;;  %v6219_v17 = vadd.f32 %v4699_v61, %v2921_v63  ;;  %v5917_v4 = vpop.f32.mrb[10].mxu1 }
 0x2d9   : > { %v4843_v14 = vadd.f32 %v6218_v39, %v8650_v32  ;;  %v6220_v26 = vadd.f32 %v6189_v62, %v5917_v4  ;;  %v2924_v18 = vpop.f32.mrb[11].mxu1  ;;  %v6200_v58 = vpop.f32.mrb[20].mxu0 }
 0x2da   : > { %v4841_v24 = vadd.f32 %v6219_v17, %v8650_v32  ;;  %v6221_v46 = vadd.f32 %v4702_v55, %v2924_v18  ;;  %v4747_v51 = vpop.f32.mrb[21].mxu0 }
 0x2db   : > { %v4875_v28 = vmax.f32 %v4843_v14, 0.0  ;;  %v4844_v1 = vadd.f32 %v6220_v26, %v8650_v32  ;;  %v6201_v54 = vpop.f32.mrb[22].mxu0 }
 0x2dc   : > { %v4873_v53 = vmax.f32 %v4841_v24, 0.0  ;;  %v4842_v22 = vadd.f32 %v6221_v46, %v8650_v32  ;;  %v4750_v41 = vpop.f32.mrb[23].mxu0 }
 0x2dd   : > { %4908 = vst.msk [vmem:[%s8657_s30 + $0x50] sm:$0xff] %vm4897_vm11, %v4875_v28  ;;  %v4876_v38 = vmax.f32 %v4844_v1, 0.0 }
 0x2de   : > { %4906 = vst.msk [vmem:[%s8657_s30 + $0x40] sm:$0xff] %vm4897_vm11, %v4873_v53  ;;  %v4874_v47 = vmax.f32 %v4842_v22, 0.0  ;;  %v5920_v61 = vpop.f32.mrb[12].mxu1 }
 0x2df   : > { %4909 = vst.msk [vmem:[%s8657_s30 + $0x58] sm:$0xff] %vm4897_vm11, %v4876_v38  ;;  %v6222_v62 = vadd.f32 %v6192_v37, %v5920_v61  ;;  %v2937_v55 = vpop.f32.mrb[13].mxu1 }
 0x2e0   : > { %4907 = vst.msk [vmem:[%s8657_s30 + $0x48] sm:$0xff] %vm4897_vm11, %v4874_v47  ;;  %v6223_v11 = vadd.f32 %v4715_v2, %v2937_v55  ;;  %v5921_v57 = vpop.f32.mrb[14].mxu1 }
 0x2e1   : > { %v4847_v30 = vadd.f32 %v6222_v62, %v8650_v32  ;;  %v6224_v43 = vadd.f32 %v6193_v48, %v5921_v57  ;;  %v2940_v12 = vpop.f32.mrb[15].mxu1  ;;  %v6204_v50 = vpop.f32.mrb[24].mxu0 }
 0x2e2   : > { %v4845_v49 = vadd.f32 %v6223_v11, %v8650_v32  ;;  %v6225_v20 = vadd.f32 %v4718_v33, %v2940_v12  ;;  %v4763_v37 = vpop.f32.mrb[25].mxu0 }
 0x2e3   : > { %v4879_v45 = vmax.f32 %v4847_v30, 0.0  ;;  %v4848_v27 = vadd.f32 %v6224_v43, %v8650_v32  ;;  %v6205_v2 = vpop.f32.mrb[26].mxu0 }
 0x2e4   : > { %v4877_v9 = vmax.f32 %v4845_v49, 0.0  ;;  %v4846_v44 = vadd.f32 %v6225_v20, %v8650_v32  ;;  %v4766_v29 = vpop.f32.mrb[27].mxu0 }
 0x2e5   : > { %4912 = vst.msk [vmem:[%s8657_s30 + $0x70] sm:$0xff] %vm4897_vm11, %v4879_v45  ;;  %v4880_v56 = vmax.f32 %v4848_v27, 0.0 }
 0x2e6   : > { %4910 = vst.msk [vmem:[%s8657_s30 + $0x60] sm:$0xff] %vm4897_vm11, %v4877_v9  ;;  %v4878_v48 = vmax.f32 %v4846_v44, 0.0  ;;  %v5924_v10 = vpop.f32.mrb[16].mxu1 }
 0x2e7   : > { %4913 = vst.msk [vmem:[%s8657_s30 + $0x78] sm:$0xff] %vm4897_vm11, %v4880_v56  ;;  %v6226_v33 = vadd.f32 %v6196_v0, %v5924_v10  ;;  %v2953_v15 = vpop.f32.mrb[17].mxu1 }
 0x2e8   : > { %4911 = vst.msk [vmem:[%s8657_s30 + $0x68] sm:$0xff] %vm4897_vm11, %v4878_v48  ;;  %v6227_v21 = vadd.f32 %v4731_v19, %v2953_v15  ;;  %v5925_v3 = vpop.f32.mrb[18].mxu1 }
 0x2e9   : > { %v4851_v35 = vadd.f32 %v6226_v33, %v8650_v32  ;;  %v6228_v5 = vadd.f32 %v6197_v16, %v5925_v3  ;;  %v2956_v7 = vpop.f32.mrb[19].mxu1  ;;  %v6208_v34 = vpop.f32.mrb[28].mxu0 }
 0x2ea   : > { %v4849_v31 = vadd.f32 %v6227_v21, %v8650_v32  ;;  %v6229_v40 = vadd.f32 %v4734_v23, %v2956_v7  ;;  %v4779_v0 = vpop.f32.mrb[29].mxu0 }
 0x2eb   : > { %v4883_v13 = vmax.f32 %v4851_v35, 0.0  ;;  %v4852_v6 = vadd.f32 %v6228_v5, %v8650_v32  ;;  %v6209_v19 = vpop.f32.mrb[30].mxu0 }
 0x2ec   : > { %v4881_v42 = vmax.f32 %v4849_v31, 0.0  ;;  %v4850_v60 = vadd.f32 %v6229_v40, %v8650_v32  ;;  %v4782_v36 = vpop.f32.mrb[31].mxu0 }
 0x2ed   : > { %4916 = vst.msk [vmem:[%s8657_s30 + $0x90] sm:$0xff] %vm4897_vm11, %v4883_v13  ;;  %v4884_v59 = vmax.f32 %v4852_v6, 0.0 }
 0x2ee   : > { %4914 = vst.msk [vmem:[%s8657_s30 + $0x80] sm:$0xff] %vm4897_vm11, %v4881_v42  ;;  %v4882_v16 = vmax.f32 %v4850_v60, 0.0  ;;  %v5928_v52 = vpop.f32.mrb[20].mxu1 }
 0x2ef   : > { %4917 = vst.msk [vmem:[%s8657_s30 + $0x98] sm:$0xff] %vm4897_vm11, %v4884_v59  ;;  %v6230_v23 = vadd.f32 %v6200_v58, %v5928_v52  ;;  %v2969_v25 = vpop.f32.mrb[21].mxu1 }
 0x2f0   : > { %4915 = vst.msk [vmem:[%s8657_s30 + $0x88] sm:$0xff] %vm4897_vm11, %v4882_v16  ;;  %v6231_v8 = vadd.f32 %v4747_v51, %v2969_v25  ;;  %v5929_v39 = vpop.f32.mrb[22].mxu1 }
 0x2f1   : > { %v4855_v63 = vadd.f32 %v6230_v23, %v8650_v32  ;;  %v6232_v17 = vadd.f32 %v6201_v54, %v5929_v39  ;;  %v2972_v4 = vpop.f32.mrb[23].mxu1 }
 0x2f2   : > { %v4853_v14 = vadd.f32 %v6231_v8, %v8650_v32  ;;  %v6233_v26 = vadd.f32 %v4750_v41, %v2972_v4 }
 0x2f3   : > { %v4887_v18 = vmax.f32 %v4855_v63, 0.0  ;;  %v4856_v24 = vadd.f32 %v6232_v17, %v8650_v32 }
 0x2f4   : > { %v4885_v46 = vmax.f32 %v4853_v14, 0.0  ;;  %v4854_v58 = vadd.f32 %v6233_v26, %v8650_v32 }
 0x2f5   : > { %4920 = vst.msk [vmem:[%s8657_s30 + $0xb0] sm:$0xff] %vm4897_vm11, %v4887_v18  ;;  %v4888_v28 = vmax.f32 %v4856_v24, 0.0 }
 0x2f6   : > { %4918 = vst.msk [vmem:[%s8657_s30 + $0xa0] sm:$0xff] %vm4897_vm11, %v4885_v46  ;;  %v4886_v1 = vmax.f32 %v4854_v58, 0.0  ;;  %v5932_v51 = vpop.f32.mrb[24].mxu1 }
 0x2f7   : > { %4921 = vst.msk [vmem:[%s8657_s30 + $0xb8] sm:$0xff] %vm4897_vm11, %v4888_v28  ;;  %v6234_v53 = vadd.f32 %v6204_v50, %v5932_v51  ;;  %v2985_v22 = vpop.f32.mrb[25].mxu1 }
 0x2f8   : > { %4919 = vst.msk [vmem:[%s8657_s30 + $0xa8] sm:$0xff] %vm4897_vm11, %v4886_v1  ;;  %v6235_v54 = vadd.f32 %v4763_v37, %v2985_v22  ;;  %v5933_v38 = vpop.f32.mrb[26].mxu1 }
 0x2f9   : > { %v4859_v41 = vadd.f32 %v6234_v53, %v8650_v32  ;;  %v6236_v47 = vadd.f32 %v6205_v2, %v5933_v38  ;;  %v2988_v61 = vpop.f32.mrb[27].mxu1 }
 0x2fa   : > { %v4857_v62 = vadd.f32 %v6235_v54, %v8650_v32  ;;  %v6237_v55 = vadd.f32 %v4766_v29, %v2988_v61 }
 0x2fb   : > { %v4891_v11 = vmax.f32 %v4859_v41, 0.0  ;;  %v4860_v57 = vadd.f32 %v6236_v47, %v8650_v32 }
 0x2fc   : > { %v4889_v30 = vmax.f32 %v4857_v62, 0.0  ;;  %v4858_v43 = vadd.f32 %v6237_v55, %v8650_v32 }
 0x2fd   : > { %4924 = vst.msk [vmem:[%s8657_s30 + $0xd0] sm:$0xff] %vm4897_vm11, %v4891_v11  ;;  %v4892_v12 = vmax.f32 %v4860_v57, 0.0 }
 0x2fe   : > { %4922 = vst.msk [vmem:[%s8657_s30 + $0xc0] sm:$0xff] %vm4897_vm11, %v4889_v30  ;;  %v4890_v49 = vmax.f32 %v4858_v43, 0.0  ;;  %v5936_v20 = vpop.f32.mrb[28].mxu1 }
 0x2ff   : > { %4925 = vst.msk [vmem:[%s8657_s30 + $0xd8] sm:$0xff] %vm4897_vm11, %v4892_v12  ;;  %v6238_v50 = vadd.f32 %v6208_v34, %v5936_v20  ;;  %v3001_v45 = vpop.f32.mrb[29].mxu1 }
 0x300   : > { %4923 = vst.msk [vmem:[%s8657_s30 + $0xc8] sm:$0xff] %vm4897_vm11, %v4890_v49  ;;  %v6239_v27 = vadd.f32 %v4779_v0, %v3001_v45  ;;  %v5937_v37 = vpop.f32.mrb[30].mxu1 }
 0x301   : > { %v4863_v9 = vadd.f32 %v6238_v50, %v8650_v32  ;;  %v6240_v44 = vadd.f32 %v6209_v19, %v5937_v37  ;;  %v3004_v2 = vpop.f32.mrb[31].mxu1 }
 0x302   : > { %v4861_v56 = vadd.f32 %v6239_v27, %v8650_v32  ;;  %v6241_v29 = vadd.f32 %v4782_v36, %v3004_v2 }
 0x303   : > { %v4895_v48 = vmax.f32 %v4863_v9, 0.0  ;;  %v4864_v10 = vadd.f32 %v6240_v44, %v8650_v32 }
 0x304   : > { %v4893_v33 = vmax.f32 %v4861_v56, 0.0  ;;  %v4862_v15 = vadd.f32 %v6241_v29, %v8650_v32 }
 0x305   : > { %4928 = vst.msk [vmem:[%s8657_s30 + $0xf0] sm:$0xff] %vm4897_vm11, %v4895_v48  ;;  %v4896_v21 = vmax.f32 %v4864_v10, 0.0 }
 0x306   : > { %4926 = vst.msk [vmem:[%s8657_s30 + $0xe0] sm:$0xff] %vm4897_vm11, %v4893_v33  ;;  %v4894_v3 = vmax.f32 %v4862_v15, 0.0 }
 0x307   : > { %4929 = vst.msk [vmem:[%s8657_s30 + $0xf8] sm:$0xff] %vm4897_vm11, %v4896_v21 }
 0x308   : > { %4927 = vst.msk [vmem:[%s8657_s30 + $0xe8] sm:$0xff] %vm4897_vm11, %v4894_v3 }
 0x309 PF: > { %s13_s12 = sadd.s32 1, %s6779_s12  }
 0x30a   : > { %p10_p4 = scmp.ge.s32.totalorder %s13_s12, 4  }
 0x30c   :  { %12 = sbr.rel (!%p10_p4) target bundleno = 1 (0x1), region = 77 }

</bundles_post_ra>
